<compile_context>
chip_gen: v7x
topology: tpu7x:2x2x1
jax: 0.10.0
libtpu: 0.0.40
codegen_flags: <defaults>
</compile_context>

<pallas_src>
import numpy as np
import jax
import jax.numpy as jnp
from jax.experimental import pallas as pl
from jax.experimental.pallas import tpu as pltpu

# ----------------------------- static config --------------------------------
EMBED_DIM  = 128                      # transformer embed dim
N_HEADS    = 4
HEAD_DIM   = EMBED_DIM // N_HEADS
MLP_HIDDEN = 256
N_LAYERS   = 2
NUM_FREQS  = 12                       # Embedder(num_freqs=12, include_input=True, dims=3)
PSENC_DIM  = 3 + 3 * 2 * NUM_FREQS    # 75
ENC_DIM    = EMBED_DIM - PSENC_DIM    # 53  (cat([xs_emb, xs_psenc]) must equal embed_dim)
RANK       = 8                        # n_weight_groups (rank of low-rank modulation)
NUM_GROUPS = RANK                     # num_group_total (single modulated layer)
HYPO_HID   = 64                       # hyponet hidden width (fan_in == fan_out of modulated layer)
HYPO_OUT   = 2                        # occ head logits
HID_PAD    = 128                      # hidden padded to full lane width (extra lanes carry zeros)
OUT_PAD    = 128                      # lane-dense output (sliced back to HYPO_OUT in JAX)
LN_EPS     = 1e-5
MAX_POINT_TILE = 1024                 # hyponet point-tile size (rows per grid step)

BF16 = jnp.bfloat16


# ------------------------------ small helpers --------------------------------
def _round_up(x, m):
    return ((x + m - 1) // m) * m


def _full_spec(shape):
    """BlockSpec covering the whole (un-tiled) parameter array (constant index_map)."""
    nd = len(shape)
    # TODO(synk): pipeline_mode=pl.Buffered(1) would avoid double-buffering these
    # constant-index weights; skipped to keep lowering maximally portable.
    return pl.BlockSpec(shape, lambda *_: (0,) * nd)


def _layernorm(x, g, b):
    mu = jnp.mean(x, axis=-1, keepdims=True)
    var = jnp.mean(jnp.square(x - mu), axis=-1, keepdims=True)
    return (x - mu) * jax.lax.rsqrt(var + LN_EPS) * g + b


def nerf_embed(x):
    """NeRF-style Embedder (JAX side, used for the encoder-token positional enc)."""
    feats = [x]
    for i in range(NUM_FREQS):
        f = float(2.0 ** i)
        feats.append(jnp.sin(x * f))
        feats.append(jnp.cos(x * f))
    return jnp.concatenate(feats, axis=-1)  # (..., 75)


def _fourier_consts():
    """Per-axis frequency rows + column masks so the Fourier embedding can be
    evaluated inside the hyponet kernel with broadcasts only (no in-kernel concat):
        P  = x*fx + y*fy + z*fz                      (TN, 75)
        ff = im*P + sm*sin(P) + cm*cos(P)            (TN, 75)
    Column order matches nerf_embed: [xyz, sin(f0*xyz), cos(f0*xyz), sin(f1*xyz), ...]."""
    fx = np.zeros((1, PSENC_DIM), np.float32)
    fy = np.zeros((1, PSENC_DIM), np.float32)
    fz = np.zeros((1, PSENC_DIM), np.float32)
    im = np.zeros((1, PSENC_DIM), np.float32)
    sm = np.zeros((1, PSENC_DIM), np.float32)
    cm = np.zeros((1, PSENC_DIM), np.float32)
    fx[0, 0] = fy[0, 1] = fz[0, 2] = 1.0
    im[0, 0:3] = 1.0
    col = 3
    for i in range(NUM_FREQS):
        f = float(2.0 ** i)
        fx[0, col], fy[0, col + 1], fz[0, col + 2] = f, f, f
        sm[0, col:col + 3] = 1.0
        col += 3
        fx[0, col], fy[0, col + 1], fz[0, col + 2] = f, f, f
        cm[0, col:col + 3] = 1.0
        col += 3
    return fx, fy, fz, im, sm, cm


_FOURIER_CONSTS = _fourier_consts()


# --------- 1) fused transformer (both layers) + group-modulation kernel -------
def transformer_mod_kernel(tok_ref,
                           ln1g, ln1b, wqkv, bqkv, wo, bo,
                           ln2g, ln2b, wm1, bm1, wm2, bm2,
                           plng, plnb, pw, pb, sf,
                           out_ref):
    x = tok_ref[0]                                   # (S, D) f32, stays VMEM-resident
    S = x.shape[0]
    scale = HEAD_DIM ** -0.5

    for l in range(N_LAYERS):
        # ---- pre-LN multi-head self attention (bf16 matmuls, f32 accumulation) ----
        xn = _layernorm(x, ln1g[l], ln1b[l])
        qkv = jnp.dot(xn.astype(BF16), wqkv[l],
                      preferred_element_type=jnp.float32) + bqkv[l]      # (S, 3D) f32
        q = qkv[:, :EMBED_DIM]
        k = qkv[:, EMBED_DIM:2 * EMBED_DIM]
        v = qkv[:, 2 * EMBED_DIM:]
        wo_l = wo[l]                                                     # (D, D) bf16
        attn = jnp.zeros_like(x)
        # TODO(synk): for large S (>~2k) tile the KV dim flash-attention style
        # instead of materializing the full (S, S) score matrix per head.
        for h in range(N_HEADS):
            sl = slice(h * HEAD_DIM, (h + 1) * HEAD_DIM)
            qh = q[:, sl].astype(BF16)
            kh = k[:, sl].astype(BF16)
            vh = v[:, sl].astype(BF16)
            # q @ k^T without an explicit transpose.
            s = jax.lax.dot_general(qh, kh, (((1,), (1,)), ((), ())),
                                    preferred_element_type=jnp.float32) * scale
            s = s - jnp.max(s, axis=-1, keepdims=True)
            p = jnp.exp(s)
            p = p * pl.reciprocal(jnp.sum(p, axis=-1, keepdims=True), approx=True)
            oh = jnp.dot(p.astype(BF16), vh, preferred_element_type=jnp.float32)
            # fold the head directly into the output projection (no concat)
            attn = attn + jnp.dot(oh.astype(BF16), wo_l[sl, :],
                                  preferred_element_type=jnp.float32)
        x = x + attn + bo[l]

        # ---- pre-LN MLP ----
        xn2 = _layernorm(x, ln2g[l], ln2b[l])
        h1 = jnp.dot(xn2.astype(BF16), wm1[l],
                     preferred_element_type=jnp.float32) + bm1[l]
        # TODO(synk): torch.nn.GELU default is the exact erf form; tanh approx used here.
        h1 = jax.nn.gelu(h1, approximate=True)
        x = x + jnp.dot(h1.astype(BF16), wm2[l],
                        preferred_element_type=jnp.float32) + bm2[l]

    # ---- predict_group_modulations on the last NUM_GROUPS tokens ----
    g = x[S - NUM_GROUPS:, :]                                            # (G, D)
    gn = _layernorm(g, plng[...], plnb[...])
    m = jnp.dot(gn.astype(BF16), pw[...],
                preferred_element_type=jnp.float32) + pb[...]            # (G, HID_PAD)
    # m^T @ shared_factor as a dot_general contracting dim 0 of both (no transpose).
    out_ref[0] = jax.lax.dot_general(m.astype(BF16), sf[...],
                                     (((0,), (0,)), ((), ())),
                                     preferred_element_type=jnp.float32)  # (HID_PAD, HID_PAD)


def transformer_and_modulation(tokens, params):
    """tokens: (B, S, 128) f32  ->  modulated weight (B, HID_PAD, HID_PAD) f32 (zero-padded)."""
    B, S, D = tokens.shape
    layers = params["transformer_layers"]

    def stack(key, dt=None):
        a = jnp.stack([lp[key] for lp in layers], axis=0)
        return a.astype(dt) if dt is not None else a

    pad_hid = HID_PAD - HYPO_HID
    weights = [
        stack("ln1_g"), stack("ln1_b"),
        stack("w_qkv", BF16), stack("b_qkv"),
        stack("w_o", BF16), stack("b_o"),
        stack("ln2_g"), stack("ln2_b"),
        stack("w_mlp1", BF16), stack("b_mlp1"),
        stack("w_mlp2", BF16), stack("b_mlp2"),
        params["postfc_ln_g"], params["postfc_ln_b"],
        jnp.pad(params["postfc_w"], ((0, 0), (0, pad_hid))).astype(BF16),
        jnp.pad(params["postfc_b"], ((0, 0), (0, pad_hid))),
        jnp.pad(params["shared_factor"], ((0, 0), (0, pad_hid))).astype(BF16),
    ]
    in_specs = [pl.BlockSpec((1, S, D), lambda b: (b, 0, 0))] + \
               [_full_spec(w.shape) for w in weights]
    return pl.pallas_call(
        transformer_mod_kernel,
        out_shape=jax.ShapeDtypeStruct((B, HID_PAD, HID_PAD), jnp.float32),
        grid_spec=pltpu.PrefetchScalarGridSpec(
            num_scalar_prefetch=0,
            grid=(B,),
            in_specs=in_specs,
            out_specs=pl.BlockSpec((1, HID_PAD, HID_PAD), lambda b: (b, 0, 0))),
        compiler_params=pltpu.CompilerParams(dimension_semantics=("parallel",)),
    )(tokens, *weights)


# --------------------- 2) HypoNet (modulated coordinate MLP) ------------------
def hyponet_kernel(coord_ref, modw_ref,
                   fx_ref, fy_ref, fz_ref, im_ref, sm_ref, cm_ref,
                   w0_ref, b0_ref, b1_ref, w2_ref, b2_ref,
                   out_ref):
    xyz = coord_ref[0]                                                  # (TN, 3) f32
    # Fused Fourier embedding (f32, EUP sin/cos): P[:, c] = xyz[:, dim(c)] * freq(c)
    P = (xyz[:, 0:1] * fx_ref[...] +
         xyz[:, 1:2] * fy_ref[...] +
         xyz[:, 2:3] * fz_ref[...])                                     # (TN, 75)
    ff = im_ref[...] * P + sm_ref[...] * jnp.sin(P) + cm_ref[...] * jnp.cos(P)

    h = jnp.dot(ff.astype(BF16), w0_ref[...],
                preferred_element_type=jnp.float32) + b0_ref[...]       # (TN, 128)
    h = jnp.maximum(h, 0.0)

    mw = modw_ref[0].astype(BF16)                                       # (128, 128) modulated weight
    h = jnp.dot(h.astype(BF16), mw,
                preferred_element_type=jnp.float32) + b1_ref[...]
    h = jnp.maximum(h, 0.0)

    out = jnp.dot(h.astype(BF16), w2_ref[...],
                  preferred_element_type=jnp.float32) + b2_ref[...]     # (TN, 128) lane-dense
    out_ref[0] = out


def hyponet_forward(coord, mod_w1, params):
    """coord: (B, N, 3), mod_w1: (B, HID_PAD, HID_PAD) -> logits (B, N, HYPO_OUT)."""
    B, N, _ = coord.shape
    TN = min(MAX_POINT_TILE, _round_up(N, 8))
    Np = _round_up(N, TN)
    if Np != N:
        coord = jnp.pad(coord, ((0, 0), (0, Np - N), (0, 0)))
    n_tiles = Np // TN

    pad_hid = HID_PAD - HYPO_HID
    pad_out = OUT_PAD - HYPO_OUT
    fx, fy, fz, im, sm, cm = (jnp.asarray(a) for a in _FOURIER_CONSTS)
    weights = [
        fx, fy, fz, im, sm, cm,
        jnp.pad(params["hypo_w0"], ((0, 0), (0, pad_hid))).astype(BF16),   # (75, 128)
        jnp.pad(params["hypo_b0"], ((0, 0), (0, pad_hid))),                # (1, 128)
        jnp.pad(params["hypo_b1"], ((0, 0), (0, pad_hid))),                # (1, 128)
        jnp.pad(params["hypo_w2"], ((0, pad_hid), (0, pad_out))).astype(BF16),  # (128, 128)
        jnp.pad(params["hypo_b2"], ((0, 0), (0, pad_out))),                # (1, 128)
    ]
    in_specs = [
        pl.BlockSpec((1, TN, 3), lambda b, n: (b, n, 0)),
        pl.BlockSpec((1, HID_PAD, HID_PAD), lambda b, n: (b, 0, 0)),
    ] + [_full_spec(w.shape) for w in weights]

    out = pl.pallas_call(
        hyponet_kernel,
        out_shape=jax.ShapeDtypeStruct((B, Np, OUT_PAD), jnp.float32),
        grid_spec=pltpu.PrefetchScalarGridSpec(
            num_scalar_prefetch=0,
            grid=(B, n_tiles),
            in_specs=in_specs,
            out_specs=pl.BlockSpec((1, TN, OUT_PAD), lambda b, n: (b, n, 0))),
        compiler_params=pltpu.CompilerParams(
            dimension_semantics=("parallel", "parallel")),
    )(coord, mod_w1, *weights)
    return out[:, :N, :HYPO_OUT]


# ------------------------------ parameters ------------------------------------
def init_params(key):
    ks = jax.random.split(key, 16)

    def lin(k, i, o):
        return (jax.random.normal(k, (i, o), jnp.float32) / jnp.sqrt(float(i))).astype(jnp.float32)

    p = {}
    # TODO(synk): DataEncoder internals unavailable; use a per-point linear projection as the data embedding.
    p["enc_w"] = lin(ks[0], 3, ENC_DIM)
    p["enc_b"] = jnp.zeros((ENC_DIM,), jnp.float32)
    # WeightGroups learnable tokens (num_group_total, embed_dim)
    p["weight_tokens"] = 0.02 * jax.random.normal(ks[1], (NUM_GROUPS, EMBED_DIM), jnp.float32)
    # AttentionStack
    layers = []
    for l in range(N_LAYERS):
        k0, k1, k2, k3 = jax.random.split(ks[2 + l], 4)
        layers.append(dict(
            ln1_g=jnp.ones((1, EMBED_DIM), jnp.float32), ln1_b=jnp.zeros((1, EMBED_DIM), jnp.float32),
            w_qkv=lin(k0, EMBED_DIM, 3 * EMBED_DIM),     b_qkv=jnp.zeros((1, 3 * EMBED_DIM), jnp.float32),
            w_o=lin(k1, EMBED_DIM, EMBED_DIM),           b_o=jnp.zeros((1, EMBED_DIM), jnp.float32),
            ln2_g=jnp.ones((1, EMBED_DIM), jnp.float32), ln2_b=jnp.zeros((1, EMBED_DIM), jnp.float32),
            w_mlp1=lin(k2, EMBED_DIM, MLP_HIDDEN),       b_mlp1=jnp.zeros((1, MLP_HIDDEN), jnp.float32),
            w_mlp2=lin(k3, MLP_HIDDEN, EMBED_DIM),       b_mlp2=jnp.zeros((1, EMBED_DIM), jnp.float32),
        ))
    p["transformer_layers"] = layers
    # group_modulation_postfc = LayerNorm(embed_dim) + Linear(embed_dim, fan_in)
    p["postfc_ln_g"] = jnp.ones((1, EMBED_DIM), jnp.float32)
    p["postfc_ln_b"] = jnp.zeros((1, EMBED_DIM), jnp.float32)
    p["postfc_w"] = lin(ks[8], EMBED_DIM, HYPO_HID)
    p["postfc_b"] = jnp.zeros((1, HYPO_HID), jnp.float32)
    # shared_factor: randn(1, rank, fan_out) / sqrt(rank * fan_in)
    p["shared_factor"] = (jax.random.normal(ks[9], (RANK, HYPO_HID), jnp.float32)
                          / jnp.sqrt(float(RANK * HYPO_HID)))
    # HypoNet base params (weight and bias stored separately; no bias-row slicing).
    p["hypo_w0"] = lin(ks[10], PSENC_DIM, HYPO_HID)
    p["hypo_b0"] = jnp.zeros((1, HYPO_HID), jnp.float32)
    # Modulated layer: base weight ignored (ignore_base_param=True); only its bias is used.
    p["hypo_b1"] = jnp.zeros((1, HYPO_HID), jnp.float32)
    p["hypo_w2"] = lin(ks[12], HYPO_HID, HYPO_OUT)
    p["hypo_b2"] = jnp.zeros((1, HYPO_OUT), jnp.float32)
    return p


# -------------------------------- forward -------------------------------------
@jax.jit
def low_rank_modulated_transinr_forward(params, xs, coord):
    """xs: (B, N, C) occ samples (only used for batch/num_onsurface); coord: (B, N, 3)."""
    B = xs.shape[0]
    num_onsurface = xs.shape[1] // 2
    xs_xyz = coord[:, :num_onsurface, :]                               # (B, n_on, 3)
    # TODO(synk): the encoder-token embedding could also be fused into the transformer
    # kernel (read 3 floats/token instead of 128); kept in JAX since it is read once.
    xs_emb = xs_xyz @ params["enc_w"] + params["enc_b"]                # (B, n_on, ENC_DIM)
    xs_psenc = nerf_embed(xs_xyz)                                      # (B, n_on, 75)
    xs_latent = jnp.concatenate([xs_emb, xs_psenc], axis=-1)           # (B, n_on, 128)
    wt = jnp.broadcast_to(params["weight_tokens"][None],
                          (B, NUM_GROUPS, EMBED_DIM))
    tokens = jnp.concatenate([xs_latent, wt], axis=1)                  # (B, S, 128)

    # Fused: both transformer layers + LN/Linear/low-rank bmm modulation head.
    mod_w1 = transformer_and_modulation(tokens, params)                # (B, 128, 128) zero-padded

    # TODO(synk): hyponet fourier_mapping config unavailable; reuse the NeRF embedder (in-kernel).
    out = hyponet_forward(coord, mod_w1, params)                       # (B, N, 2)
    return out


# ---------------------------------- main ---------------------------------------
if __name__ == "__main__":
    key = jax.random.PRNGKey(0)
    kp, kx, kc = jax.random.split(key, 3)
    params = init_params(kp)

    B, N, C = 2, 16, 4
    xs = jax.random.normal(kx, (B, N, C), jnp.float32)                          # occ/sdf samples
    coord = jax.random.uniform(kc, (B, N, 3), jnp.float32, minval=-1.0, maxval=1.0)

    out = low_rank_modulated_transinr_forward(params, xs, coord)
    jax.block_until_ready(out)
    assert out.shape == (B, N, HYPO_OUT) and out.dtype == jnp.float32
    assert bool(jnp.all(jnp.isfinite(out)))
    print("KERNEL_OK")
</pallas_src>

<mosaic_0001>
module attributes {stable_mosaic.version = 11 : i64} {
  func.func @transformer_mod_kernel(%arg0: i32, %arg1: memref<1x16x128xf32, #tpu.memory_space<vmem>>, %arg2: memref<2x1x128xf32, #tpu.memory_space<vmem>>, %arg3: memref<2x1x128xf32, #tpu.memory_space<vmem>>, %arg4: memref<2x128x384xbf16, #tpu.memory_space<vmem>>, %arg5: memref<2x1x384xf32, #tpu.memory_space<vmem>>, %arg6: memref<2x128x128xbf16, #tpu.memory_space<vmem>>, %arg7: memref<2x1x128xf32, #tpu.memory_space<vmem>>, %arg8: memref<2x1x128xf32, #tpu.memory_space<vmem>>, %arg9: memref<2x1x128xf32, #tpu.memory_space<vmem>>, %arg10: memref<2x128x256xbf16, #tpu.memory_space<vmem>>, %arg11: memref<2x1x256xf32, #tpu.memory_space<vmem>>, %arg12: memref<2x256x128xbf16, #tpu.memory_space<vmem>>, %arg13: memref<2x1x128xf32, #tpu.memory_space<vmem>>, %arg14: memref<1x128xf32, #tpu.memory_space<vmem>>, %arg15: memref<1x128xf32, #tpu.memory_space<vmem>>, %arg16: memref<128x128xbf16, #tpu.memory_space<vmem>>, %arg17: memref<1x128xf32, #tpu.memory_space<vmem>>, %arg18: memref<8x128xbf16, #tpu.memory_space<vmem>>, %arg19: memref<1x128x128xf32, #tpu.memory_space<vmem>>) attributes {dimension_semantics = [#tpu.dimension_semantics<parallel>], iteration_bounds = array<i64: 2>, scalar_prefetch = 0 : i64, scratch_operands = 0 : i64, tpu.core_type = #tpu.core_type<tc>, window_params = [{transform_indices = @transform_0, window_bounds = array<i64: 1, 16, 128>}, {pipeline_mode = #tpu.pipeline_mode<synchronous>, transform_indices = @transform_1, window_bounds = array<i64: 2, 1, 128>}, {pipeline_mode = #tpu.pipeline_mode<synchronous>, transform_indices = @transform_2, window_bounds = array<i64: 2, 1, 128>}, {pipeline_mode = #tpu.pipeline_mode<synchronous>, transform_indices = @transform_3, window_bounds = array<i64: 2, 128, 384>}, {pipeline_mode = #tpu.pipeline_mode<synchronous>, transform_indices = @transform_4, window_bounds = array<i64: 2, 1, 384>}, {pipeline_mode = #tpu.pipeline_mode<synchronous>, transform_indices = @transform_5, window_bounds = array<i64: 2, 128, 128>}, {pipeline_mode = #tpu.pipeline_mode<synchronous>, transform_indices = @transform_6, window_bounds = array<i64: 2, 1, 128>}, {pipeline_mode = #tpu.pipeline_mode<synchronous>, transform_indices = @transform_7, window_bounds = array<i64: 2, 1, 128>}, {pipeline_mode = #tpu.pipeline_mode<synchronous>, transform_indices = @transform_8, window_bounds = array<i64: 2, 1, 128>}, {pipeline_mode = #tpu.pipeline_mode<synchronous>, transform_indices = @transform_9, window_bounds = array<i64: 2, 128, 256>}, {pipeline_mode = #tpu.pipeline_mode<synchronous>, transform_indices = @transform_10, window_bounds = array<i64: 2, 1, 256>}, {pipeline_mode = #tpu.pipeline_mode<synchronous>, transform_indices = @transform_11, window_bounds = array<i64: 2, 256, 128>}, {pipeline_mode = #tpu.pipeline_mode<synchronous>, transform_indices = @transform_12, window_bounds = array<i64: 2, 1, 128>}, {pipeline_mode = #tpu.pipeline_mode<synchronous>, transform_indices = @transform_13, window_bounds = array<i64: 1, 128>}, {pipeline_mode = #tpu.pipeline_mode<synchronous>, transform_indices = @transform_14, window_bounds = array<i64: 1, 128>}, {pipeline_mode = #tpu.pipeline_mode<synchronous>, transform_indices = @transform_15, window_bounds = array<i64: 128, 128>}, {pipeline_mode = #tpu.pipeline_mode<synchronous>, transform_indices = @transform_16, window_bounds = array<i64: 1, 128>}, {pipeline_mode = #tpu.pipeline_mode<synchronous>, transform_indices = @transform_17, window_bounds = array<i64: 8, 128>}, {transform_indices = @transform_18, window_bounds = array<i64: 1, 128, 128>}]} {
    %c0 = arith.constant 0 : index
    %c0_0 = arith.constant 0 : index
    %c0_1 = arith.constant 0 : index
    %0 = vector.load %arg1[%c0, %c0_0, %c0_1] : memref<1x16x128xf32, #tpu.memory_space<vmem>>, vector<1x16x128xf32>
    %1 = vector.shape_cast %0 : vector<1x16x128xf32> to vector<16x128xf32>
    %c0_2 = arith.constant 0 : index
    %c0_3 = arith.constant 0 : index
    %c0_4 = arith.constant 0 : index
    %2 = vector.load %arg2[%c0_2, %c0_3, %c0_4] : memref<2x1x128xf32, #tpu.memory_space<vmem>>, vector<1x1x128xf32>
    %3 = vector.shape_cast %2 : vector<1x1x128xf32> to vector<1x128xf32>
    %c0_5 = arith.constant 0 : index
    %c0_6 = arith.constant 0 : index
    %c0_7 = arith.constant 0 : index
    %4 = vector.load %arg3[%c0_5, %c0_6, %c0_7] : memref<2x1x128xf32, #tpu.memory_space<vmem>>, vector<1x1x128xf32>
    %5 = vector.shape_cast %4 : vector<1x1x128xf32> to vector<1x128xf32>
    %cst = arith.constant dense<0.000000e+00> : vector<16xf32>
    %6 = vector.multi_reduction <add>, %1, %cst [1] : vector<16x128xf32> to vector<16xf32>
    %7 = vector.shape_cast %6 : vector<16xf32> to vector<16x1xf32>
    %cst_8 = arith.constant 1.280000e+02 : f32
    %8 = vector.broadcast %cst_8 : f32 to vector<16x1xf32>
    %9 = arith.divf %7, %8 : vector<16x1xf32>
    %10 = vector.broadcast %9 : vector<16x1xf32> to vector<16x128xf32>
    %11 = arith.subf %1, %10 : vector<16x128xf32>
    %12 = arith.mulf %11, %11 : vector<16x128xf32>
    %cst_9 = arith.constant dense<0.000000e+00> : vector<16xf32>
    %13 = vector.multi_reduction <add>, %12, %cst_9 [1] : vector<16x128xf32> to vector<16xf32>
    %14 = vector.shape_cast %13 : vector<16xf32> to vector<16x1xf32>
    %cst_10 = arith.constant 1.280000e+02 : f32
    %15 = vector.broadcast %cst_10 : f32 to vector<16x1xf32>
    %16 = arith.divf %14, %15 : vector<16x1xf32>
    %17 = vector.broadcast %9 : vector<16x1xf32> to vector<16x128xf32>
    %18 = arith.subf %1, %17 : vector<16x128xf32>
    %cst_11 = arith.constant 9.99999974E-6 : f32
    %19 = vector.broadcast %cst_11 : f32 to vector<16x1xf32>
    %20 = arith.addf %16, %19 : vector<16x1xf32>
    %21 = math.rsqrt %20 : vector<16x1xf32>
    %22 = vector.broadcast %21 : vector<16x1xf32> to vector<16x128xf32>
    %23 = arith.mulf %18, %22 : vector<16x128xf32>
    %24 = vector.broadcast %3 : vector<1x128xf32> to vector<16x128xf32>
    %25 = arith.mulf %23, %24 : vector<16x128xf32>
    %26 = vector.broadcast %5 : vector<1x128xf32> to vector<16x128xf32>
    %27 = arith.addf %25, %26 : vector<16x128xf32>
    %28 = arith.truncf %27 : vector<16x128xf32> to vector<16x128xbf16>
    %c0_12 = arith.constant 0 : index
    %c0_13 = arith.constant 0 : index
    %c0_14 = arith.constant 0 : index
    %29 = vector.load %arg4[%c0_12, %c0_13, %c0_14] : memref<2x128x384xbf16, #tpu.memory_space<vmem>>, vector<1x128x384xbf16>
    %30 = vector.shape_cast %29 : vector<1x128x384xbf16> to vector<128x384xbf16>
    %cst_15 = arith.constant dense<0.000000e+00> : vector<16x384xf32>
    %31 = tpu.matmul %28, %30, %cst_15 {dimension_numbers = #tpu.dot_dimension_numbers<[1], [0], [0], [1], [0, 0, 1, 1], [], []>} : vector<16x128xbf16>, vector<128x384xbf16>, vector<16x384xf32> -> vector<16x384xf32>
    %c0_16 = arith.constant 0 : index
    %c0_17 = arith.constant 0 : index
    %c0_18 = arith.constant 0 : index
    %32 = vector.load %arg5[%c0_16, %c0_17, %c0_18] : memref<2x1x384xf32, #tpu.memory_space<vmem>>, vector<1x1x384xf32>
    %33 = vector.shape_cast %32 : vector<1x1x384xf32> to vector<1x384xf32>
    %34 = vector.broadcast %33 : vector<1x384xf32> to vector<16x384xf32>
    %35 = arith.addf %31, %34 : vector<16x384xf32>
    %36 = vector.extract_strided_slice %35 {offsets = [0, 0], sizes = [16, 128], strides = [1, 1]} : vector<16x384xf32> to vector<16x128xf32>
    %37 = vector.extract_strided_slice %35 {offsets = [0, 128], sizes = [16, 128], strides = [1, 1]} : vector<16x384xf32> to vector<16x128xf32>
    %38 = vector.extract_strided_slice %35 {offsets = [0, 256], sizes = [16, 128], strides = [1, 1]} : vector<16x384xf32> to vector<16x128xf32>
    %c0_19 = arith.constant 0 : index
    %c0_20 = arith.constant 0 : index
    %c0_21 = arith.constant 0 : index
    %39 = vector.load %arg6[%c0_19, %c0_20, %c0_21] : memref<2x128x128xbf16, #tpu.memory_space<vmem>>, vector<1x128x128xbf16>
    %40 = vector.shape_cast %39 : vector<1x128x128xbf16> to vector<128x128xbf16>
    %cst_22 = arith.constant 0.000000e+00 : f32
    %41 = vector.broadcast %cst_22 : f32 to vector<16x128xf32>
    %42 = vector.extract_strided_slice %36 {offsets = [0, 0], sizes = [16, 32], strides = [1, 1]} : vector<16x128xf32> to vector<16x32xf32>
    %43 = arith.truncf %42 : vector<16x32xf32> to vector<16x32xbf16>
    %44 = vector.extract_strided_slice %37 {offsets = [0, 0], sizes = [16, 32], strides = [1, 1]} : vector<16x128xf32> to vector<16x32xf32>
    %45 = arith.truncf %44 : vector<16x32xf32> to vector<16x32xbf16>
    %46 = vector.extract_strided_slice %38 {offsets = [0, 0], sizes = [16, 32], strides = [1, 1]} : vector<16x128xf32> to vector<16x32xf32>
    %47 = arith.truncf %46 : vector<16x32xf32> to vector<16x32xbf16>
    %cst_23 = arith.constant dense<0.000000e+00> : vector<16x16xf32>
    %48 = tpu.matmul %43, %45, %cst_23 {dimension_numbers = #tpu.dot_dimension_numbers<[1], [1], [0], [0], [0, 0, 1, 0], [], []>} : vector<16x32xbf16>, vector<16x32xbf16>, vector<16x16xf32> -> vector<16x16xf32>
    %cst_24 = arith.constant 0.176776692 : f32
    %49 = vector.broadcast %cst_24 : f32 to vector<16x16xf32>
    %50 = arith.mulf %48, %49 : vector<16x16xf32>
    %cst_25 = arith.constant dense<0xFF800000> : vector<16xf32>
    %51 = vector.multi_reduction <maximumf>, %50, %cst_25 [1] : vector<16x16xf32> to vector<16xf32>
    %52 = vector.shape_cast %51 : vector<16xf32> to vector<16x1xf32>
    %53 = vector.broadcast %52 : vector<16x1xf32> to vector<16x16xf32>
    %54 = arith.subf %50, %53 : vector<16x16xf32>
    %55 = math.exp %54 : vector<16x16xf32>
    %cst_26 = arith.constant dense<0.000000e+00> : vector<16xf32>
    %56 = vector.multi_reduction <add>, %55, %cst_26 [1] : vector<16x16xf32> to vector<16xf32>
    %57 = vector.shape_cast %56 : vector<16xf32> to vector<16x1xf32>
    %58 = tpu.reciprocal %57 {approx = true} : vector<16x1xf32> -> vector<16x1xf32>
    %59 = vector.broadcast %58 : vector<16x1xf32> to vector<16x16xf32>
    %60 = arith.mulf %55, %59 : vector<16x16xf32>
    %61 = arith.truncf %60 : vector<16x16xf32> to vector<16x16xbf16>
    %cst_27 = arith.constant dense<0.000000e+00> : vector<16x32xf32>
    %62 = tpu.matmul %61, %47, %cst_27 {dimension_numbers = #tpu.dot_dimension_numbers<[1], [0], [0], [1], [0, 0, 1, 1], [], []>} : vector<16x16xbf16>, vector<16x32xbf16>, vector<16x32xf32> -> vector<16x32xf32>
    %63 = arith.truncf %62 : vector<16x32xf32> to vector<16x32xbf16>
    %64 = vector.extract_strided_slice %40 {offsets = [0, 0], sizes = [32, 128], strides = [1, 1]} : vector<128x128xbf16> to vector<32x128xbf16>
    %cst_28 = arith.constant dense<0.000000e+00> : vector<16x128xf32>
    %65 = tpu.matmul %63, %64, %cst_28 {dimension_numbers = #tpu.dot_dimension_numbers<[1], [0], [0], [1], [0, 0, 1, 1], [], []>} : vector<16x32xbf16>, vector<32x128xbf16>, vector<16x128xf32> -> vector<16x128xf32>
    %66 = arith.addf %41, %65 : vector<16x128xf32>
    %67 = vector.extract_strided_slice %36 {offsets = [0, 32], sizes = [16, 32], strides = [1, 1]} : vector<16x128xf32> to vector<16x32xf32>
    %68 = arith.truncf %67 : vector<16x32xf32> to vector<16x32xbf16>
    %69 = vector.extract_strided_slice %37 {offsets = [0, 32], sizes = [16, 32], strides = [1, 1]} : vector<16x128xf32> to vector<16x32xf32>
    %70 = arith.truncf %69 : vector<16x32xf32> to vector<16x32xbf16>
    %71 = vector.extract_strided_slice %38 {offsets = [0, 32], sizes = [16, 32], strides = [1, 1]} : vector<16x128xf32> to vector<16x32xf32>
    %72 = arith.truncf %71 : vector<16x32xf32> to vector<16x32xbf16>
    %cst_29 = arith.constant dense<0.000000e+00> : vector<16x16xf32>
    %73 = tpu.matmul %68, %70, %cst_29 {dimension_numbers = #tpu.dot_dimension_numbers<[1], [1], [0], [0], [0, 0, 1, 0], [], []>} : vector<16x32xbf16>, vector<16x32xbf16>, vector<16x16xf32> -> vector<16x16xf32>
    %cst_30 = arith.constant 0.176776692 : f32
    %74 = vector.broadcast %cst_30 : f32 to vector<16x16xf32>
    %75 = arith.mulf %73, %74 : vector<16x16xf32>
    %cst_31 = arith.constant dense<0xFF800000> : vector<16xf32>
    %76 = vector.multi_reduction <maximumf>, %75, %cst_31 [1] : vector<16x16xf32> to vector<16xf32>
    %77 = vector.shape_cast %76 : vector<16xf32> to vector<16x1xf32>
    %78 = vector.broadcast %77 : vector<16x1xf32> to vector<16x16xf32>
    %79 = arith.subf %75, %78 : vector<16x16xf32>
    %80 = math.exp %79 : vector<16x16xf32>
    %cst_32 = arith.constant dense<0.000000e+00> : vector<16xf32>
    %81 = vector.multi_reduction <add>, %80, %cst_32 [1] : vector<16x16xf32> to vector<16xf32>
    %82 = vector.shape_cast %81 : vector<16xf32> to vector<16x1xf32>
    %83 = tpu.reciprocal %82 {approx = true} : vector<16x1xf32> -> vector<16x1xf32>
    %84 = vector.broadcast %83 : vector<16x1xf32> to vector<16x16xf32>
    %85 = arith.mulf %80, %84 : vector<16x16xf32>
    %86 = arith.truncf %85 : vector<16x16xf32> to vector<16x16xbf16>
    %cst_33 = arith.constant dense<0.000000e+00> : vector<16x32xf32>
    %87 = tpu.matmul %86, %72, %cst_33 {dimension_numbers = #tpu.dot_dimension_numbers<[1], [0], [0], [1], [0, 0, 1, 1], [], []>} : vector<16x16xbf16>, vector<16x32xbf16>, vector<16x32xf32> -> vector<16x32xf32>
    %88 = arith.truncf %87 : vector<16x32xf32> to vector<16x32xbf16>
    %89 = vector.extract_strided_slice %40 {offsets = [32, 0], sizes = [32, 128], strides = [1, 1]} : vector<128x128xbf16> to vector<32x128xbf16>
    %cst_34 = arith.constant dense<0.000000e+00> : vector<16x128xf32>
    %90 = tpu.matmul %88, %89, %cst_34 {dimension_numbers = #tpu.dot_dimension_numbers<[1], [0], [0], [1], [0, 0, 1, 1], [], []>} : vector<16x32xbf16>, vector<32x128xbf16>, vector<16x128xf32> -> vector<16x128xf32>
    %91 = arith.addf %66, %90 : vector<16x128xf32>
    %92 = vector.extract_strided_slice %36 {offsets = [0, 64], sizes = [16, 32], strides = [1, 1]} : vector<16x128xf32> to vector<16x32xf32>
    %93 = arith.truncf %92 : vector<16x32xf32> to vector<16x32xbf16>
    %94 = vector.extract_strided_slice %37 {offsets = [0, 64], sizes = [16, 32], strides = [1, 1]} : vector<16x128xf32> to vector<16x32xf32>
    %95 = arith.truncf %94 : vector<16x32xf32> to vector<16x32xbf16>
    %96 = vector.extract_strided_slice %38 {offsets = [0, 64], sizes = [16, 32], strides = [1, 1]} : vector<16x128xf32> to vector<16x32xf32>
    %97 = arith.truncf %96 : vector<16x32xf32> to vector<16x32xbf16>
    %cst_35 = arith.constant dense<0.000000e+00> : vector<16x16xf32>
    %98 = tpu.matmul %93, %95, %cst_35 {dimension_numbers = #tpu.dot_dimension_numbers<[1], [1], [0], [0], [0, 0, 1, 0], [], []>} : vector<16x32xbf16>, vector<16x32xbf16>, vector<16x16xf32> -> vector<16x16xf32>
    %cst_36 = arith.constant 0.176776692 : f32
    %99 = vector.broadcast %cst_36 : f32 to vector<16x16xf32>
    %100 = arith.mulf %98, %99 : vector<16x16xf32>
    %cst_37 = arith.constant dense<0xFF800000> : vector<16xf32>
    %101 = vector.multi_reduction <maximumf>, %100, %cst_37 [1] : vector<16x16xf32> to vector<16xf32>
    %102 = vector.shape_cast %101 : vector<16xf32> to vector<16x1xf32>
    %103 = vector.broadcast %102 : vector<16x1xf32> to vector<16x16xf32>
    %104 = arith.subf %100, %103 : vector<16x16xf32>
    %105 = math.exp %104 : vector<16x16xf32>
    %cst_38 = arith.constant dense<0.000000e+00> : vector<16xf32>
    %106 = vector.multi_reduction <add>, %105, %cst_38 [1] : vector<16x16xf32> to vector<16xf32>
    %107 = vector.shape_cast %106 : vector<16xf32> to vector<16x1xf32>
    %108 = tpu.reciprocal %107 {approx = true} : vector<16x1xf32> -> vector<16x1xf32>
    %109 = vector.broadcast %108 : vector<16x1xf32> to vector<16x16xf32>
    %110 = arith.mulf %105, %109 : vector<16x16xf32>
    %111 = arith.truncf %110 : vector<16x16xf32> to vector<16x16xbf16>
    %cst_39 = arith.constant dense<0.000000e+00> : vector<16x32xf32>
    %112 = tpu.matmul %111, %97, %cst_39 {dimension_numbers = #tpu.dot_dimension_numbers<[1], [0], [0], [1], [0, 0, 1, 1], [], []>} : vector<16x16xbf16>, vector<16x32xbf16>, vector<16x32xf32> -> vector<16x32xf32>
    %113 = arith.truncf %112 : vector<16x32xf32> to vector<16x32xbf16>
    %114 = vector.extract_strided_slice %40 {offsets = [64, 0], sizes = [32, 128], strides = [1, 1]} : vector<128x128xbf16> to vector<32x128xbf16>
    %cst_40 = arith.constant dense<0.000000e+00> : vector<16x128xf32>
    %115 = tpu.matmul %113, %114, %cst_40 {dimension_numbers = #tpu.dot_dimension_numbers<[1], [0], [0], [1], [0, 0, 1, 1], [], []>} : vector<16x32xbf16>, vector<32x128xbf16>, vector<16x128xf32> -> vector<16x128xf32>
    %116 = arith.addf %91, %115 : vector<16x128xf32>
    %117 = vector.extract_strided_slice %36 {offsets = [0, 96], sizes = [16, 32], strides = [1, 1]} : vector<16x128xf32> to vector<16x32xf32>
    %118 = arith.truncf %117 : vector<16x32xf32> to vector<16x32xbf16>
    %119 = vector.extract_strided_slice %37 {offsets = [0, 96], sizes = [16, 32], strides = [1, 1]} : vector<16x128xf32> to vector<16x32xf32>
    %120 = arith.truncf %119 : vector<16x32xf32> to vector<16x32xbf16>
    %121 = vector.extract_strided_slice %38 {offsets = [0, 96], sizes = [16, 32], strides = [1, 1]} : vector<16x128xf32> to vector<16x32xf32>
    %122 = arith.truncf %121 : vector<16x32xf32> to vector<16x32xbf16>
    %cst_41 = arith.constant dense<0.000000e+00> : vector<16x16xf32>
    %123 = tpu.matmul %118, %120, %cst_41 {dimension_numbers = #tpu.dot_dimension_numbers<[1], [1], [0], [0], [0, 0, 1, 0], [], []>} : vector<16x32xbf16>, vector<16x32xbf16>, vector<16x16xf32> -> vector<16x16xf32>
    %cst_42 = arith.constant 0.176776692 : f32
    %124 = vector.broadcast %cst_42 : f32 to vector<16x16xf32>
    %125 = arith.mulf %123, %124 : vector<16x16xf32>
    %cst_43 = arith.constant dense<0xFF800000> : vector<16xf32>
    %126 = vector.multi_reduction <maximumf>, %125, %cst_43 [1] : vector<16x16xf32> to vector<16xf32>
    %127 = vector.shape_cast %126 : vector<16xf32> to vector<16x1xf32>
    %128 = vector.broadcast %127 : vector<16x1xf32> to vector<16x16xf32>
    %129 = arith.subf %125, %128 : vector<16x16xf32>
    %130 = math.exp %129 : vector<16x16xf32>
    %cst_44 = arith.constant dense<0.000000e+00> : vector<16xf32>
    %131 = vector.multi_reduction <add>, %130, %cst_44 [1] : vector<16x16xf32> to vector<16xf32>
    %132 = vector.shape_cast %131 : vector<16xf32> to vector<16x1xf32>
    %133 = tpu.reciprocal %132 {approx = true} : vector<16x1xf32> -> vector<16x1xf32>
    %134 = vector.broadcast %133 : vector<16x1xf32> to vector<16x16xf32>
    %135 = arith.mulf %130, %134 : vector<16x16xf32>
    %136 = arith.truncf %135 : vector<16x16xf32> to vector<16x16xbf16>
    %cst_45 = arith.constant dense<0.000000e+00> : vector<16x32xf32>
    %137 = tpu.matmul %136, %122, %cst_45 {dimension_numbers = #tpu.dot_dimension_numbers<[1], [0], [0], [1], [0, 0, 1, 1], [], []>} : vector<16x16xbf16>, vector<16x32xbf16>, vector<16x32xf32> -> vector<16x32xf32>
    %138 = arith.truncf %137 : vector<16x32xf32> to vector<16x32xbf16>
    %139 = vector.extract_strided_slice %40 {offsets = [96, 0], sizes = [32, 128], strides = [1, 1]} : vector<128x128xbf16> to vector<32x128xbf16>
    %cst_46 = arith.constant dense<0.000000e+00> : vector<16x128xf32>
    %140 = tpu.matmul %138, %139, %cst_46 {dimension_numbers = #tpu.dot_dimension_numbers<[1], [0], [0], [1], [0, 0, 1, 1], [], []>} : vector<16x32xbf16>, vector<32x128xbf16>, vector<16x128xf32> -> vector<16x128xf32>
    %141 = arith.addf %116, %140 : vector<16x128xf32>
    %142 = arith.addf %1, %141 : vector<16x128xf32>
    %c0_47 = arith.constant 0 : index
    %c0_48 = arith.constant 0 : index
    %c0_49 = arith.constant 0 : index
    %143 = vector.load %arg7[%c0_47, %c0_48, %c0_49] : memref<2x1x128xf32, #tpu.memory_space<vmem>>, vector<1x1x128xf32>
    %144 = vector.shape_cast %143 : vector<1x1x128xf32> to vector<1x128xf32>
    %145 = vector.broadcast %144 : vector<1x128xf32> to vector<16x128xf32>
    %146 = arith.addf %142, %145 : vector<16x128xf32>
    %c0_50 = arith.constant 0 : index
    %c0_51 = arith.constant 0 : index
    %c0_52 = arith.constant 0 : index
    %147 = vector.load %arg8[%c0_50, %c0_51, %c0_52] : memref<2x1x128xf32, #tpu.memory_space<vmem>>, vector<1x1x128xf32>
    %148 = vector.shape_cast %147 : vector<1x1x128xf32> to vector<1x128xf32>
    %c0_53 = arith.constant 0 : index
    %c0_54 = arith.constant 0 : index
    %c0_55 = arith.constant 0 : index
    %149 = vector.load %arg9[%c0_53, %c0_54, %c0_55] : memref<2x1x128xf32, #tpu.memory_space<vmem>>, vector<1x1x128xf32>
    %150 = vector.shape_cast %149 : vector<1x1x128xf32> to vector<1x128xf32>
    %cst_56 = arith.constant dense<0.000000e+00> : vector<16xf32>
    %151 = vector.multi_reduction <add>, %146, %cst_56 [1] : vector<16x128xf32> to vector<16xf32>
    %152 = vector.shape_cast %151 : vector<16xf32> to vector<16x1xf32>
    %cst_57 = arith.constant 1.280000e+02 : f32
    %153 = vector.broadcast %cst_57 : f32 to vector<16x1xf32>
    %154 = arith.divf %152, %153 : vector<16x1xf32>
    %155 = vector.broadcast %154 : vector<16x1xf32> to vector<16x128xf32>
    %156 = arith.subf %146, %155 : vector<16x128xf32>
    %157 = arith.mulf %156, %156 : vector<16x128xf32>
    %cst_58 = arith.constant dense<0.000000e+00> : vector<16xf32>
    %158 = vector.multi_reduction <add>, %157, %cst_58 [1] : vector<16x128xf32> to vector<16xf32>
    %159 = vector.shape_cast %158 : vector<16xf32> to vector<16x1xf32>
    %cst_59 = arith.constant 1.280000e+02 : f32
    %160 = vector.broadcast %cst_59 : f32 to vector<16x1xf32>
    %161 = arith.divf %159, %160 : vector<16x1xf32>
    %162 = vector.broadcast %154 : vector<16x1xf32> to vector<16x128xf32>
    %163 = arith.subf %146, %162 : vector<16x128xf32>
    %cst_60 = arith.constant 9.99999974E-6 : f32
    %164 = vector.broadcast %cst_60 : f32 to vector<16x1xf32>
    %165 = arith.addf %161, %164 : vector<16x1xf32>
    %166 = math.rsqrt %165 : vector<16x1xf32>
    %167 = vector.broadcast %166 : vector<16x1xf32> to vector<16x128xf32>
    %168 = arith.mulf %163, %167 : vector<16x128xf32>
    %169 = vector.broadcast %148 : vector<1x128xf32> to vector<16x128xf32>
    %170 = arith.mulf %168, %169 : vector<16x128xf32>
    %171 = vector.broadcast %150 : vector<1x128xf32> to vector<16x128xf32>
    %172 = arith.addf %170, %171 : vector<16x128xf32>
    %173 = arith.truncf %172 : vector<16x128xf32> to vector<16x128xbf16>
    %c0_61 = arith.constant 0 : index
    %c0_62 = arith.constant 0 : index
    %c0_63 = arith.constant 0 : index
    %174 = vector.load %arg10[%c0_61, %c0_62, %c0_63] : memref<2x128x256xbf16, #tpu.memory_space<vmem>>, vector<1x128x256xbf16>
    %175 = vector.shape_cast %174 : vector<1x128x256xbf16> to vector<128x256xbf16>
    %cst_64 = arith.constant dense<0.000000e+00> : vector<16x256xf32>
    %176 = tpu.matmul %173, %175, %cst_64 {dimension_numbers = #tpu.dot_dimension_numbers<[1], [0], [0], [1], [0, 0, 1, 1], [], []>} : vector<16x128xbf16>, vector<128x256xbf16>, vector<16x256xf32> -> vector<16x256xf32>
    %c0_65 = arith.constant 0 : index
    %c0_66 = arith.constant 0 : index
    %c0_67 = arith.constant 0 : index
    %177 = vector.load %arg11[%c0_65, %c0_66, %c0_67] : memref<2x1x256xf32, #tpu.memory_space<vmem>>, vector<1x1x256xf32>
    %178 = vector.shape_cast %177 : vector<1x1x256xf32> to vector<1x256xf32>
    %179 = vector.broadcast %178 : vector<1x256xf32> to vector<16x256xf32>
    %180 = arith.addf %176, %179 : vector<16x256xf32>
    %181 = arith.mulf %180, %180 : vector<16x256xf32>
    %182 = arith.mulf %180, %181 : vector<16x256xf32>
    %cst_68 = arith.constant 4.471500e-02 : f32
    %183 = vector.broadcast %cst_68 : f32 to vector<16x256xf32>
    %184 = arith.mulf %183, %182 : vector<16x256xf32>
    %185 = arith.addf %180, %184 : vector<16x256xf32>
    %cst_69 = arith.constant 0.797884583 : f32
    %186 = vector.broadcast %cst_69 : f32 to vector<16x256xf32>
    %187 = arith.mulf %186, %185 : vector<16x256xf32>
    %188 = math.tanh %187 : vector<16x256xf32>
    %cst_70 = arith.constant 1.000000e+00 : f32
    %189 = vector.broadcast %cst_70 : f32 to vector<16x256xf32>
    %190 = arith.addf %189, %188 : vector<16x256xf32>
    %cst_71 = arith.constant 5.000000e-01 : f32
    %191 = vector.broadcast %cst_71 : f32 to vector<16x256xf32>
    %192 = arith.mulf %191, %190 : vector<16x256xf32>
    %193 = arith.mulf %180, %192 : vector<16x256xf32>
    %194 = arith.truncf %193 : vector<16x256xf32> to vector<16x256xbf16>
    %c0_72 = arith.constant 0 : index
    %c0_73 = arith.constant 0 : index
    %c0_74 = arith.constant 0 : index
    %195 = vector.load %arg12[%c0_72, %c0_73, %c0_74] : memref<2x256x128xbf16, #tpu.memory_space<vmem>>, vector<1x256x128xbf16>
    %196 = vector.shape_cast %195 : vector<1x256x128xbf16> to vector<256x128xbf16>
    %cst_75 = arith.constant dense<0.000000e+00> : vector<16x128xf32>
    %197 = tpu.matmul %194, %196, %cst_75 {dimension_numbers = #tpu.dot_dimension_numbers<[1], [0], [0], [1], [0, 0, 1, 1], [], []>} : vector<16x256xbf16>, vector<256x128xbf16>, vector<16x128xf32> -> vector<16x128xf32>
    %198 = arith.addf %146, %197 : vector<16x128xf32>
    %c0_76 = arith.constant 0 : index
    %c0_77 = arith.constant 0 : index
    %c0_78 = arith.constant 0 : index
    %199 = vector.load %arg13[%c0_76, %c0_77, %c0_78] : memref<2x1x128xf32, #tpu.memory_space<vmem>>, vector<1x1x128xf32>
    %200 = vector.shape_cast %199 : vector<1x1x128xf32> to vector<1x128xf32>
    %201 = vector.broadcast %200 : vector<1x128xf32> to vector<16x128xf32>
    %202 = arith.addf %198, %201 : vector<16x128xf32>
    %c1 = arith.constant 1 : index
    %c0_79 = arith.constant 0 : index
    %c0_80 = arith.constant 0 : index
    %203 = vector.load %arg2[%c1, %c0_79, %c0_80] : memref<2x1x128xf32, #tpu.memory_space<vmem>>, vector<1x1x128xf32>
    %204 = vector.shape_cast %203 : vector<1x1x128xf32> to vector<1x128xf32>
    %c1_81 = arith.constant 1 : index
    %c0_82 = arith.constant 0 : index
    %c0_83 = arith.constant 0 : index
    %205 = vector.load %arg3[%c1_81, %c0_82, %c0_83] : memref<2x1x128xf32, #tpu.memory_space<vmem>>, vector<1x1x128xf32>
    %206 = vector.shape_cast %205 : vector<1x1x128xf32> to vector<1x128xf32>
    %cst_84 = arith.constant dense<0.000000e+00> : vector<16xf32>
    %207 = vector.multi_reduction <add>, %202, %cst_84 [1] : vector<16x128xf32> to vector<16xf32>
    %208 = vector.shape_cast %207 : vector<16xf32> to vector<16x1xf32>
    %cst_85 = arith.constant 1.280000e+02 : f32
    %209 = vector.broadcast %cst_85 : f32 to vector<16x1xf32>
    %210 = arith.divf %208, %209 : vector<16x1xf32>
    %211 = vector.broadcast %210 : vector<16x1xf32> to vector<16x128xf32>
    %212 = arith.subf %202, %211 : vector<16x128xf32>
    %213 = arith.mulf %212, %212 : vector<16x128xf32>
    %cst_86 = arith.constant dense<0.000000e+00> : vector<16xf32>
    %214 = vector.multi_reduction <add>, %213, %cst_86 [1] : vector<16x128xf32> to vector<16xf32>
    %215 = vector.shape_cast %214 : vector<16xf32> to vector<16x1xf32>
    %cst_87 = arith.constant 1.280000e+02 : f32
    %216 = vector.broadcast %cst_87 : f32 to vector<16x1xf32>
    %217 = arith.divf %215, %216 : vector<16x1xf32>
    %218 = vector.broadcast %210 : vector<16x1xf32> to vector<16x128xf32>
    %219 = arith.subf %202, %218 : vector<16x128xf32>
    %cst_88 = arith.constant 9.99999974E-6 : f32
    %220 = vector.broadcast %cst_88 : f32 to vector<16x1xf32>
    %221 = arith.addf %217, %220 : vector<16x1xf32>
    %222 = math.rsqrt %221 : vector<16x1xf32>
    %223 = vector.broadcast %222 : vector<16x1xf32> to vector<16x128xf32>
    %224 = arith.mulf %219, %223 : vector<16x128xf32>
    %225 = vector.broadcast %204 : vector<1x128xf32> to vector<16x128xf32>
    %226 = arith.mulf %224, %225 : vector<16x128xf32>
    %227 = vector.broadcast %206 : vector<1x128xf32> to vector<16x128xf32>
    %228 = arith.addf %226, %227 : vector<16x128xf32>
    %229 = arith.truncf %228 : vector<16x128xf32> to vector<16x128xbf16>
    %c1_89 = arith.constant 1 : index
    %c0_90 = arith.constant 0 : index
    %c0_91 = arith.constant 0 : index
    %230 = vector.load %arg4[%c1_89, %c0_90, %c0_91] : memref<2x128x384xbf16, #tpu.memory_space<vmem>>, vector<1x128x384xbf16>
    %231 = vector.shape_cast %230 : vector<1x128x384xbf16> to vector<128x384xbf16>
    %cst_92 = arith.constant dense<0.000000e+00> : vector<16x384xf32>
    %232 = tpu.matmul %229, %231, %cst_92 {dimension_numbers = #tpu.dot_dimension_numbers<[1], [0], [0], [1], [0, 0, 1, 1], [], []>} : vector<16x128xbf16>, vector<128x384xbf16>, vector<16x384xf32> -> vector<16x384xf32>
    %c1_93 = arith.constant 1 : index
    %c0_94 = arith.constant 0 : index
    %c0_95 = arith.constant 0 : index
    %233 = vector.load %arg5[%c1_93, %c0_94, %c0_95] : memref<2x1x384xf32, #tpu.memory_space<vmem>>, vector<1x1x384xf32>
    %234 = vector.shape_cast %233 : vector<1x1x384xf32> to vector<1x384xf32>
    %235 = vector.broadcast %234 : vector<1x384xf32> to vector<16x384xf32>
    %236 = arith.addf %232, %235 : vector<16x384xf32>
    %237 = vector.extract_strided_slice %236 {offsets = [0, 0], sizes = [16, 128], strides = [1, 1]} : vector<16x384xf32> to vector<16x128xf32>
    %238 = vector.extract_strided_slice %236 {offsets = [0, 128], sizes = [16, 128], strides = [1, 1]} : vector<16x384xf32> to vector<16x128xf32>
    %239 = vector.extract_strided_slice %236 {offsets = [0, 256], sizes = [16, 128], strides = [1, 1]} : vector<16x384xf32> to vector<16x128xf32>
    %c1_96 = arith.constant 1 : index
    %c0_97 = arith.constant 0 : index
    %c0_98 = arith.constant 0 : index
    %240 = vector.load %arg6[%c1_96, %c0_97, %c0_98] : memref<2x128x128xbf16, #tpu.memory_space<vmem>>, vector<1x128x128xbf16>
    %241 = vector.shape_cast %240 : vector<1x128x128xbf16> to vector<128x128xbf16>
    %cst_99 = arith.constant 0.000000e+00 : f32
    %242 = vector.broadcast %cst_99 : f32 to vector<16x128xf32>
    %243 = vector.extract_strided_slice %237 {offsets = [0, 0], sizes = [16, 32], strides = [1, 1]} : vector<16x128xf32> to vector<16x32xf32>
    %244 = arith.truncf %243 : vector<16x32xf32> to vector<16x32xbf16>
    %245 = vector.extract_strided_slice %238 {offsets = [0, 0], sizes = [16, 32], strides = [1, 1]} : vector<16x128xf32> to vector<16x32xf32>
    %246 = arith.truncf %245 : vector<16x32xf32> to vector<16x32xbf16>
    %247 = vector.extract_strided_slice %239 {offsets = [0, 0], sizes = [16, 32], strides = [1, 1]} : vector<16x128xf32> to vector<16x32xf32>
    %248 = arith.truncf %247 : vector<16x32xf32> to vector<16x32xbf16>
    %cst_100 = arith.constant dense<0.000000e+00> : vector<16x16xf32>
    %249 = tpu.matmul %244, %246, %cst_100 {dimension_numbers = #tpu.dot_dimension_numbers<[1], [1], [0], [0], [0, 0, 1, 0], [], []>} : vector<16x32xbf16>, vector<16x32xbf16>, vector<16x16xf32> -> vector<16x16xf32>
    %cst_101 = arith.constant 0.176776692 : f32
    %250 = vector.broadcast %cst_101 : f32 to vector<16x16xf32>
    %251 = arith.mulf %249, %250 : vector<16x16xf32>
    %cst_102 = arith.constant dense<0xFF800000> : vector<16xf32>
    %252 = vector.multi_reduction <maximumf>, %251, %cst_102 [1] : vector<16x16xf32> to vector<16xf32>
    %253 = vector.shape_cast %252 : vector<16xf32> to vector<16x1xf32>
    %254 = vector.broadcast %253 : vector<16x1xf32> to vector<16x16xf32>
    %255 = arith.subf %251, %254 : vector<16x16xf32>
    %256 = math.exp %255 : vector<16x16xf32>
    %cst_103 = arith.constant dense<0.000000e+00> : vector<16xf32>
    %257 = vector.multi_reduction <add>, %256, %cst_103 [1] : vector<16x16xf32> to vector<16xf32>
    %258 = vector.shape_cast %257 : vector<16xf32> to vector<16x1xf32>
    %259 = tpu.reciprocal %258 {approx = true} : vector<16x1xf32> -> vector<16x1xf32>
    %260 = vector.broadcast %259 : vector<16x1xf32> to vector<16x16xf32>
    %261 = arith.mulf %256, %260 : vector<16x16xf32>
    %262 = arith.truncf %261 : vector<16x16xf32> to vector<16x16xbf16>
    %cst_104 = arith.constant dense<0.000000e+00> : vector<16x32xf32>
    %263 = tpu.matmul %262, %248, %cst_104 {dimension_numbers = #tpu.dot_dimension_numbers<[1], [0], [0], [1], [0, 0, 1, 1], [], []>} : vector<16x16xbf16>, vector<16x32xbf16>, vector<16x32xf32> -> vector<16x32xf32>
    %264 = arith.truncf %263 : vector<16x32xf32> to vector<16x32xbf16>
    %265 = vector.extract_strided_slice %241 {offsets = [0, 0], sizes = [32, 128], strides = [1, 1]} : vector<128x128xbf16> to vector<32x128xbf16>
    %cst_105 = arith.constant dense<0.000000e+00> : vector<16x128xf32>
    %266 = tpu.matmul %264, %265, %cst_105 {dimension_numbers = #tpu.dot_dimension_numbers<[1], [0], [0], [1], [0, 0, 1, 1], [], []>} : vector<16x32xbf16>, vector<32x128xbf16>, vector<16x128xf32> -> vector<16x128xf32>
    %267 = arith.addf %242, %266 : vector<16x128xf32>
    %268 = vector.extract_strided_slice %237 {offsets = [0, 32], sizes = [16, 32], strides = [1, 1]} : vector<16x128xf32> to vector<16x32xf32>
    %269 = arith.truncf %268 : vector<16x32xf32> to vector<16x32xbf16>
    %270 = vector.extract_strided_slice %238 {offsets = [0, 32], sizes = [16, 32], strides = [1, 1]} : vector<16x128xf32> to vector<16x32xf32>
    %271 = arith.truncf %270 : vector<16x32xf32> to vector<16x32xbf16>
    %272 = vector.extract_strided_slice %239 {offsets = [0, 32], sizes = [16, 32], strides = [1, 1]} : vector<16x128xf32> to vector<16x32xf32>
    %273 = arith.truncf %272 : vector<16x32xf32> to vector<16x32xbf16>
    %cst_106 = arith.constant dense<0.000000e+00> : vector<16x16xf32>
    %274 = tpu.matmul %269, %271, %cst_106 {dimension_numbers = #tpu.dot_dimension_numbers<[1], [1], [0], [0], [0, 0, 1, 0], [], []>} : vector<16x32xbf16>, vector<16x32xbf16>, vector<16x16xf32> -> vector<16x16xf32>
    %cst_107 = arith.constant 0.176776692 : f32
    %275 = vector.broadcast %cst_107 : f32 to vector<16x16xf32>
    %276 = arith.mulf %274, %275 : vector<16x16xf32>
    %cst_108 = arith.constant dense<0xFF800000> : vector<16xf32>
    %277 = vector.multi_reduction <maximumf>, %276, %cst_108 [1] : vector<16x16xf32> to vector<16xf32>
    %278 = vector.shape_cast %277 : vector<16xf32> to vector<16x1xf32>
    %279 = vector.broadcast %278 : vector<16x1xf32> to vector<16x16xf32>
    %280 = arith.subf %276, %279 : vector<16x16xf32>
    %281 = math.exp %280 : vector<16x16xf32>
    %cst_109 = arith.constant dense<0.000000e+00> : vector<16xf32>
    %282 = vector.multi_reduction <add>, %281, %cst_109 [1] : vector<16x16xf32> to vector<16xf32>
    %283 = vector.shape_cast %282 : vector<16xf32> to vector<16x1xf32>
    %284 = tpu.reciprocal %283 {approx = true} : vector<16x1xf32> -> vector<16x1xf32>
    %285 = vector.broadcast %284 : vector<16x1xf32> to vector<16x16xf32>
    %286 = arith.mulf %281, %285 : vector<16x16xf32>
    %287 = arith.truncf %286 : vector<16x16xf32> to vector<16x16xbf16>
    %cst_110 = arith.constant dense<0.000000e+00> : vector<16x32xf32>
    %288 = tpu.matmul %287, %273, %cst_110 {dimension_numbers = #tpu.dot_dimension_numbers<[1], [0], [0], [1], [0, 0, 1, 1], [], []>} : vector<16x16xbf16>, vector<16x32xbf16>, vector<16x32xf32> -> vector<16x32xf32>
    %289 = arith.truncf %288 : vector<16x32xf32> to vector<16x32xbf16>
    %290 = vector.extract_strided_slice %241 {offsets = [32, 0], sizes = [32, 128], strides = [1, 1]} : vector<128x128xbf16> to vector<32x128xbf16>
    %cst_111 = arith.constant dense<0.000000e+00> : vector<16x128xf32>
    %291 = tpu.matmul %289, %290, %cst_111 {dimension_numbers = #tpu.dot_dimension_numbers<[1], [0], [0], [1], [0, 0, 1, 1], [], []>} : vector<16x32xbf16>, vector<32x128xbf16>, vector<16x128xf32> -> vector<16x128xf32>
    %292 = arith.addf %267, %291 : vector<16x128xf32>
    %293 = vector.extract_strided_slice %237 {offsets = [0, 64], sizes = [16, 32], strides = [1, 1]} : vector<16x128xf32> to vector<16x32xf32>
    %294 = arith.truncf %293 : vector<16x32xf32> to vector<16x32xbf16>
    %295 = vector.extract_strided_slice %238 {offsets = [0, 64], sizes = [16, 32], strides = [1, 1]} : vector<16x128xf32> to vector<16x32xf32>
    %296 = arith.truncf %295 : vector<16x32xf32> to vector<16x32xbf16>
    %297 = vector.extract_strided_slice %239 {offsets = [0, 64], sizes = [16, 32], strides = [1, 1]} : vector<16x128xf32> to vector<16x32xf32>
    %298 = arith.truncf %297 : vector<16x32xf32> to vector<16x32xbf16>
    %cst_112 = arith.constant dense<0.000000e+00> : vector<16x16xf32>
    %299 = tpu.matmul %294, %296, %cst_112 {dimension_numbers = #tpu.dot_dimension_numbers<[1], [1], [0], [0], [0, 0, 1, 0], [], []>} : vector<16x32xbf16>, vector<16x32xbf16>, vector<16x16xf32> -> vector<16x16xf32>
    %cst_113 = arith.constant 0.176776692 : f32
    %300 = vector.broadcast %cst_113 : f32 to vector<16x16xf32>
    %301 = arith.mulf %299, %300 : vector<16x16xf32>
    %cst_114 = arith.constant dense<0xFF800000> : vector<16xf32>
    %302 = vector.multi_reduction <maximumf>, %301, %cst_114 [1] : vector<16x16xf32> to vector<16xf32>
    %303 = vector.shape_cast %302 : vector<16xf32> to vector<16x1xf32>
    %304 = vector.broadcast %303 : vector<16x1xf32> to vector<16x16xf32>
    %305 = arith.subf %301, %304 : vector<16x16xf32>
    %306 = math.exp %305 : vector<16x16xf32>
    %cst_115 = arith.constant dense<0.000000e+00> : vector<16xf32>
    %307 = vector.multi_reduction <add>, %306, %cst_115 [1] : vector<16x16xf32> to vector<16xf32>
    %308 = vector.shape_cast %307 : vector<16xf32> to vector<16x1xf32>
    %309 = tpu.reciprocal %308 {approx = true} : vector<16x1xf32> -> vector<16x1xf32>
    %310 = vector.broadcast %309 : vector<16x1xf32> to vector<16x16xf32>
    %311 = arith.mulf %306, %310 : vector<16x16xf32>
    %312 = arith.truncf %311 : vector<16x16xf32> to vector<16x16xbf16>
    %cst_116 = arith.constant dense<0.000000e+00> : vector<16x32xf32>
    %313 = tpu.matmul %312, %298, %cst_116 {dimension_numbers = #tpu.dot_dimension_numbers<[1], [0], [0], [1], [0, 0, 1, 1], [], []>} : vector<16x16xbf16>, vector<16x32xbf16>, vector<16x32xf32> -> vector<16x32xf32>
    %314 = arith.truncf %313 : vector<16x32xf32> to vector<16x32xbf16>
    %315 = vector.extract_strided_slice %241 {offsets = [64, 0], sizes = [32, 128], strides = [1, 1]} : vector<128x128xbf16> to vector<32x128xbf16>
    %cst_117 = arith.constant dense<0.000000e+00> : vector<16x128xf32>
    %316 = tpu.matmul %314, %315, %cst_117 {dimension_numbers = #tpu.dot_dimension_numbers<[1], [0], [0], [1], [0, 0, 1, 1], [], []>} : vector<16x32xbf16>, vector<32x128xbf16>, vector<16x128xf32> -> vector<16x128xf32>
    %317 = arith.addf %292, %316 : vector<16x128xf32>
    %318 = vector.extract_strided_slice %237 {offsets = [0, 96], sizes = [16, 32], strides = [1, 1]} : vector<16x128xf32> to vector<16x32xf32>
    %319 = arith.truncf %318 : vector<16x32xf32> to vector<16x32xbf16>
    %320 = vector.extract_strided_slice %238 {offsets = [0, 96], sizes = [16, 32], strides = [1, 1]} : vector<16x128xf32> to vector<16x32xf32>
    %321 = arith.truncf %320 : vector<16x32xf32> to vector<16x32xbf16>
    %322 = vector.extract_strided_slice %239 {offsets = [0, 96], sizes = [16, 32], strides = [1, 1]} : vector<16x128xf32> to vector<16x32xf32>
    %323 = arith.truncf %322 : vector<16x32xf32> to vector<16x32xbf16>
    %cst_118 = arith.constant dense<0.000000e+00> : vector<16x16xf32>
    %324 = tpu.matmul %319, %321, %cst_118 {dimension_numbers = #tpu.dot_dimension_numbers<[1], [1], [0], [0], [0, 0, 1, 0], [], []>} : vector<16x32xbf16>, vector<16x32xbf16>, vector<16x16xf32> -> vector<16x16xf32>
    %cst_119 = arith.constant 0.176776692 : f32
    %325 = vector.broadcast %cst_119 : f32 to vector<16x16xf32>
    %326 = arith.mulf %324, %325 : vector<16x16xf32>
    %cst_120 = arith.constant dense<0xFF800000> : vector<16xf32>
    %327 = vector.multi_reduction <maximumf>, %326, %cst_120 [1] : vector<16x16xf32> to vector<16xf32>
    %328 = vector.shape_cast %327 : vector<16xf32> to vector<16x1xf32>
    %329 = vector.broadcast %328 : vector<16x1xf32> to vector<16x16xf32>
    %330 = arith.subf %326, %329 : vector<16x16xf32>
    %331 = math.exp %330 : vector<16x16xf32>
    %cst_121 = arith.constant dense<0.000000e+00> : vector<16xf32>
    %332 = vector.multi_reduction <add>, %331, %cst_121 [1] : vector<16x16xf32> to vector<16xf32>
    %333 = vector.shape_cast %332 : vector<16xf32> to vector<16x1xf32>
    %334 = tpu.reciprocal %333 {approx = true} : vector<16x1xf32> -> vector<16x1xf32>
    %335 = vector.broadcast %334 : vector<16x1xf32> to vector<16x16xf32>
    %336 = arith.mulf %331, %335 : vector<16x16xf32>
    %337 = arith.truncf %336 : vector<16x16xf32> to vector<16x16xbf16>
    %cst_122 = arith.constant dense<0.000000e+00> : vector<16x32xf32>
    %338 = tpu.matmul %337, %323, %cst_122 {dimension_numbers = #tpu.dot_dimension_numbers<[1], [0], [0], [1], [0, 0, 1, 1], [], []>} : vector<16x16xbf16>, vector<16x32xbf16>, vector<16x32xf32> -> vector<16x32xf32>
    %339 = arith.truncf %338 : vector<16x32xf32> to vector<16x32xbf16>
    %340 = vector.extract_strided_slice %241 {offsets = [96, 0], sizes = [32, 128], strides = [1, 1]} : vector<128x128xbf16> to vector<32x128xbf16>
    %cst_123 = arith.constant dense<0.000000e+00> : vector<16x128xf32>
    %341 = tpu.matmul %339, %340, %cst_123 {dimension_numbers = #tpu.dot_dimension_numbers<[1], [0], [0], [1], [0, 0, 1, 1], [], []>} : vector<16x32xbf16>, vector<32x128xbf16>, vector<16x128xf32> -> vector<16x128xf32>
    %342 = arith.addf %317, %341 : vector<16x128xf32>
    %343 = arith.addf %202, %342 : vector<16x128xf32>
    %c1_124 = arith.constant 1 : index
    %c0_125 = arith.constant 0 : index
    %c0_126 = arith.constant 0 : index
    %344 = vector.load %arg7[%c1_124, %c0_125, %c0_126] : memref<2x1x128xf32, #tpu.memory_space<vmem>>, vector<1x1x128xf32>
    %345 = vector.shape_cast %344 : vector<1x1x128xf32> to vector<1x128xf32>
    %346 = vector.broadcast %345 : vector<1x128xf32> to vector<16x128xf32>
    %347 = arith.addf %343, %346 : vector<16x128xf32>
    %c1_127 = arith.constant 1 : index
    %c0_128 = arith.constant 0 : index
    %c0_129 = arith.constant 0 : index
    %348 = vector.load %arg8[%c1_127, %c0_128, %c0_129] : memref<2x1x128xf32, #tpu.memory_space<vmem>>, vector<1x1x128xf32>
    %349 = vector.shape_cast %348 : vector<1x1x128xf32> to vector<1x128xf32>
    %c1_130 = arith.constant 1 : index
    %c0_131 = arith.constant 0 : index
    %c0_132 = arith.constant 0 : index
    %350 = vector.load %arg9[%c1_130, %c0_131, %c0_132] : memref<2x1x128xf32, #tpu.memory_space<vmem>>, vector<1x1x128xf32>
    %351 = vector.shape_cast %350 : vector<1x1x128xf32> to vector<1x128xf32>
    %cst_133 = arith.constant dense<0.000000e+00> : vector<16xf32>
    %352 = vector.multi_reduction <add>, %347, %cst_133 [1] : vector<16x128xf32> to vector<16xf32>
    %353 = vector.shape_cast %352 : vector<16xf32> to vector<16x1xf32>
    %cst_134 = arith.constant 1.280000e+02 : f32
    %354 = vector.broadcast %cst_134 : f32 to vector<16x1xf32>
    %355 = arith.divf %353, %354 : vector<16x1xf32>
    %356 = vector.broadcast %355 : vector<16x1xf32> to vector<16x128xf32>
    %357 = arith.subf %347, %356 : vector<16x128xf32>
    %358 = arith.mulf %357, %357 : vector<16x128xf32>
    %cst_135 = arith.constant dense<0.000000e+00> : vector<16xf32>
    %359 = vector.multi_reduction <add>, %358, %cst_135 [1] : vector<16x128xf32> to vector<16xf32>
    %360 = vector.shape_cast %359 : vector<16xf32> to vector<16x1xf32>
    %cst_136 = arith.constant 1.280000e+02 : f32
    %361 = vector.broadcast %cst_136 : f32 to vector<16x1xf32>
    %362 = arith.divf %360, %361 : vector<16x1xf32>
    %363 = vector.broadcast %355 : vector<16x1xf32> to vector<16x128xf32>
    %364 = arith.subf %347, %363 : vector<16x128xf32>
    %cst_137 = arith.constant 9.99999974E-6 : f32
    %365 = vector.broadcast %cst_137 : f32 to vector<16x1xf32>
    %366 = arith.addf %362, %365 : vector<16x1xf32>
    %367 = math.rsqrt %366 : vector<16x1xf32>
    %368 = vector.broadcast %367 : vector<16x1xf32> to vector<16x128xf32>
    %369 = arith.mulf %364, %368 : vector<16x128xf32>
    %370 = vector.broadcast %349 : vector<1x128xf32> to vector<16x128xf32>
    %371 = arith.mulf %369, %370 : vector<16x128xf32>
    %372 = vector.broadcast %351 : vector<1x128xf32> to vector<16x128xf32>
    %373 = arith.addf %371, %372 : vector<16x128xf32>
    %374 = arith.truncf %373 : vector<16x128xf32> to vector<16x128xbf16>
    %c1_138 = arith.constant 1 : index
    %c0_139 = arith.constant 0 : index
    %c0_140 = arith.constant 0 : index
    %375 = vector.load %arg10[%c1_138, %c0_139, %c0_140] : memref<2x128x256xbf16, #tpu.memory_space<vmem>>, vector<1x128x256xbf16>
    %376 = vector.shape_cast %375 : vector<1x128x256xbf16> to vector<128x256xbf16>
    %cst_141 = arith.constant dense<0.000000e+00> : vector<16x256xf32>
    %377 = tpu.matmul %374, %376, %cst_141 {dimension_numbers = #tpu.dot_dimension_numbers<[1], [0], [0], [1], [0, 0, 1, 1], [], []>} : vector<16x128xbf16>, vector<128x256xbf16>, vector<16x256xf32> -> vector<16x256xf32>
    %c1_142 = arith.constant 1 : index
    %c0_143 = arith.constant 0 : index
    %c0_144 = arith.constant 0 : index
    %378 = vector.load %arg11[%c1_142, %c0_143, %c0_144] : memref<2x1x256xf32, #tpu.memory_space<vmem>>, vector<1x1x256xf32>
    %379 = vector.shape_cast %378 : vector<1x1x256xf32> to vector<1x256xf32>
    %380 = vector.broadcast %379 : vector<1x256xf32> to vector<16x256xf32>
    %381 = arith.addf %377, %380 : vector<16x256xf32>
    %382 = arith.mulf %381, %381 : vector<16x256xf32>
    %383 = arith.mulf %381, %382 : vector<16x256xf32>
    %cst_145 = arith.constant 4.471500e-02 : f32
    %384 = vector.broadcast %cst_145 : f32 to vector<16x256xf32>
    %385 = arith.mulf %384, %383 : vector<16x256xf32>
    %386 = arith.addf %381, %385 : vector<16x256xf32>
    %cst_146 = arith.constant 0.797884583 : f32
    %387 = vector.broadcast %cst_146 : f32 to vector<16x256xf32>
    %388 = arith.mulf %387, %386 : vector<16x256xf32>
    %389 = math.tanh %388 : vector<16x256xf32>
    %cst_147 = arith.constant 1.000000e+00 : f32
    %390 = vector.broadcast %cst_147 : f32 to vector<16x256xf32>
    %391 = arith.addf %390, %389 : vector<16x256xf32>
    %cst_148 = arith.constant 5.000000e-01 : f32
    %392 = vector.broadcast %cst_148 : f32 to vector<16x256xf32>
    %393 = arith.mulf %392, %391 : vector<16x256xf32>
    %394 = arith.mulf %381, %393 : vector<16x256xf32>
    %395 = arith.truncf %394 : vector<16x256xf32> to vector<16x256xbf16>
    %c1_149 = arith.constant 1 : index
    %c0_150 = arith.constant 0 : index
    %c0_151 = arith.constant 0 : index
    %396 = vector.load %arg12[%c1_149, %c0_150, %c0_151] : memref<2x256x128xbf16, #tpu.memory_space<vmem>>, vector<1x256x128xbf16>
    %397 = vector.shape_cast %396 : vector<1x256x128xbf16> to vector<256x128xbf16>
    %cst_152 = arith.constant dense<0.000000e+00> : vector<16x128xf32>
    %398 = tpu.matmul %395, %397, %cst_152 {dimension_numbers = #tpu.dot_dimension_numbers<[1], [0], [0], [1], [0, 0, 1, 1], [], []>} : vector<16x256xbf16>, vector<256x128xbf16>, vector<16x128xf32> -> vector<16x128xf32>
    %399 = arith.addf %347, %398 : vector<16x128xf32>
    %c1_153 = arith.constant 1 : index
    %c0_154 = arith.constant 0 : index
    %c0_155 = arith.constant 0 : index
    %400 = vector.load %arg13[%c1_153, %c0_154, %c0_155] : memref<2x1x128xf32, #tpu.memory_space<vmem>>, vector<1x1x128xf32>
    %401 = vector.shape_cast %400 : vector<1x1x128xf32> to vector<1x128xf32>
    %402 = vector.broadcast %401 : vector<1x128xf32> to vector<16x128xf32>
    %403 = arith.addf %399, %402 : vector<16x128xf32>
    %404 = vector.extract_strided_slice %403 {offsets = [8, 0], sizes = [8, 128], strides = [1, 1]} : vector<16x128xf32> to vector<8x128xf32>
    %c0_156 = arith.constant 0 : index
    %c0_157 = arith.constant 0 : index
    %405 = vector.load %arg14[%c0_156, %c0_157] : memref<1x128xf32, #tpu.memory_space<vmem>>, vector<1x128xf32>
    %c0_158 = arith.constant 0 : index
    %c0_159 = arith.constant 0 : index
    %406 = vector.load %arg15[%c0_158, %c0_159] : memref<1x128xf32, #tpu.memory_space<vmem>>, vector<1x128xf32>
    %cst_160 = arith.constant dense<0.000000e+00> : vector<8xf32>
    %407 = vector.multi_reduction <add>, %404, %cst_160 [1] : vector<8x128xf32> to vector<8xf32>
    %408 = vector.shape_cast %407 : vector<8xf32> to vector<8x1xf32>
    %cst_161 = arith.constant 1.280000e+02 : f32
    %409 = vector.broadcast %cst_161 : f32 to vector<8x1xf32>
    %410 = arith.divf %408, %409 : vector<8x1xf32>
    %411 = vector.broadcast %410 : vector<8x1xf32> to vector<8x128xf32>
    %412 = arith.subf %404, %411 : vector<8x128xf32>
    %413 = arith.mulf %412, %412 : vector<8x128xf32>
    %cst_162 = arith.constant dense<0.000000e+00> : vector<8xf32>
    %414 = vector.multi_reduction <add>, %413, %cst_162 [1] : vector<8x128xf32> to vector<8xf32>
    %415 = vector.shape_cast %414 : vector<8xf32> to vector<8x1xf32>
    %cst_163 = arith.constant 1.280000e+02 : f32
    %416 = vector.broadcast %cst_163 : f32 to vector<8x1xf32>
    %417 = arith.divf %415, %416 : vector<8x1xf32>
    %418 = vector.broadcast %410 : vector<8x1xf32> to vector<8x128xf32>
    %419 = arith.subf %404, %418 : vector<8x128xf32>
    %cst_164 = arith.constant 9.99999974E-6 : f32
    %420 = vector.broadcast %cst_164 : f32 to vector<8x1xf32>
    %421 = arith.addf %417, %420 : vector<8x1xf32>
    %422 = math.rsqrt %421 : vector<8x1xf32>
    %423 = vector.broadcast %422 : vector<8x1xf32> to vector<8x128xf32>
    %424 = arith.mulf %419, %423 : vector<8x128xf32>
    %425 = vector.broadcast %405 : vector<1x128xf32> to vector<8x128xf32>
    %426 = arith.mulf %424, %425 : vector<8x128xf32>
    %427 = vector.broadcast %406 : vector<1x128xf32> to vector<8x128xf32>
    %428 = arith.addf %426, %427 : vector<8x128xf32>
    %429 = arith.truncf %428 : vector<8x128xf32> to vector<8x128xbf16>
    %c0_165 = arith.constant 0 : index
    %c0_166 = arith.constant 0 : index
    %430 = vector.load %arg16[%c0_165, %c0_166] : memref<128x128xbf16, #tpu.memory_space<vmem>>, vector<128x128xbf16>
    %cst_167 = arith.constant dense<0.000000e+00> : vector<8x128xf32>
    %431 = tpu.matmul %429, %430, %cst_167 {dimension_numbers = #tpu.dot_dimension_numbers<[1], [0], [0], [1], [0, 0, 1, 1], [], []>} : vector<8x128xbf16>, vector<128x128xbf16>, vector<8x128xf32> -> vector<8x128xf32>
    %c0_168 = arith.constant 0 : index
    %c0_169 = arith.constant 0 : index
    %432 = vector.load %arg17[%c0_168, %c0_169] : memref<1x128xf32, #tpu.memory_space<vmem>>, vector<1x128xf32>
    %433 = vector.broadcast %432 : vector<1x128xf32> to vector<8x128xf32>
    %434 = arith.addf %431, %433 : vector<8x128xf32>
    %435 = arith.truncf %434 : vector<8x128xf32> to vector<8x128xbf16>
    %c0_170 = arith.constant 0 : index
    %c0_171 = arith.constant 0 : index
    %436 = vector.load %arg18[%c0_170, %c0_171] : memref<8x128xbf16, #tpu.memory_space<vmem>>, vector<8x128xbf16>
    %cst_172 = arith.constant dense<0.000000e+00> : vector<128x128xf32>
    %437 = tpu.matmul %435, %436, %cst_172 {dimension_numbers = #tpu.dot_dimension_numbers<[0], [0], [1], [1], [0, 1, 1, 1], [], []>} : vector<8x128xbf16>, vector<8x128xbf16>, vector<128x128xf32> -> vector<128x128xf32>
    %c0_173 = arith.constant 0 : index
    %c0_174 = arith.constant 0 : index
    %c0_175 = arith.constant 0 : index
    %438 = vector.load %arg19[%c0_173, %c0_174, %c0_175] : memref<1x128x128xf32, #tpu.memory_space<vmem>>, vector<1x128x128xf32>
    %439 = vector.shape_cast %438 : vector<1x128x128xf32> to vector<128x128xf32>
    %440 = vector.shape_cast %437 : vector<128x128xf32> to vector<1x128x128xf32>
    tpu.vector_store %arg19[%c0_173, %c0_174, %c0_175], %440 {strides = array<i32>} : memref<1x128x128xf32, #tpu.memory_space<vmem>>, vector<1x128x128xf32>,
    return
  }
  func.func @transform_0(%arg0: i32) -> (i32, i32, i32) {
    %c0_i32 = arith.constant 0 : i32
    %c0_i32_0 = arith.constant 0 : i32
    %c0_i32_1 = arith.constant 0 : i32
    return %arg0, %c0_i32, %c0_i32_0 : i32, i32, i32
  }
  func.func @transform_1(%arg0: i32) -> (i32, i32, i32) {
    %c0_i32 = arith.constant 0 : i32
    %c0_i32_0 = arith.constant 0 : i32
    %c0_i32_1 = arith.constant 0 : i32
    %c0_i32_2 = arith.constant 0 : i32
    return %c0_i32, %c0_i32_0, %c0_i32_1 : i32, i32, i32
  }
  func.func @transform_2(%arg0: i32) -> (i32, i32, i32) {
    %c0_i32 = arith.constant 0 : i32
    %c0_i32_0 = arith.constant 0 : i32
    %c0_i32_1 = arith.constant 0 : i32
    %c0_i32_2 = arith.constant 0 : i32
    return %c0_i32, %c0_i32_0, %c0_i32_1 : i32, i32, i32
  }
  func.func @transform_3(%arg0: i32) -> (i32, i32, i32) {
    %c0_i32 = arith.constant 0 : i32
    %c0_i32_0 = arith.constant 0 : i32
    %c0_i32_1 = arith.constant 0 : i32
    %c0_i32_2 = arith.constant 0 : i32
    return %c0_i32, %c0_i32_0, %c0_i32_1 : i32, i32, i32
  }
  func.func @transform_4(%arg0: i32) -> (i32, i32, i32) {
    %c0_i32 = arith.constant 0 : i32
    %c0_i32_0 = arith.constant 0 : i32
    %c0_i32_1 = arith.constant 0 : i32
    %c0_i32_2 = arith.constant 0 : i32
    return %c0_i32, %c0_i32_0, %c0_i32_1 : i32, i32, i32
  }
  func.func @transform_5(%arg0: i32) -> (i32, i32, i32) {
    %c0_i32 = arith.constant 0 : i32
    %c0_i32_0 = arith.constant 0 : i32
    %c0_i32_1 = arith.constant 0 : i32
    %c0_i32_2 = arith.constant 0 : i32
    return %c0_i32, %c0_i32_0, %c0_i32_1 : i32, i32, i32
  }
  func.func @transform_6(%arg0: i32) -> (i32, i32, i32) {
    %c0_i32 = arith.constant 0 : i32
    %c0_i32_0 = arith.constant 0 : i32
    %c0_i32_1 = arith.constant 0 : i32
    %c0_i32_2 = arith.constant 0 : i32
    return %c0_i32, %c0_i32_0, %c0_i32_1 : i32, i32, i32
  }
  func.func @transform_7(%arg0: i32) -> (i32, i32, i32) {
    %c0_i32 = arith.constant 0 : i32
    %c0_i32_0 = arith.constant 0 : i32
    %c0_i32_1 = arith.constant 0 : i32
    %c0_i32_2 = arith.constant 0 : i32
    return %c0_i32, %c0_i32_0, %c0_i32_1 : i32, i32, i32
  }
  func.func @transform_8(%arg0: i32) -> (i32, i32, i32) {
    %c0_i32 = arith.constant 0 : i32
    %c0_i32_0 = arith.constant 0 : i32
    %c0_i32_1 = arith.constant 0 : i32
    %c0_i32_2 = arith.constant 0 : i32
    return %c0_i32, %c0_i32_0, %c0_i32_1 : i32, i32, i32
  }
  func.func @transform_9(%arg0: i32) -> (i32, i32, i32) {
    %c0_i32 = arith.constant 0 : i32
    %c0_i32_0 = arith.constant 0 : i32
    %c0_i32_1 = arith.constant 0 : i32
    %c0_i32_2 = arith.constant 0 : i32
    return %c0_i32, %c0_i32_0, %c0_i32_1 : i32, i32, i32
  }
  func.func @transform_10(%arg0: i32) -> (i32, i32, i32) {
    %c0_i32 = arith.constant 0 : i32
    %c0_i32_0 = arith.constant 0 : i32
    %c0_i32_1 = arith.constant 0 : i32
    %c0_i32_2 = arith.constant 0 : i32
    return %c0_i32, %c0_i32_0, %c0_i32_1 : i32, i32, i32
  }
  func.func @transform_11(%arg0: i32) -> (i32, i32, i32) {
    %c0_i32 = arith.constant 0 : i32
    %c0_i32_0 = arith.constant 0 : i32
    %c0_i32_1 = arith.constant 0 : i32
    %c0_i32_2 = arith.constant 0 : i32
    return %c0_i32, %c0_i32_0, %c0_i32_1 : i32, i32, i32
  }
  func.func @transform_12(%arg0: i32) -> (i32, i32, i32) {
    %c0_i32 = arith.constant 0 : i32
    %c0_i32_0 = arith.constant 0 : i32
    %c0_i32_1 = arith.constant 0 : i32
    %c0_i32_2 = arith.constant 0 : i32
    return %c0_i32, %c0_i32_0, %c0_i32_1 : i32, i32, i32
  }
  func.func @transform_13(%arg0: i32) -> (i32, i32) {
    %c0_i32 = arith.constant 0 : i32
    %c0_i32_0 = arith.constant 0 : i32
    %c0_i32_1 = arith.constant 0 : i32
    return %c0_i32, %c0_i32_0 : i32, i32
  }
  func.func @transform_14(%arg0: i32) -> (i32, i32) {
    %c0_i32 = arith.constant 0 : i32
    %c0_i32_0 = arith.constant 0 : i32
    %c0_i32_1 = arith.constant 0 : i32
    return %c0_i32, %c0_i32_0 : i32, i32
  }
  func.func @transform_15(%arg0: i32) -> (i32, i32) {
    %c0_i32 = arith.constant 0 : i32
    %c0_i32_0 = arith.constant 0 : i32
    %c0_i32_1 = arith.constant 0 : i32
    return %c0_i32, %c0_i32_0 : i32, i32
  }
  func.func @transform_16(%arg0: i32) -> (i32, i32) {
    %c0_i32 = arith.constant 0 : i32
    %c0_i32_0 = arith.constant 0 : i32
    %c0_i32_1 = arith.constant 0 : i32
    return %c0_i32, %c0_i32_0 : i32, i32
  }
  func.func @transform_17(%arg0: i32) -> (i32, i32) {
    %c0_i32 = arith.constant 0 : i32
    %c0_i32_0 = arith.constant 0 : i32
    %c0_i32_1 = arith.constant 0 : i32
    return %c0_i32, %c0_i32_0 : i32, i32
  }
  func.func @transform_18(%arg0: i32) -> (i32, i32, i32) {
    %c0_i32 = arith.constant 0 : i32
    %c0_i32_0 = arith.constant 0 : i32
    %c0_i32_1 = arith.constant 0 : i32
    return %arg0, %c0_i32, %c0_i32_0 : i32, i32, i32
  }
}

module attributes {stable_mosaic.version = 11 : i64} {
  func.func @hyponet_kernel(%arg0: i32, %arg1: i32, %arg2: memref<1x16x3xf32, #tpu.memory_space<vmem>>, %arg3: memref<1x128x128xf32, #tpu.memory_space<vmem>>, %arg4: memref<1x75xf32, #tpu.memory_space<vmem>>, %arg5: memref<1x75xf32, #tpu.memory_space<vmem>>, %arg6: memref<1x75xf32, #tpu.memory_space<vmem>>, %arg7: memref<1x75xf32, #tpu.memory_space<vmem>>, %arg8: memref<1x75xf32, #tpu.memory_space<vmem>>, %arg9: memref<1x75xf32, #tpu.memory_space<vmem>>, %arg10: memref<75x128xbf16, #tpu.memory_space<vmem>>, %arg11: memref<1x128xf32, #tpu.memory_space<vmem>>, %arg12: memref<1x128xf32, #tpu.memory_space<vmem>>, %arg13: memref<128x128xbf16, #tpu.memory_space<vmem>>, %arg14: memref<1x128xf32, #tpu.memory_space<vmem>>, %arg15: memref<1x16x128xf32, #tpu.memory_space<vmem>>) attributes {dimension_semantics = [#tpu.dimension_semantics<parallel>, #tpu.dimension_semantics<parallel>], iteration_bounds = array<i64: 2, 1>, scalar_prefetch = 0 : i64, scratch_operands = 0 : i64, tpu.core_type = #tpu.core_type<tc>, window_params = [{transform_indices = @transform_0, window_bounds = array<i64: 1, 16, 3>}, {transform_indices = @transform_1, window_bounds = array<i64: 1, 128, 128>}, {pipeline_mode = #tpu.pipeline_mode<synchronous>, transform_indices = @transform_2, window_bounds = array<i64: 1, 75>}, {pipeline_mode = #tpu.pipeline_mode<synchronous>, transform_indices = @transform_3, window_bounds = array<i64: 1, 75>}, {pipeline_mode = #tpu.pipeline_mode<synchronous>, transform_indices = @transform_4, window_bounds = array<i64: 1, 75>}, {pipeline_mode = #tpu.pipeline_mode<synchronous>, transform_indices = @transform_5, window_bounds = array<i64: 1, 75>}, {pipeline_mode = #tpu.pipeline_mode<synchronous>, transform_indices = @transform_6, window_bounds = array<i64: 1, 75>}, {pipeline_mode = #tpu.pipeline_mode<synchronous>, transform_indices = @transform_7, window_bounds = array<i64: 1, 75>}, {pipeline_mode = #tpu.pipeline_mode<synchronous>, transform_indices = @transform_8, window_bounds = array<i64: 75, 128>}, {pipeline_mode = #tpu.pipeline_mode<synchronous>, transform_indices = @transform_9, window_bounds = array<i64: 1, 128>}, {pipeline_mode = #tpu.pipeline_mode<synchronous>, transform_indices = @transform_10, window_bounds = array<i64: 1, 128>}, {pipeline_mode = #tpu.pipeline_mode<synchronous>, transform_indices = @transform_11, window_bounds = array<i64: 128, 128>}, {pipeline_mode = #tpu.pipeline_mode<synchronous>, transform_indices = @transform_12, window_bounds = array<i64: 1, 128>}, {transform_indices = @transform_13, window_bounds = array<i64: 1, 16, 128>}]} {
    %c0 = arith.constant 0 : index
    %c0_0 = arith.constant 0 : index
    %c0_1 = arith.constant 0 : index
    %0 = vector.load %arg2[%c0, %c0_0, %c0_1] : memref<1x16x3xf32, #tpu.memory_space<vmem>>, vector<1x16x3xf32>
    %1 = vector.shape_cast %0 : vector<1x16x3xf32> to vector<16x3xf32>
    %2 = vector.extract_strided_slice %1 {offsets = [0, 0], sizes = [16, 1], strides = [1, 1]} : vector<16x3xf32> to vector<16x1xf32>
    %c0_2 = arith.constant 0 : index
    %c0_3 = arith.constant 0 : index
    %3 = vector.load %arg4[%c0_2, %c0_3] : memref<1x75xf32, #tpu.memory_space<vmem>>, vector<1x75xf32>
    %4 = vector.broadcast %2 : vector<16x1xf32> to vector<16x75xf32>
    %5 = vector.broadcast %3 : vector<1x75xf32> to vector<16x75xf32>
    %6 = arith.mulf %4, %5 : vector<16x75xf32>
    %7 = vector.extract_strided_slice %1 {offsets = [0, 1], sizes = [16, 1], strides = [1, 1]} : vector<16x3xf32> to vector<16x1xf32>
    %c0_4 = arith.constant 0 : index
    %c0_5 = arith.constant 0 : index
    %8 = vector.load %arg5[%c0_4, %c0_5] : memref<1x75xf32, #tpu.memory_space<vmem>>, vector<1x75xf32>
    %9 = vector.broadcast %7 : vector<16x1xf32> to vector<16x75xf32>
    %10 = vector.broadcast %8 : vector<1x75xf32> to vector<16x75xf32>
    %11 = arith.mulf %9, %10 : vector<16x75xf32>
    %12 = arith.addf %6, %11 : vector<16x75xf32>
    %13 = vector.extract_strided_slice %1 {offsets = [0, 2], sizes = [16, 1], strides = [1, 1]} : vector<16x3xf32> to vector<16x1xf32>
    %c0_6 = arith.constant 0 : index
    %c0_7 = arith.constant 0 : index
    %14 = vector.load %arg6[%c0_6, %c0_7] : memref<1x75xf32, #tpu.memory_space<vmem>>, vector<1x75xf32>
    %15 = vector.broadcast %13 : vector<16x1xf32> to vector<16x75xf32>
    %16 = vector.broadcast %14 : vector<1x75xf32> to vector<16x75xf32>
    %17 = arith.mulf %15, %16 : vector<16x75xf32>
    %18 = arith.addf %12, %17 : vector<16x75xf32>
    %c0_8 = arith.constant 0 : index
    %c0_9 = arith.constant 0 : index
    %19 = vector.load %arg7[%c0_8, %c0_9] : memref<1x75xf32, #tpu.memory_space<vmem>>, vector<1x75xf32>
    %20 = vector.broadcast %19 : vector<1x75xf32> to vector<16x75xf32>
    %21 = arith.mulf %20, %18 : vector<16x75xf32>
    %c0_10 = arith.constant 0 : index
    %c0_11 = arith.constant 0 : index
    %22 = vector.load %arg8[%c0_10, %c0_11] : memref<1x75xf32, #tpu.memory_space<vmem>>, vector<1x75xf32>
    %23 = math.sin %18 : vector<16x75xf32>
    %24 = vector.broadcast %22 : vector<1x75xf32> to vector<16x75xf32>
    %25 = arith.mulf %24, %23 : vector<16x75xf32>
    %26 = arith.addf %21, %25 : vector<16x75xf32>
    %c0_12 = arith.constant 0 : index
    %c0_13 = arith.constant 0 : index
    %27 = vector.load %arg9[%c0_12, %c0_13] : memref<1x75xf32, #tpu.memory_space<vmem>>, vector<1x75xf32>
    %28 = math.cos %18 : vector<16x75xf32>
    %29 = vector.broadcast %27 : vector<1x75xf32> to vector<16x75xf32>
    %30 = arith.mulf %29, %28 : vector<16x75xf32>
    %31 = arith.addf %26, %30 : vector<16x75xf32>
    %32 = arith.truncf %31 : vector<16x75xf32> to vector<16x75xbf16>
    %c0_14 = arith.constant 0 : index
    %c0_15 = arith.constant 0 : index
    %33 = vector.load %arg10[%c0_14, %c0_15] : memref<75x128xbf16, #tpu.memory_space<vmem>>, vector<75x128xbf16>
    %cst = arith.constant dense<0.000000e+00> : vector<16x128xf32>
    %34 = tpu.matmul %32, %33, %cst {dimension_numbers = #tpu.dot_dimension_numbers<[1], [0], [0], [1], [0, 0, 1, 1], [], []>} : vector<16x75xbf16>, vector<75x128xbf16>, vector<16x128xf32> -> vector<16x128xf32>
    %c0_16 = arith.constant 0 : index
    %c0_17 = arith.constant 0 : index
    %35 = vector.load %arg11[%c0_16, %c0_17] : memref<1x128xf32, #tpu.memory_space<vmem>>, vector<1x128xf32>
    %36 = vector.broadcast %35 : vector<1x128xf32> to vector<16x128xf32>
    %37 = arith.addf %34, %36 : vector<16x128xf32>
    %cst_18 = arith.constant 0.000000e+00 : f32
    %38 = vector.broadcast %cst_18 : f32 to vector<16x128xf32>
    %39 = arith.maximumf %37, %38 : vector<16x128xf32>
    %c0_19 = arith.constant 0 : index
    %c0_20 = arith.constant 0 : index
    %c0_21 = arith.constant 0 : index
    %40 = vector.load %arg3[%c0_19, %c0_20, %c0_21] : memref<1x128x128xf32, #tpu.memory_space<vmem>>, vector<1x128x128xf32>
    %41 = vector.shape_cast %40 : vector<1x128x128xf32> to vector<128x128xf32>
    %42 = arith.truncf %41 : vector<128x128xf32> to vector<128x128xbf16>
    %43 = arith.truncf %39 : vector<16x128xf32> to vector<16x128xbf16>
    %cst_22 = arith.constant dense<0.000000e+00> : vector<16x128xf32>
    %44 = tpu.matmul %43, %42, %cst_22 {dimension_numbers = #tpu.dot_dimension_numbers<[1], [0], [0], [1], [0, 0, 1, 1], [], []>} : vector<16x128xbf16>, vector<128x128xbf16>, vector<16x128xf32> -> vector<16x128xf32>
    %c0_23 = arith.constant 0 : index
    %c0_24 = arith.constant 0 : index
    %45 = vector.load %arg12[%c0_23, %c0_24] : memref<1x128xf32, #tpu.memory_space<vmem>>, vector<1x128xf32>
    %46 = vector.broadcast %45 : vector<1x128xf32> to vector<16x128xf32>
    %47 = arith.addf %44, %46 : vector<16x128xf32>
    %cst_25 = arith.constant 0.000000e+00 : f32
    %48 = vector.broadcast %cst_25 : f32 to vector<16x128xf32>
    %49 = arith.maximumf %47, %48 : vector<16x128xf32>
    %50 = arith.truncf %49 : vector<16x128xf32> to vector<16x128xbf16>
    %c0_26 = arith.constant 0 : index
    %c0_27 = arith.constant 0 : index
    %51 = vector.load %arg13[%c0_26, %c0_27] : memref<128x128xbf16, #tpu.memory_space<vmem>>, vector<128x128xbf16>
    %cst_28 = arith.constant dense<0.000000e+00> : vector<16x128xf32>
    %52 = tpu.matmul %50, %51, %cst_28 {dimension_numbers = #tpu.dot_dimension_numbers<[1], [0], [0], [1], [0, 0, 1, 1], [], []>} : vector<16x128xbf16>, vector<128x128xbf16>, vector<16x128xf32> -> vector<16x128xf32>
    %c0_29 = arith.constant 0 : index
    %c0_30 = arith.constant 0 : index
    %53 = vector.load %arg14[%c0_29, %c0_30] : memref<1x128xf32, #tpu.memory_space<vmem>>, vector<1x128xf32>
    %54 = vector.broadcast %53 : vector<1x128xf32> to vector<16x128xf32>
    %55 = arith.addf %52, %54 : vector<16x128xf32>
    %c0_31 = arith.constant 0 : index
    %c0_32 = arith.constant 0 : index
    %c0_33 = arith.constant 0 : index
    %56 = vector.load %arg15[%c0_31, %c0_32, %c0_33] : memref<1x16x128xf32, #tpu.memory_space<vmem>>, vector<1x16x128xf32>
    %57 = vector.shape_cast %56 : vector<1x16x128xf32> to vector<16x128xf32>
    %58 = vector.shape_cast %55 : vector<16x128xf32> to vector<1x16x128xf32>
    tpu.vector_store %arg15[%c0_31, %c0_32, %c0_33], %58 {strides = array<i32>} : memref<1x16x128xf32, #tpu.memory_space<vmem>>, vector<1x16x128xf32>,
    return
  }
  func.func @transform_0(%arg0: i32, %arg1: i32) -> (i32, i32, i32) {
    %c0_i32 = arith.constant 0 : i32
    %c0_i32_0 = arith.constant 0 : i32
    return %arg0, %arg1, %c0_i32 : i32, i32, i32
  }
  func.func @transform_1(%arg0: i32, %arg1: i32) -> (i32, i32, i32) {
    %c0_i32 = arith.constant 0 : i32
    %c0_i32_0 = arith.constant 0 : i32
    %c0_i32_1 = arith.constant 0 : i32
    return %arg0, %c0_i32, %c0_i32_0 : i32, i32, i32
  }
  func.func @transform_2(%arg0: i32, %arg1: i32) -> (i32, i32) {
    %c0_i32 = arith.constant 0 : i32
    %c0_i32_0 = arith.constant 0 : i32
    %c0_i32_1 = arith.constant 0 : i32
    return %c0_i32, %c0_i32_0 : i32, i32
  }
  func.func @transform_3(%arg0: i32, %arg1: i32) -> (i32, i32) {
    %c0_i32 = arith.constant 0 : i32
    %c0_i32_0 = arith.constant 0 : i32
    %c0_i32_1 = arith.constant 0 : i32
    return %c0_i32, %c0_i32_0 : i32, i32
  }
  func.func @transform_4(%arg0: i32, %arg1: i32) -> (i32, i32) {
    %c0_i32 = arith.constant 0 : i32
    %c0_i32_0 = arith.constant 0 : i32
    %c0_i32_1 = arith.constant 0 : i32
    return %c0_i32, %c0_i32_0 : i32, i32
  }
  func.func @transform_5(%arg0: i32, %arg1: i32) -> (i32, i32) {
    %c0_i32 = arith.constant 0 : i32
    %c0_i32_0 = arith.constant 0 : i32
    %c0_i32_1 = arith.constant 0 : i32
    return %c0_i32, %c0_i32_0 : i32, i32
  }
  func.func @transform_6(%arg0: i32, %arg1: i32) -> (i32, i32) {
    %c0_i32 = arith.constant 0 : i32
    %c0_i32_0 = arith.constant 0 : i32
    %c0_i32_1 = arith.constant 0 : i32
    return %c0_i32, %c0_i32_0 : i32, i32
  }
  func.func @transform_7(%arg0: i32, %arg1: i32) -> (i32, i32) {
    %c0_i32 = arith.constant 0 : i32
    %c0_i32_0 = arith.constant 0 : i32
    %c0_i32_1 = arith.constant 0 : i32
    return %c0_i32, %c0_i32_0 : i32, i32
  }
  func.func @transform_8(%arg0: i32, %arg1: i32) -> (i32, i32) {
    %c0_i32 = arith.constant 0 : i32
    %c0_i32_0 = arith.constant 0 : i32
    %c0_i32_1 = arith.constant 0 : i32
    return %c0_i32, %c0_i32_0 : i32, i32
  }
  func.func @transform_9(%arg0: i32, %arg1: i32) -> (i32, i32) {
    %c0_i32 = arith.constant 0 : i32
    %c0_i32_0 = arith.constant 0 : i32
    %c0_i32_1 = arith.constant 0 : i32
    return %c0_i32, %c0_i32_0 : i32, i32
  }
  func.func @transform_10(%arg0: i32, %arg1: i32) -> (i32, i32) {
    %c0_i32 = arith.constant 0 : i32
    %c0_i32_0 = arith.constant 0 : i32
    %c0_i32_1 = arith.constant 0 : i32
    return %c0_i32, %c0_i32_0 : i32, i32
  }
  func.func @transform_11(%arg0: i32, %arg1: i32) -> (i32, i32) {
    %c0_i32 = arith.constant 0 : i32
    %c0_i32_0 = arith.constant 0 : i32
    %c0_i32_1 = arith.constant 0 : i32
    return %c0_i32, %c0_i32_0 : i32, i32
  }
  func.func @transform_12(%arg0: i32, %arg1: i32) -> (i32, i32) {
    %c0_i32 = arith.constant 0 : i32
    %c0_i32_0 = arith.constant 0 : i32
    %c0_i32_1 = arith.constant 0 : i32
    return %c0_i32, %c0_i32_0 : i32, i32
  }
  func.func @transform_13(%arg0: i32, %arg1: i32) -> (i32, i32, i32) {
    %c0_i32 = arith.constant 0 : i32
    %c0_i32_0 = arith.constant 0 : i32
    return %arg0, %arg1, %c0_i32 : i32, i32, i32
  }
}

</mosaic_0001>

<bundles_post_ra>
// kernel: low_rank_modulated_transinr_forward.3
= control target key start
LH: loop header
LB: loop body
LE: loop exit
PB: predicated region body
PF: predicated region fallthrough
CT: control target
= control target key end

     0   :  { %s1703_s25 = smov 0   ;;  %s1705_s26 = smov 0   ;;  %s1926_s0 = inlined_call_operand.vmem [shape: f32[2,16,3], index: 0, kind: input, shape index: {}]   ;;  %s1927_s1 = inlined_call_operand.vmem [shape: f32[2,128,128], index: 1, kind: input, shape index: {}]   ;;  %s1928_s2 = inlined_call_operand.vmem [shape: f32[1,75], index: 2, kind: input, shape index: {}]   ;;  %s1929_s3 = inlined_call_operand.vmem [shape: f32[1,75], index: 3, kind: input, shape index: {}]   ;;  %s1930_s4 = inlined_call_operand.vmem [shape: f32[1,75], index: 4, kind: input, shape index: {}]   ;;  %s1931_s5 = inlined_call_operand.vmem [shape: f32[1,75], index: 5, kind: input, shape index: {}]   ;;  %s1932_s6 = inlined_call_operand.vmem [shape: f32[1,75], index: 6, kind: input, shape index: {}]   ;;  %s1933_s7 = inlined_call_operand.vmem [shape: f32[1,75], index: 7, kind: input, shape index: {}]   ;;  %s1934_s8 = inlined_call_operand.vmem [shape: bf16[75,128], index: 8, kind: input, shape index: {}]   ;;  %s1935_s9 = inlined_call_operand.vmem [shape: f32[1,128], index: 9, kind: input, shape index: {}]   ;;  %s1936_s10 = inlined_call_operand.vmem [shape: f32[1,128], index: 10, kind: input, shape index: {}]   ;;  %s1937_s11 = inlined_call_operand.vmem [shape: bf16[128,128], index: 11, kind: input, shape index: {}]   ;;  %s1938_s12 = inlined_call_operand.vmem [shape: f32[1,128], index: 12, kind: input, shape index: {}]   ;;  %s1939_s13 = inlined_call_operand.vmem [shape: f32[2,16,128], index: 13, kind: output, shape index: {}]  }
   0x1   :  { %s1707_s27 = smov 0  }
   0x2 LB: > { %s35_s28 = sadd.s32 1, %s1615_s26  ;;  %p1399_p0 = scmp.ge.s32.totalorder %s1619_s27, 1  ;;  %s1619_s27 = sphi %s1707_s27, %s23_s27   ;;  %s1615_s26 = sphi %s1705_s26, %s1941_s26   ;;  %s1611_s25 = sphi %s1703_s25, %s1940_s25  }
   0x3   : > { %p37_p1 = scmp.ge.s32.totalorder %s35_s28, 2  ;;  %p418_p2 = scmp.lt.s32.totalorder %s1619_s27, 3 }
   0x5   : > { %s1943_s28 = smov (%p37_p1, %s35_s28), 0  ;;  %p419_p3 = pnand %p1399_p0, %p418_p2 }
   0x6   : > { %p476_p4 = scmp.lt.s32.totalorder (!%p419_p3), %s1611_s25, 1  ;;  %v1621_v0 = vmov (!%p419_p3), 1   ;;  %v1622_v1 = vmov (!%p419_p3), 0   ;;  %v1623_v4 = vmov (!%p419_p3), 2   ;;  %v1576_v5 = vld [vmem:[%s1934_s8] sm:$0xff] (!%p419_p3)   ;;  %v1624_v6 = vmov (!%p419_p3), 0.0  }
   0x7   : > { %422 = sbr.rel (%p419_p3) target bundleno = 913 (0x391), region = 72  ;;  %1573 = vset.pattern.permute.xlu1 (!%p419_p3), %v1621_v0  ;;  %1572 = vset.pattern.permute.xlu0 (!%p419_p3), %v1622_v1  ;;  %v1577_v7 = vld [vmem:[%s1934_s8 + $0x8] sm:$0xff] (!%p419_p3)   ;;  %vm1625_vm0 = vmmov (!%p419_p3), 0   ;;  %vm1056_vm1 = vcmask (!%p419_p3), 1044480   ;;  %v1578_v8 = vld [vmem:[%s1934_s8 + $0x10] sm:$0xff] (!%p419_p3)   ;;  %vm1057_vm2 = vcmask (!%p419_p3), 1045504  }
   0x8   : > { %1474 = vmatprep.subr.bf16.mxu0 (!%p419_p3), %v1624_v6  ;;  %1488 = vmatprep.subr.bf16.mxu1 (!%p419_p3), %v1624_v6  ;;  %v1626_v9 = vmov (!%p419_p3), 65535   ;;  %v1579_v11 = vld [vmem:[%s1934_s8 + $0x18] sm:$0xff] (!%p419_p3)   ;;  %v1580_v12 = vld [vmem:[%s1934_s8 + $0x20] sm:$0x3f] (!%p419_p3)  }
   0x9   : > { %1475 = vmatpush3.bf16.msra.mxu0 (!%p419_p3), %v1576_v5  ;;  %1484 = vmatprep.mubr.msk.bf16.mxu0 (!%p419_p3), %vm1625_vm0, %v1624_v6  ;;  %v1058_v10 = vsel (!%p419_p3), %vm1056_vm1, 4294967295, %v1626_v9  ;;  %v1407_v34 = vld [vmem:[%s1929_s3] ss:$0 sm:$0xff] (!%p419_p3)  ;;  %v1627_v9 = vmov (!%p419_p3), 683565275  }
   0xa   : > { %1476 = vmatprep.subr.bf16.mxu0 (!%p419_p3), %v1624_v6  ;;  %1504 = vmatprep.mubr.msk.bf16.mxu1 (!%p419_p3), %vm1625_vm0, %v1624_v6  ;;  %v1059_v13 = vsel (!%p419_p3), %vm1057_vm2, %v1058_v10, 0  ;;  %v1406_v35 = vld [vmem:[%s1928_s2] ss:$0 sm:$0xff] (!%p419_p3) }
   0xb   : > { %v1061_v14 = vand.u32 (!%p419_p3), %v1580_v12, %v1059_v13  ;;  %v1408_v43 = vld [vmem:[%s1930_s4] ss:$0 sm:$0xff] (!%p419_p3)  ;;  %v1628_v13 = vmov (!%p419_p3), 2475754826  }
   0xd   : > { %1477 = vmatpush3.bf16.msra.mxu0 (!%p419_p3), %v1577_v7 }
   0xe   : > { %s1945_s25 = smov (!%p476_p4, %s1611_s25), 1  ;;  %1478 = vmatprep.subr.bf16.mxu0 %v1624_v6 }
   0xf   : > { %s1447_s29 = sshll.u32 %s1945_s25, 4  ;;  %s1448_s14 = sshll.u32 %s1945_s25, 7 }
  0x10   : > { %s483_s15 = scalar_lea.vmem %s1926_s0, %s1447_s29  ;;  %s1759_s17 = scalar_lea.vmem %s1927_s1, %s1448_s14 }
  0x11   : > { %v501_v2 = vld [vmem:[%s483_s15] sm:$0xff]  ;;  %v502_v3 = vld [vmem:[%s483_s15 + $0x8] sm:$0xff]  ;;  %1479 = vmatpush3.bf16.msra.mxu0 %v1578_v8  ;;  %v1108_v17 = vld [vmem:[%s1759_s17 + $0x10] sm:$0xff]  ;;  %s498_s19 = scalar_lea.vmem %s1939_s13, %s1447_s29 }
  0x12   : > { %524 = vperm.xlu1 %1573, %v501_v2   ;;  %506 = vperm.xlu0 %1572, %v501_v2   ;;  %v1106_v15 = vld [vmem:[%s1759_s17] sm:$0xff]  ;;  %v1107_v16 = vld [vmem:[%s1759_s17 + $0x8] sm:$0xff]  ;;  %v1109_v19 = vld [vmem:[%s1759_s17 + $0x18] sm:$0xff] }
  0x13   : > { %1480 = vmatprep.subr.bf16.mxu0 %v1624_v6  ;;  %v1122_v18 = vpack.c.bf16 %v1107_v16, %v1106_v15  ;;  %v1123_v20 = vpack.c.bf16 %v1109_v19, %v1108_v17  ;;  %v1110_v21 = vld [vmem:[%s1759_s17 + $0x20] sm:$0xff]  ;;  %v1111_v22 = vld [vmem:[%s1759_s17 + $0x28] sm:$0xff]  ;;  %v1112_v24 = vld [vmem:[%s1759_s17 + $0x30] sm:$0xff]  ;;  %v1629_v15 = vmov 2131351028  }
  0x14   : > { %v1124_v23 = vpack.c.bf16 %v1111_v22, %v1110_v21  ;;  %v1113_v25 = vld [vmem:[%s1759_s17 + $0x38] sm:$0xff]  ;;  %v1114_v27 = vld [vmem:[%s1759_s17 + $0x40] sm:$0xff]  ;;  %v1115_v28 = vld [vmem:[%s1759_s17 + $0x48] sm:$0xff]  ;;  %v1630_v17 = vmov 2102212464  }
  0x15   : > { %1481 = vmatpush3.bf16.msra.mxu0 %v1579_v11  ;;  %1489 = vmatpush3.bf16.msra.mxu1 %v1122_v18  ;;  %v1125_v26 = vpack.c.bf16 %v1113_v25, %v1112_v24  ;;  %v1126_v31 = vpack.c.bf16 %v1115_v28, %v1114_v27  ;;  %v1116_v32 = vld [vmem:[%s1759_s17 + $0x50] sm:$0xff]  ;;  %v1117_v33 = vld [vmem:[%s1759_s17 + $0x58] sm:$0xff]  ;;  %v1631_v19 = vmov 920167782  }
  0x16   : > { %528 = vperm.xlu1 %1573, %v502_v3   ;;  %511 = vperm.xlu0 %1572, %v502_v3   ;;  %v1127_v38 = vpack.c.bf16 %v1117_v33, %v1116_v32 }
  0x17   : > { %1482 = vmatprep.subr.bf16.mxu0 %v1624_v6  ;;  %1490 = vmatprep.subr.bf16.mxu1 %v1624_v6 }
  0x19   : > { %1483 = vmatpush3.bf16.msra.mxu0 %v1061_v14  ;;  %1491 = vmatpush3.bf16.msra.mxu1 %v1123_v20 }
  0x1a   : > { %1575 = vset.pattern.permute.xlu1 %v1623_v4  ;;  %1574 = vset.pattern.permute.xlu0 %v1623_v4 }
  0x1b   : > { %547 = vperm.xlu1 %1575, %v502_v3   ;;  %543 = vperm.xlu0 %1574, %v501_v2  }
  0x1c   : > { %1508 = vmatprep.subr.bf16.mxu0 %v1624_v6  ;;  %1492 = vmatprep.subr.bf16.mxu1 %v1624_v6 }
  0x1d   : > { %1493 = vmatpush3.bf16.msra.mxu1 %v1124_v23 }
  0x1e   : > { %1494 = vmatprep.subr.bf16.mxu1 %v1624_v6 }
  0x21   : > { %1495 = vmatpush3.bf16.msra.mxu1 %v1125_v26  ;;  %v1632_v26 = vmov 1326507024  }
  0x22   : > { %1496 = vmatprep.subr.bf16.mxu1 %v1624_v6 }
  0x25   : > { %1497 = vmatpush3.bf16.msra.mxu1 %v1126_v31 }
  0x26   : > { %1498 = vmatprep.subr.bf16.mxu1 %v1624_v6 }
  0x29   : > { %1499 = vmatpush3.bf16.msra.mxu1 %v1127_v38 }
  0x2a   : > { %1500 = vmatprep.subr.bf16.mxu1 %v1624_v6 }
  0x91   : > { %v525_v29 = vpop.permute.xlu1 %524  ;;  %v507_v30 = vpop.permute.xlu0 %506 }
  0x92   : > { %v537_v39 = vmul.f32 %v1407_v34, %v525_v29  ;;  %v520_v40 = vmul.f32 %v1406_v35, %v507_v30 }
  0x94   : > { %v539_v46 = vadd.f32 %v537_v39, %v520_v40 }
  0x95   : > { %v529_v36 = vpop.permute.xlu1 %528  ;;  %v512_v37 = vpop.permute.xlu0 %511 }
  0x96   : > { %v538_v41 = vmul.f32 %v1407_v34, %v529_v36  ;;  %v521_v42 = vmul.f32 %v1406_v35, %v512_v37 }
  0x98   : > { %v540_v47 = vadd.f32 %v538_v41, %v521_v42 }
  0x9a   : > { %v548_v44 = vpop.permute.xlu1 %547  ;;  %v544_v45 = vpop.permute.xlu0 %543 }
  0x9b   : > { %v557_v48 = vmul.f32 %v1408_v43, %v548_v44  ;;  %v556_v49 = vmul.f32 %v1408_v43, %v544_v45 }
  0x9d   : > { %v1788_v50 = vadd.f32 %v557_v48, %v540_v47  ;;  %v1790_v51 = vadd.f32 %v556_v49, %v539_v46 }
  0x9f   : > { %v674_v52 = vand.u32 2147483647, %v1788_v50  ;;  %v677_v53 = vand.u32 2139095040, %v1788_v50  ;;  %v573_v54 = vand.u32 2139095040, %v1790_v51  ;;  %v570_v57 = vand.u32 2147483647, %v1790_v51 }
  0xa0   : > { %vm676_vm2 = vcmp.lt.s32.totalorder %v1788_v50, 0 }
  0xa1   : > { %v678_v55 = vshrl.u32 %v677_v53, 23  ;;  %v681_v56 = vand.u32 8388607, %v674_v52  ;;  %v574_v58 = vshrl.u32 %v573_v54, 23  ;;  %v1800_v63 = vand.u32 8388607, %v570_v57 }
  0xa3   : > { %v1414_v59 = vadd.s32 4294967169, %v678_v55  ;;  %v1410_v60 = vadd.s32 4294967169, %v574_v58  ;;  %v682_v62 = vor.u32 8388608, %v681_v56  ;;  %v578_v7 = vor.u32 8388608, %v1800_v63 }
  0xa5   : > { %v684_v61 = vadd.s32 1, %v1414_v59  ;;  %v580_v0 = vadd.s32 1, %v1410_v60  ;;  %v1802_v5 = vshll.u32 %v682_v62, 8 }
  0xa7   : > { %vm685_vm3 = vcmp.gt.s32.totalorder %v684_v61, 0  ;;  %vm581_vm4 = vcmp.gt.s32.totalorder %v580_v0, 0 }
  0xa8   : > { %v686_v1 = vsel %vm685_vm3, %v684_v61, 0  ;;  %v582_v4 = vsel %vm581_vm4, %v580_v0, 0  ;;  %vm675_vm3 = vcmp.le.f32.partialorder %v674_v52, 0.7853982  ;;  %vm572_vm4 = vcmp.lt.s32.totalorder %v1790_v51, 0 }
  0xa9   : > { %v687_v2 = vshrl.u32 %v686_v1, 5  ;;  %v688_v3 = vand.u32 31, %v686_v1  ;;  %v1805_v11 = vshrl.u32 %v582_v4, 5  ;;  %v584_v12 = vand.u32 31, %v582_v4 }
  0xaa   : > { %v618_v1 = vshll.u32 %v578_v7, 8 }
  0xab   : > { %v689_v8 = vsub.s32 32, %v688_v3  ;;  %v691_v10 = vshll.u32 %v1627_v9, %v688_v3  ;;  %v694_v14 = vshll.u32 %v1628_v13, %v688_v3  ;;  %v697_v16 = vshll.u32 %v1629_v15, %v688_v3 }
  0xac   : > { %v700_v18 = vshll.u32 %v1630_v17, %v688_v3  ;;  %v703_v20 = vshll.u32 %v1631_v19, %v688_v3  ;;  %vm706_vm5 = vcmp.lt.s32.totalorder %v687_v2, 1  ;;  %vm707_vm6 = vcmp.lt.s32.totalorder %v687_v2, 2 }
  0xad   : > { %v692_v21 = vshrl.u32 %v1628_v13, %v689_v8  ;;  %v695_v22 = vshrl.u32 %v1629_v15, %v689_v8  ;;  %v698_v23 = vshrl.u32 %v1630_v17, %v689_v8  ;;  %v690_v24 = vshrl.u32 %v1627_v9, %v689_v8 }
  0xae   : > { %v701_v25 = vshrl.u32 %v1631_v19, %v689_v8  ;;  %v704_v27 = vshrl.u32 %v1632_v26, %v689_v8  ;;  %v585_v31 = vsub.s32 32, %v584_v12  ;;  %vm708_vm7 = vcmp.lt.s32.totalorder %v687_v2, 3 }
  0xaf   : > { %v693_v28 = vor.u32 %v692_v21, %v691_v10  ;;  %v696_v29 = vor.u32 %v695_v22, %v694_v14  ;;  %v699_v30 = vor.u32 %v698_v23, %v697_v16  ;;  %vm709_vm8 = vcmp.lt.s32.totalorder %v687_v2, 4 }
  0xb0   : > { %v702_v32 = vor.u32 %v701_v25, %v700_v18  ;;  %v705_v33 = vor.u32 %v704_v27, %v703_v20  ;;  %v587_v41 = vshll.u32 %v1627_v9, %v584_v12  ;;  %v588_v44 = vshrl.u32 %v1628_v13, %v585_v31 }
  0xb1   : > { %v710_v34 = vsel %vm706_vm5, %v690_v24, %v693_v28  ;;  %v711_v35 = vsel %vm709_vm8, %v699_v30, 2102212464  ;;  %v714_v36 = vsel %vm706_vm5, %v693_v28, %v696_v29  ;;  %v718_v37 = vsel %vm706_vm5, %v696_v29, %v699_v30 }
  0xb2   : > { %v712_v38 = vsel %vm708_vm7, %v696_v29, %v711_v35  ;;  %v715_v39 = vsel %vm709_vm8, %v702_v32, 920167782  ;;  %v719_v40 = vsel %vm709_vm8, %v705_v33, 1326507024  ;;  %v590_v45 = vshll.u32 %v1628_v13, %v584_v12 }
  0xb3   : > { %v716_v42 = vsel %vm708_vm7, %v699_v30, %v715_v39  ;;  %v720_v43 = vsel %vm708_vm7, %v702_v32, %v719_v40  ;;  %v713_v46 = vsel %vm707_vm6, %v710_v34, %v712_v38  ;;  %v591_v49 = vshrl.u32 %v1629_v15, %v585_v31 }
  0xb4   : > { %v717_v47 = vsel %vm707_vm6, %v714_v36, %v716_v42  ;;  %v721_v48 = vsel %vm707_vm6, %v718_v37, %v720_v43  ;;  %v589_v58 = vor.u32 %v588_v44, %v587_v41  ;;  %v593_v60 = vshll.u32 %v1629_v15, %v584_v12 }
  0xb5   : > { %v1814_v53 = vmul.u32.u64.low %v1802_v5, %v721_v48  ;;  %v1815_v54 = vmul.u32.u64.high %v1802_v5, %v721_v48, %v1814_v53  ;;  %v1818_v55 = vmul.u32.u64.low %v1802_v5, %v717_v47  ;;  %v1819_v56 = vmul.u32.u64.high %v1802_v5, %v717_v47, %v1818_v55 }
  0xb6   : > { %v592_v59 = vor.u32 %v591_v49, %v590_v45  ;;  %v594_v61 = vshrl.u32 %v1630_v17, %v585_v31  ;;  %v596_v62 = vshll.u32 %v1630_v17, %v584_v12  ;;  %v597_v63 = vshrl.u32 %v1631_v19, %v585_v31 }
  0xb7   : > { %v600_v0 = vshrl.u32 %v1632_v26, %v585_v31  ;;  %v729_v2 = vmul.u32 %v1802_v5, %v713_v46  ;;  %v586_v3 = vshrl.u32 %v1627_v9, %v585_v31  ;;  %v599_v8 = vshll.u32 %v1631_v19, %v584_v12 }
  0xb8   : > { %v595_v4 = vor.u32 %v594_v61, %v593_v60  ;;  %vm731_vm9 = vc.u32 %v1815_v54, %v1818_v55  ;;  %v732_v10 = vadd.s32 1, %v1819_v56  ;;  %v598_v13 = vor.u32 %v597_v63, %v596_v62 }
  0xb9   : > { %vm602_vm10 = vcmp.lt.s32.totalorder %v1805_v11, 1  ;;  %v601_v14 = vor.u32 %v600_v0, %v599_v8  ;;  %vm604_vm11 = vcmp.lt.s32.totalorder %v1805_v11, 3  ;;  %vm605_vm12 = vcmp.lt.s32.totalorder %v1805_v11, 4 }
  0xba   : > { %v610_v15 = vsel %vm602_vm10, %v589_v58, %v592_v59  ;;  %v733_v7 = vsel %vm731_vm9, %v732_v10, %v1819_v56  ;;  %v607_v16 = vsel %vm605_vm12, %v595_v4, 2102212464  ;;  %v611_v5 = vsel %vm605_vm12, %v598_v13, 920167782 }
  0xbb   : > { %v614_v9 = vsel %vm602_vm10, %v592_v59, %v595_v4  ;;  %v734_v17 = vadd.s32 %v733_v7, %v729_v2  ;;  %vm603_vm13 = vcmp.lt.s32.totalorder %v1805_v11, 2  ;;  %v612_v12 = vsel %vm604_vm11, %v595_v4, %v611_v5 }
  0xbc   : > { %v615_v18 = vsel %vm605_vm12, %v601_v14, 1326507024  ;;  %v606_v19 = vsel %vm602_vm10, %v586_v3, %v589_v58  ;;  %v608_v20 = vsel %vm604_vm11, %v592_v59, %v607_v16  ;;  %v613_v21 = vsel %vm603_vm13, %v610_v15, %v612_v12 }
  0xbd   : > { %v616_v22 = vsel %vm604_vm11, %v598_v13, %v615_v18  ;;  %v735_v23 = vadd.s32 536870912, %v734_v17  ;;  %v1829_v25 = vmul.u32.u64.low %v618_v1, %v613_v21  ;;  %v1830_v26 = vmul.u32.u64.high %v618_v1, %v613_v21, %v1829_v25 }
  0xbe   : > { %v617_v24 = vsel %vm603_vm13, %v614_v9, %v616_v22  ;;  %v609_v30 = vsel %vm603_vm13, %v606_v19, %v608_v20  ;;  %v730_v46 = vadd.s32 %v1818_v55, %v1815_v54  ;;  %vm571_vm5 = vcmp.le.f32.partialorder %v570_v57, 0.7853982 }
  0xbf   : > { %v1832_v27 = vmul.u32.u64.low %v618_v1, %v617_v24  ;;  %v1833_v28 = vmul.u32.u64.high %v618_v1, %v617_v24, %v1832_v27  ;;  %v736_v29 = vshrl.u32 %v735_v23, 30  ;;  %v628_v32 = vadd.s32 1, %v1830_v26 }
  0xc0   : > { %v625_v11 = vmul.u32 %v618_v1, %v609_v30  ;;  %vm766_vm9 = vweird.f32 %v1788_v50 }
  0xc1   : > { %v737_v31 = vshll.u32 %v736_v29, 30  ;;  %vm627_vm14 = vc.u32 %v1833_v28, %v1829_v25  ;;  %v626_v3 = vadd.s32 %v1829_v25, %v1833_v28  ;;  %v760_v55 = vsub.s32 4, %v736_v29 }
  0xc2   : > { %v629_v34 = vsel %vm627_vm14, %v628_v32, %v1830_v26 }
  0xc3   : > { %v738_v33 = vsub.s32 %v734_v17, %v737_v31  ;;  %v630_v35 = vadd.s32 %v629_v34, %v625_v11  ;;  %v761_v9 = vsel %vm676_vm2, %v760_v55, %v736_v29 }
  0xc4   : > { %v763_v20 = vsel %vm675_vm3, 0, %v761_v9  ;;  %v1581_v9 = vld [vmem:[%s1937_s11] sm:$0xff]  }
  0xc5   : > { %v740_v36 = vsub.s32 0, %v738_v33  ;;  %v631_v37 = vadd.s32 536870912, %v630_v35  ;;  %v767_v23 = vadd.s32 3, %v763_v20  ;;  %v985_v11 = vand.u32 3, %v763_v20  ;;  %v1586_v20 = vld [vmem:[%s1937_s11 + $0x28] sm:$0xff]  }
  0xc7   : > { %v1415_v38 = vmin.u32 %v740_v36, %v738_v33  ;;  %v632_v39 = vshrl.u32 %v631_v37, 30  ;;  %v768_v27 = vand.u32 3, %v767_v23  ;;  %vm987_vm10 = vcmp.eq.s32.totalorder %v985_v11, 0  ;;  %v1409_v37 = vld [vmem:[%s1931_s5] ss:$0 sm:$0xff] }
  0xc8   : > { %vm990_vm11 = vcmp.eq.s32.totalorder %v985_v11, 2  ;;  %vm986_vm12 = vcmp.lt.s32.totalorder %v985_v11, 2 }
  0xc9   : > { %v742_v40 = vclz %v1415_v38  ;;  %v633_v41 = vshll.u32 %v632_v39, 30  ;;  %v656_v22 = vsub.s32 4, %v632_v39  ;;  %vm773_vm6 = vcmp.eq.s32.totalorder %v768_v27, 2  ;;  %v1418_v38 = vld [vmem:[%s1932_s6] ss:$0 sm:$0xff] }
  0xca   : > { %vm770_vm7 = vcmp.eq.s32.totalorder %v768_v27, 0  ;;  %vm769_vm8 = vcmp.lt.s32.totalorder %v768_v27, 2 }
  0xcb   : > { %v1416_v42 = vadd.s32 4294967294, %v742_v40  ;;  %v634_v43 = vsub.s32 %v630_v35, %v633_v41  ;;  %v657_v25 = vsel %vm572_vm4, %v656_v22, %v632_v39 }
  0xcc   : > { %v659_v29 = vsel %vm571_vm5, 0, %v657_v25 }
  0xcd   : > { %vm1417_vm15 = vcmp.lt.s32.totalorder %v1416_v42, 0  ;;  %v636_v45 = vsub.s32 0, %v634_v43  ;;  %v882_v36 = vand.u32 3, %v659_v29 }
  0xce   : > { %v745_v44 = vsel %vm1417_vm15, 0, %v1416_v42 }
  0xcf   : > { %v746_v47 = vsub.s32 32, %v745_v44  ;;  %v750_v48 = vsub.s32 4294967266, %v745_v44  ;;  %v1411_v49 = vmin.u32 %v636_v45, %v634_v43  ;;  %v747_v53 = vshll.u32 %v738_v33, %v745_v44 }
  0xd0   : > { %v663_v33 = vadd.s32 3, %v659_v29  ;;  %v568_v45 = vmul.f32 %v1409_v37, %v1788_v50  ;;  %vm883_vm14 = vcmp.lt.s32.totalorder %v882_v36, 2  ;;  %vm887_vm15 = vcmp.eq.s32.totalorder %v882_v36, 2 }
  0xd1   : > { %v748_v56 = vshrl.u32 %v730_v46, %v746_v47  ;;  %v751_v58 = vadd.s32 127, %v750_v48  ;;  %v638_v59 = vclz %v1411_v49 }
  0xd2   : > { %v664_v39 = vand.u32 3, %v663_v33 }
  0xd3   : > { %v749_v60 = vor.u32 %v748_v56, %v747_v53  ;;  %v752_v61 = vshll.u32 %v751_v58, 23  ;;  %v1412_v62 = vadd.s32 4294967294, %v638_v59  ;;  %v1427_v59 = vld [vmem:[%s1933_s7] ss:$0 sm:$0xff] }
  0xd4   : > { %vm669_vm13 = vcmp.eq.s32.totalorder %v664_v39, 2 }
  0xd5   : > { %v753_v63 = vor.u32 4788187, %v752_v61  ;;  %vm1413_vm1 = vcmp.lt.s32.totalorder %v1412_v62, 0  ;;  %v756_v1 = vcvt.s32.f32 %v749_v60 }
  0xd6   : > { %v641_v2 = vsel %vm1413_vm1, 0, %v1412_v62  ;;  %vm666_vm1 = vcmp.eq.s32.totalorder %v664_v39, 0 }
  0xd7   : > { %v754_v0 = vand.u32 2147483647, %v753_v63  ;;  %v642_v4 = vsub.s32 32, %v641_v2  ;;  %v646_v8 = vsub.s32 4294967266, %v641_v2  ;;  %v643_v10 = vshll.u32 %v634_v43, %v641_v2 }
  0xd9   : > { %v757_v54 = vmul.f32 %v756_v1, %v754_v0  ;;  %v644_v13 = vshrl.u32 %v626_v3, %v642_v4  ;;  %v647_v14 = vadd.s32 127, %v646_v8  ;;  %v567_v3 = vmul.f32 %v1409_v37, %v1790_v51 }
  0xdb   : > { %v758_v15 = vxor.u32 2147483648, %v757_v54  ;;  %v645_v7 = vor.u32 %v644_v13, %v643_v10  ;;  %v648_v16 = vshll.u32 %v647_v14, 23  ;;  %v1118_v14 = vld [vmem:[%s1759_s17 + $0x60] sm:$0xff] }
  0xdd   : > { %v759_v5 = vsel %vm676_vm2, %v758_v15, %v757_v54  ;;  %v649_v12 = vor.u32 4788187, %v648_v16  ;;  %v652_v19 = vcvt.s32.f32 %v645_v7  ;;  %vm884_vm2 = vcmp.eq.s32.totalorder %v882_v36, 0  ;;  %v1119_v15 = vld [vmem:[%s1759_s17 + $0x68] sm:$0xff]  ;;  %v1121_v16 = vld [vmem:[%s1759_s17 + $0x78] sm:$0xff] }
  0xde   : > { %v762_v17 = vsel %vm675_vm3, %v1788_v50, %v759_v5  ;;  %vm665_vm3 = vcmp.lt.s32.totalorder %v664_v39, 2  ;;  %v1128_v7 = vpack.c.bf16 %v1119_v15, %v1118_v14 }
  0xdf   : > { %1589 = vcosq.f32 %v762_v17  ;;  %v650_v18 = vand.u32 2147483647, %v649_v12  ;;  %v1583_v12 = vld [vmem:[%s1937_s11 + $0x10] sm:$0xff]  }
  0xe0   : > { %1591 = vsinq.f32 %v762_v17  ;;  %1501 = vmatpush3.bf16.msra.mxu1 %v1128_v7  ;;  %v1582_v17 = vld [vmem:[%s1937_s11 + $0x8] sm:$0xff]  }
  0xe1   : > { %v653_v21 = vmul.f32 %v652_v19, %v650_v18  ;;  %1502 = vmatprep.subr.bf16.mxu1 %v1624_v6  ;;  %v1584_v18 = vld [vmem:[%s1937_s11 + $0x18] sm:$0xff]   ;;  %v1585_v19 = vld [vmem:[%s1937_s11 + $0x20] sm:$0xff]  }
  0xe3   : > { %v654_v24 = vxor.u32 2147483648, %v653_v21 }
  0xe5   : > { %v655_v52 = vsel %vm572_vm4, %v654_v24, %v653_v21  ;;  %vm662_vm4 = vweird.f32 %v1790_v51  ;;  %v1428_v21 = vld [vmem:[%s1935_s9] ss:$0 sm:$0xff] }
  0xe6   : > { %v658_v26 = vsel %vm571_vm5, %v1790_v51, %v655_v52  ;;  %vm1052_vm5 = vcmask 613376   ;;  %v1120_v51 = vld [vmem:[%s1759_s17 + $0x70] sm:$0xff] }
  0xe7   : > { %1593 = vcosq.f32 %v658_v26  ;;  %v1129_v5 = vpack.c.bf16 %v1121_v16, %v1120_v51 }
  0xe8   : > { %1595 = vsinq.f32 %v658_v26 }
  0xe9   : > { %v1590_v28 = vpop.eup %1589  ;;  %1503 = vmatpush3.bf16.msra.mxu1 %v1129_v5 }
  0xea   : > { %v1592_v30 = vpop.eup %1591  ;;  %v774_v31 = vxor.u32 2147483648, %v1590_v28 }
  0xeb   : > { %v771_v32 = vxor.u32 2147483648, %v1592_v30 }
  0xec   : > { %v775_v34 = vsel %vm773_vm6, %v774_v31, %v1592_v30  ;;  %v992_v42 = vsel %vm990_vm11, %v774_v31, %v1592_v30  ;;  %v1587_v30 = vld [vmem:[%s1937_s11 + $0x30] sm:$0xff]   ;;  %v1588_v31 = vld [vmem:[%s1937_s11 + $0x38] sm:$0xff]  }
  0xed   : > { %v772_v35 = vsel %vm770_vm7, %v1590_v28, %v771_v32  ;;  %v989_v41 = vsel %vm987_vm10, %v1590_v28, %v771_v32  ;;  %v1435_v32 = vld [vmem:[%s1936_s10] ss:$0 sm:$0xff] }
  0xee   : > { %v776_v57 = vsel %vm769_vm8, %v772_v35, %v775_v34  ;;  %v993_v48 = vsel %vm986_vm12, %v989_v41, %v992_v42 }
  0xef   : > { %v777_v40 = vsel %vm766_vm9, nan, %v776_v57  ;;  %v994_v61 = vsel %vm766_vm9, nan, %v993_v48 }
  0xf0   : > { %v785_v47 = vmul.f32 %v1418_v38, %v777_v40  ;;  %v1002_v8 = vmul.f32 %v1427_v59, %v994_v61 }
  0xf1   : > { %v1594_v43 = vpop.eup %1593 }
  0xf2   : > { %v1596_v44 = vpop.eup %1595  ;;  %v670_v46 = vxor.u32 2147483648, %v1594_v43  ;;  %v787_v63 = vadd.f32 %v785_v47, %v568_v45 }
  0xf3   : > { %v667_v49 = vxor.u32 2147483648, %v1596_v44 }
  0xf4   : > { %v671_v53 = vsel %vm669_vm13, %v670_v46, %v1596_v44  ;;  %v889_v56 = vsel %vm887_vm15, %v670_v46, %v1596_v44  ;;  %v1004_v10 = vadd.f32 %v1002_v8, %v787_v63 }
  0xf5   : > { %v668_v58 = vsel %vm666_vm1, %v1594_v43, %v667_v49  ;;  %v886_v60 = vsel %vm884_vm2, %v1594_v43, %v667_v49 }
  0xf6   : > { %v672_v62 = vsel %vm665_vm3, %v668_v58, %v671_v53  ;;  %v890_v0 = vsel %vm883_vm14, %v886_v60, %v889_v56 }
  0xf7   : > { %v673_v1 = vsel %vm662_vm4, nan, %v672_v62  ;;  %v891_v2 = vsel %vm662_vm4, nan, %v890_v0 }
  0xf8   : > { %v784_v4 = vmul.f32 %v1418_v38, %v673_v1  ;;  %v1001_v55 = vmul.f32 %v1427_v59, %v891_v2 }
  0xfa   : > { %v786_v54 = vadd.f32 %v784_v4, %v567_v3 }
  0xfc   : > { %v1003_v50 = vadd.f32 %v1001_v55, %v786_v54 }
  0xfe   : > { %v1005_v13 = vpack.c.bf16 %v1004_v10, %v1003_v50 }
 0x100   : > { %1485 = vmatmul.mubr.msk.bf16.vlgmr.msra.gmra.mrb[0].mxu0 %vm1052_vm5, %v1005_v13 }
 0x101   : > { %1524 = vmatprep.mubr.msk.bf16.mxu0 %vm1625_vm0, %v1624_v6  ;;  %1509 = vmatpush3.bf16.msra.mxu0 %v1581_v9 }
 0x102   : > { %1510 = vmatprep.subr.bf16.mxu0 %v1624_v6 }
 0x105   : > { %1511 = vmatpush3.bf16.msra.mxu0 %v1582_v17 }
 0x106   : > { %1512 = vmatprep.subr.bf16.mxu0 %v1624_v6 }
 0x109   : > { %1513 = vmatpush3.bf16.msra.mxu0 %v1583_v12 }
 0x10a   : > { %1514 = vmatprep.subr.bf16.mxu0 %v1624_v6 }
 0x10d   : > { %1515 = vmatpush3.bf16.msra.mxu0 %v1584_v18 }
 0x10e   : > { %1516 = vmatprep.subr.bf16.mxu0 %v1624_v6 }
 0x111   : > { %1517 = vmatpush3.bf16.msra.mxu0 %v1585_v19 }
 0x112   : > { %1518 = vmatprep.subr.bf16.mxu0 %v1624_v6 }
 0x115   : > { %1519 = vmatpush3.bf16.msra.mxu0 %v1586_v20 }
 0x116   : > { %1520 = vmatprep.subr.bf16.mxu0 %v1624_v6 }
 0x119   : > { %1521 = vmatpush3.bf16.msra.mxu0 %v1587_v30 }
 0x11a   : > { %1522 = vmatprep.subr.bf16.mxu0 %v1624_v6  ;;  %v1436_v6 = vld [vmem:[%s1938_s12] ss:$0 sm:$0xff] }
 0x11d   : > { %1523 = vmatpush3.bf16.msra.mxu0 %v1588_v31 }
 0x1d3   : > { %v1097_v22 = vpop.f32.mrb[0].mxu0 }
 0x1d4   : > { %v1098_v23 = vadd.f32 %v1428_v21, %v1097_v22  ;;  %v1486_v24 = vpop.f32.mrb[1].mxu0 }
 0x1d5   : > { %v1100_v52 = vpop.f32.mrb[2].mxu0 }
 0x1d6   : > { %v1101_v25 = vadd.f32 %v1428_v21, %v1100_v52  ;;  %v1487_v26 = vpop.f32.mrb[3].mxu0  ;;  %v1104_v27 = vmax.f32 %v1098_v23, 0.0 }
 0x1d8   : > { %v1105_v28 = vmax.f32 %v1101_v25, 0.0 }
 0x1da   : > { %v1130_v29 = vpack.c.bf16 %v1105_v28, %v1104_v27 }
 0x1dc   : > { %1505 = vmatmul.mubr.bf16.vlgmr.msra.gmra.mrb[0].mxu1 %v1130_v29 }
 0x2af   : > { %v1172_v11 = vpop.f32.mrb[0].mxu1 }
 0x2b0   : > { %v1173_v33 = vadd.f32 %v1435_v32, %v1172_v11  ;;  %v1506_v34 = vpop.f32.mrb[1].mxu1 }
 0x2b1   : > { %v1175_v35 = vpop.f32.mrb[2].mxu1 }
 0x2b2   : > { %v1176_v57 = vadd.f32 %v1435_v32, %v1175_v35  ;;  %v1507_v36 = vpop.f32.mrb[3].mxu1  ;;  %v1179_v37 = vmax.f32 %v1173_v33, 0.0 }
 0x2b4   : > { %v1180_v38 = vmax.f32 %v1176_v57, 0.0 }
 0x2b6   : > { %v1181_v39 = vpack.c.bf16 %v1180_v38, %v1179_v37 }
 0x2b8   : > { %1525 = vmatmul.mubr.bf16.vlgmr.msra.gmra.mrb[4].mxu0 %v1181_v39 }
 0x38b   : > { %v1287_v40 = vpop.f32.mrb[4].mxu0 }
 0x38c   : > { %v1288_v41 = vadd.f32 %v1436_v6, %v1287_v40  ;;  %v1526_v42 = vpop.f32.mrb[5].mxu0 }
 0x38d   : > { %v1290_v43 = vpop.f32.mrb[6].mxu0 }
 0x38e   : > { %1294 = vst [vmem:[%s498_s19] sm:$0xff] %v1288_v41  ;;  %v1291_v44 = vadd.f32 %v1436_v6, %v1290_v43  ;;  %v1527_v45 = vpop.f32.mrb[7].mxu0 }
 0x390   : > { %1295 = vst [vmem:[%s498_s19 + $0x8] sm:$0xff] %v1291_v44 }
 0x391 PF: > { %s23_s27 = sadd.s32 1, %s1619_s27   ;;  %s1940_s25 = smov %s1615_s26 }
 0x392   : > { %p20_p5 = scmp.ge.s32.totalorder %s23_s27, 4   ;;  %s1941_s26 = smov %s1943_s28 }
 0x394   :  { %22 = sbr.rel (!%p20_p5) target bundleno = 2 (0x2), region = 105 }

// kernel: low_rank_modulated_transinr_forward.2
= control target key start
LH: loop header
LB: loop body
LE: loop exit
PB: predicated region body
PF: predicated region fallthrough
CT: control target
= control target key end

     0   :  { %s4935_s27 = smov 0   ;;  %s5761_s0 = inlined_call_operand.vmem [shape: f32[2,16,128], index: 0, kind: input, shape index: {}]   ;;  %s5762_s1 = inlined_call_operand.vmem [shape: f32[2,1,128], index: 1, kind: input, shape index: {}]   ;;  %s5763_s2 = inlined_call_operand.vmem [shape: f32[2,1,128], index: 2, kind: input, shape index: {}]   ;;  %s5764_s3 = inlined_call_operand.vmem [shape: bf16[2,128,384], index: 3, kind: input, shape index: {}]   ;;  %s5765_s4 = inlined_call_operand.vmem [shape: f32[2,1,384], index: 4, kind: input, shape index: {}]   ;;  %s5766_s5 = inlined_call_operand.vmem [shape: bf16[2,128,128], index: 5, kind: input, shape index: {}]   ;;  %s5767_s6 = inlined_call_operand.vmem [shape: f32[2,1,128], index: 6, kind: input, shape index: {}]   ;;  %s5768_s7 = inlined_call_operand.vmem [shape: f32[2,1,128], index: 7, kind: input, shape index: {}]   ;;  %s5769_s8 = inlined_call_operand.vmem [shape: f32[2,1,128], index: 8, kind: input, shape index: {}]   ;;  %s5770_s9 = inlined_call_operand.vmem [shape: bf16[2,128,256], index: 9, kind: input, shape index: {}]   ;;  %s5771_s10 = inlined_call_operand.vmem [shape: f32[2,1,256], index: 10, kind: input, shape index: {}]   ;;  %s5772_s11 = inlined_call_operand.vmem [shape: bf16[2,256,128], index: 11, kind: input, shape index: {}]   ;;  %s5773_s12 = inlined_call_operand.vmem [shape: f32[2,1,128], index: 12, kind: input, shape index: {}]   ;;  %s5774_s13 = inlined_call_operand.vmem [shape: f32[1,128], index: 13, kind: input, shape index: {}]   ;;  %s5775_s14 = inlined_call_operand.vmem [shape: f32[1,128], index: 14, kind: input, shape index: {}]   ;;  %s5776_s15 = inlined_call_operand.vmem [shape: bf16[128,128], index: 15, kind: input, shape index: {}]   ;;  %s5777_s16 = inlined_call_operand.vmem [shape: f32[1,128], index: 16, kind: input, shape index: {}]   ;;  %s5778_s17 = inlined_call_operand.vmem [shape: bf16[8,128], index: 17, kind: input, shape index: {}]   ;;  %s5779_s18 = inlined_call_operand.vmem [shape: f32[2,128,128], index: 18, kind: output, shape index: {}]  }
   0x1   :  { %5786 = sst [smem:[#allocation2_spill]] %s5761_s0 }
   0x2   :  { %5787 = sst [smem:[#allocation3_spill]] %s5762_s1 }
   0x3   :  { %5788 = sst [smem:[#allocation4_spill]] %s5763_s2 }
   0x4 LB: > { %s3869_s28 = sadd.s32 4294967295, %s4832_s27   ;;  %p3873_p0 = scmp.ge.s32.totalorder %s4832_s27, 1  ;;  %s4832_s27 = sphi %s4935_s27, %s28_s27  }
   0x5   : > { %p512_p1 = scmp.lt.s32.totalorder %s4832_s27, 3 }
   0x7   : > { %p513_p2 = pnand %p3873_p0, %p512_p1 }
   0x8   : > { %p566_p3 = scmp.lt.s32.totalorder (!%p513_p2), %s3869_s28, 1  ;;  %s5789_s19 = sld [smem:[#allocation2_spill]] (!%p513_p2)  ;;  %v4558_v2 = vld [vmem:[%s5764_s3 + $0x4] ss:$12 sps:$4 sm:$0xff] (!%p513_p2)   ;;  %v4560_v3 = vld [vmem:[%s5764_s3] ss:$12 sps:$4 sm:$0xff] (!%p513_p2)   ;;  %v655_v53 = vlaneseq (!%p513_p2) }
   0x9   : > { %516 = sbr.rel (%p513_p2) target bundleno = 8314 (0x207a), region = 92  ;;  %v4834_v4 = vmov (!%p513_p2), 0.0   ;;  %v4561_v5 = vld [vmem:[%s5764_s3 + $0x8] ss:$12 sps:$4 sm:$0xff] (!%p513_p2)   ;;  %798 = vmatprep.subr.bf16.mxu0 (!%p513_p2), %v4558_v2  ;;  %v4564_v15 = vld [vmem:[%s5764_s3 + $0x18] ss:$12 sps:$4 sm:$0xff] (!%p513_p2)  }
   0xa   : > { %4305 = vmatprep.subr.bf16.mxu1 (!%p513_p2), %v4834_v4  ;;  %v4562_v6 = vld [vmem:[%s5764_s3 + $0x1c] ss:$12 sps:$4 sm:$0xff] (!%p513_p2)   ;;  %799 = vmatpush1.bf16.msra.mxu0 (!%p513_p2), %v4560_v3  ;;  %v4565_v16 = vld [vmem:[%s5764_s3 + $0x20] ss:$12 sps:$4 sm:$0xff] (!%p513_p2)   ;;  %v4569_v19 = vld [vmem:[%s5764_s3 + $0x38] ss:$12 sps:$4 sm:$0xff] (!%p513_p2)  }
   0xb   : > { %4306 = vmatpush3.bf16.msra.mxu1 (!%p513_p2), %v4561_v5  ;;  %800 = vmatprep.subr.bf16.mxu0 (!%p513_p2), %v4562_v6  ;;  %v4566_v17 = vld [vmem:[%s5764_s3 + $0x34] ss:$12 sps:$4 sm:$0xff] (!%p513_p2)   ;;  %v4568_v18 = vld [vmem:[%s5764_s3 + $0x30] ss:$12 sps:$4 sm:$0xff] (!%p513_p2)   ;;  %v4570_v20 = vld [vmem:[%s5764_s3 + $0x4c] ss:$12 sps:$4 sm:$0xff] (!%p513_p2)  }
   0xc   : > { %4307 = vmatprep.subr.bf16.mxu1 (!%p513_p2), %v4834_v4  ;;  %v4572_v21 = vld [vmem:[%s5764_s3 + $0x48] ss:$12 sps:$4 sm:$0xff] (!%p513_p2)   ;;  %v4573_v22 = vld [vmem:[%s5764_s3 + $0x50] ss:$12 sps:$4 sm:$0xff] (!%p513_p2)   ;;  %v4576_v24 = vld [vmem:[%s5764_s3 + $0x60] ss:$12 sps:$4 sm:$0xff] (!%p513_p2)  }
   0xd   : > { %v4574_v23 = vld [vmem:[%s5764_s3 + $0x64] ss:$12 sps:$4 sm:$0xff] (!%p513_p2)   ;;  %v4577_v25 = vld [vmem:[%s5764_s3 + $0x68] ss:$12 sps:$4 sm:$0xff] (!%p513_p2)   ;;  %v4581_v28 = vld [vmem:[%s5764_s3 + $0x80] ss:$12 sps:$4 sm:$0xff] (!%p513_p2)  }
   0xe   : > { %801 = vmatpush1.bf16.msra.mxu0 (!%p513_p2), %v4564_v15  ;;  %v4578_v26 = vld [vmem:[%s5764_s3 + $0x7c] ss:$12 sps:$4 sm:$0xff] (!%p513_p2)   ;;  %v4580_v27 = vld [vmem:[%s5764_s3 + $0x78] ss:$12 sps:$4 sm:$0xff] (!%p513_p2)   ;;  %v4582_v29 = vld [vmem:[%s5764_s3 + $0x94] ss:$12 sps:$4 sm:$0xff] (!%p513_p2)  }
   0xf   : > { %4308 = vmatpush3.bf16.msra.mxu1 (!%p513_p2), %v4565_v16  ;;  %802 = vmatprep.subr.bf16.mxu0 (!%p513_p2), %v4566_v17  ;;  %v4835_v30 = vmov (!%p513_p2), 0   ;;  %vm4836_vm0 = vmmov (!%p513_p2), 0   ;;  %v4584_v31 = vld [vmem:[%s5764_s3 + $0x90] ss:$12 sps:$4 sm:$0xff] (!%p513_p2)   ;;  %v4585_v32 = vld [vmem:[%s5764_s3 + $0x98] ss:$12 sps:$4 sm:$0xff] (!%p513_p2)  }
  0x10   : > { %s5795_s28 = smov (!%p566_p3, %s3869_s28), 1  ;;  %4309 = vmatprep.subr.bf16.mxu1 %v4834_v4  ;;  %830 = vmatprep.mubr.bf16.mxu0 %v4835_v30  ;;  %v4586_v33 = vld [vmem:[%s5764_s3 + $0xac] ss:$12 sps:$4 sm:$0xff]   ;;  %v4588_v34 = vld [vmem:[%s5764_s3 + $0xa8] ss:$12 sps:$4 sm:$0xff]   ;;  %s5790_s22 = sld [smem:[#allocation3_spill]] }
  0x11   : > { %s4167_s29 = sshll.u32 %s5795_s28, 4  ;;  %4321 = vmatprep.mubr.msk.bf16.mxu1 %vm4836_vm0, %v4834_v4  ;;  %v4589_v35 = vld [vmem:[%s5764_s3 + $0xb0] ss:$12 sps:$4 sm:$0xff]   ;;  %s5791_s24 = sld [smem:[#allocation4_spill]]  ;;  %v5058_v54 = vshrl.u32 %v655_v53, 7  ;;  %vm901_vm1 = vcmask 261120  }
  0x12   : > { %s4949_s1 = scalar_lea.vmem %s5789_s19, %s4167_s29  ;;  %803 = vmatpush1.bf16.msra.mxu0 %v4568_v18  ;;  %v653_v57 = vld [vmem:[%s5765_s4] sm:$0x7]  ;;  %s4837_s29 = smov 96   ;;  %vm951_vm2 = vcmask 130048   ;;  %vm3697_vm3 = vcmask 1043456   ;;  %vm3672_vm4 = vcmask 64512  }
  0x13   : > { %v577_v0 = vld [vmem:[%s4949_s1] sm:$0xff]  ;;  %v578_v1 = vld [vmem:[%s4949_s1 + $0x8] sm:$0xff]  ;;  %4310 = vmatpush3.bf16.msra.mxu1 %v4569_v19  ;;  %804 = vmatprep.subr.bf16.mxu0 %v4570_v20  ;;  %v5061_v55 = vsub.s32 0, %v5058_v54  ;;  %v665_v56 = vsub.s32 2, %v5058_v54  ;;  %v5068_v58 = vsub.s32 1, %v5058_v54  ;;  %s5784_s30 = smov 64  }
  0x14   : > { %581 = vadd.xlane.f32.xlu0 %v577_v0  ;;  %4311 = vmatprep.subr.bf16.mxu1 %v4834_v4  ;;  %s5782_s0 = smov 32   ;;  %s4168_s26 = sshll.u32 %s5795_s28, 7 }
  0x15   : > { %v658_v59 = vrot.slane %v653_v57, %v5061_v55  ;;  %v666_v60 = vrot.slane %v653_v57, %v665_v56  ;;  %v662_v63 = vrot.slane %v653_v57, %v5068_v58 }
  0x16   : > { %805 = vmatpush1.bf16.msra.mxu0 %v4572_v21  ;;  %v3878_v44 = vld [vmem:[%s5790_s22] ss:$0 sm:$0xff] }
  0x17   : > { %4312 = vmatpush3.bf16.msra.mxu1 %v4573_v22  ;;  %806 = vmatprep.subr.bf16.mxu0 %v4574_v23  ;;  %v3879_v48 = vld [vmem:[%s5791_s24] ss:$0 sm:$0xff] }
  0x18   : > { %583 = vadd.xlane.f32.xlu0 %v578_v1  ;;  %4313 = vmatprep.subr.bf16.mxu1 %v4834_v4 }
  0x1a   : > { %807 = vmatpush1.bf16.msra.mxu0 %v4576_v24 }
  0x1b   : > { %4314 = vmatpush3.bf16.msra.mxu1 %v4577_v25  ;;  %808 = vmatprep.subr.bf16.mxu0 %v4578_v26 }
  0x1c   : > { %4315 = vmatprep.subr.bf16.mxu1 %v4834_v4 }
  0x1e   : > { %809 = vmatpush1.bf16.msra.mxu0 %v4580_v27 }
  0x1f   : > { %4316 = vmatpush3.bf16.msra.mxu1 %v4581_v28  ;;  %810 = vmatprep.subr.bf16.mxu0 %v4582_v29 }
  0x20   : > { %4317 = vmatprep.subr.bf16.mxu1 %v4834_v4 }
  0x22   : > { %811 = vmatpush1.bf16.msra.mxu0 %v4584_v31 }
  0x23   : > { %4318 = vmatpush3.bf16.msra.mxu1 %v4585_v32  ;;  %812 = vmatprep.subr.bf16.mxu0 %v4586_v33 }
  0x24   : > { %4319 = vmatprep.subr.bf16.mxu1 %v4834_v4 }
  0x26   : > { %813 = vmatpush1.bf16.msra.mxu0 %v4588_v34 }
  0x27   : > { %4320 = vmatpush3.bf16.msra.mxu1 %v4589_v35  ;;  %4325 = vmatprep.subr.bf16.mxu0 %v4834_v4 }
  0x28   : > { %4331 = vmatprep.subr.bf16.mxu1 %v4834_v4 }
  0xa1   : > { %v582_v7 = vpop.xlane.xlu0 %581 }
  0xa2   : > { %v586_v8 = vmul.f32 0.0078125, %v582_v7 }
  0xa4   : > { %v4967_v9 = vsub.f32 %v577_v0, %v586_v8 }
  0xa5   : > { %v584_v10 = vpop.xlane.xlu0 %583 }
  0xa6   : > { %v587_v11 = vmul.f32 0.0078125, %v584_v10  ;;  %v590_v12 = vmul.f32 %v4967_v9, %v4967_v9 }
  0xa8   : > { %v4971_v13 = vsub.f32 %v578_v1, %v587_v11  ;;  %592 = vadd.xlane.f32.xlu1 %v590_v12 }
  0xaa   : > { %v591_v14 = vmul.f32 %v4971_v13, %v4971_v13 }
  0xac   : > { %594 = vadd.xlane.f32.xlu1 %v591_v14 }
 0x135   : > { %v593_v36 = vpop.xlane.xlu1 %592 }
 0x136   : > { %v596_v37 = vmul.f32 0.0078125, %v593_v36 }
 0x138   : > { %v598_v38 = vadd.f32 1e-05, %v596_v37 }
 0x139   : > { %v595_v39 = vpop.xlane.xlu1 %594 }
 0x13a   : > { %4726 = vrsqrt.f32 %v598_v38  ;;  %v597_v40 = vmul.f32 0.0078125, %v595_v39 }
 0x13c   : > { %v599_v41 = vadd.f32 1e-05, %v597_v40 }
 0x13e   : > { %4728 = vrsqrt.f32 %v599_v41 }
 0x144   : > { %v4727_v42 = vpop.eup %4726 }
 0x145   : > { %v602_v43 = vmul.f32 %v4727_v42, %v4967_v9 }
 0x147   : > { %v610_v47 = vmul.f32 %v3878_v44, %v602_v43 }
 0x148   : > { %v4729_v45 = vpop.eup %4728 }
 0x149   : > { %v603_v46 = vmul.f32 %v4729_v45, %v4971_v13  ;;  %v618_v50 = vadd.f32 %v3879_v48, %v610_v47 }
 0x14b   : > { %v611_v49 = vmul.f32 %v3878_v44, %v603_v46 }
 0x14d   : > { %v619_v51 = vadd.f32 %v3879_v48, %v611_v49 }
 0x14f   : > { %v620_v52 = vpack.c.bf16 %v619_v51, %v618_v50 }
 0x151   : > { %831 = vmatmul.mubr.bf16.vlgmr.msra.gmra.mrb[0].mxu0 %v620_v52  ;;  %4322 = vmatmul.mubr.bf16.vlgmr.msra.gmra.mrb[0].mxu1 %v620_v52 }
 0x152   : > { %4327 = vmatprep.mubr.msk.bf16.mxu0 %vm4836_vm0, %v4834_v4  ;;  %4333 = vmatprep.mubr.msk.bf16.mxu1 %vm4836_vm0, %v4834_v4 }
 0x224   : > { %v832_v61 = vpop.f32.mrb[0].mxu0  ;;  %v875_v62 = vpop.f32.mrb[0].mxu1 }
 0x225   : > { %v834_v0 = vpop.f32.mrb[1].mxu0  ;;  %v4323_v1 = vpop.f32.mrb[1].mxu1  ;;  %v833_v5 = vadd.f32 %v832_v61, %v658_v59  ;;  %v876_v6 = vadd.f32 %v875_v62, %v666_v60 }
 0x226   : > { %v836_v2 = vpop.f32.mrb[2].mxu0  ;;  %v878_v3 = vpop.f32.mrb[2].mxu1  ;;  %v835_v11 = vadd.f32 %v834_v0, %v662_v63 }
 0x227   : > { %v837_v7 = vadd.f32 %v836_v2, %v658_v59  ;;  %v879_v8 = vadd.f32 %v878_v3, %v666_v60  ;;  %v838_v9 = vpop.f32.mrb[3].mxu0  ;;  %v4324_v10 = vpop.f32.mrb[3].mxu1 }
 0x228   : > { %v839_v12 = vadd.f32 %v838_v9, %v662_v63 }
 0x229   : > { %v5074_v13 = vpack.c.bf16 %v837_v7, %v833_v5  ;;  %v5076_v14 = vpack.c.bf16 %v879_v8, %v876_v6  ;;  %v4592_v5 = vld [vmem:[%s5766_s5 + $0x10] sm:$0xff]   ;;  %v4593_v6 = vld [vmem:[%s5766_s5 + $0x18] sm:$0xff]  }
 0x22a   : > { %v5078_v15 = vpack.c.bf16 %v839_v12, %v835_v11 }
 0x22b   : > { %4332 = vmatpush3.bf16.msra.mxu1 %v5076_v14  ;;  %1021 = vrot.lane.b32.xlu1 %v5074_v13, %s4837_s29 }
 0x22c   : > { %1024 = vrot.lane.b32.xlu0 %v5078_v15, %s4837_s29  ;;  %v906_v16 = vsel %vm901_vm1, %v5078_v15, 0  ;;  %4343 = vmatprep.subr.bf16.mxu1 %v4834_v4 }
 0x22d   : > { %4326 = vmatpush3.bf16.xpose.msra.mxu0 %v906_v16 }
 0x22e   : > { %4337 = vmatprep.subr.bf16.mxu0 %v4834_v4 }
 0x234   : > { %4328 = vmatmul.mubr.msk.bf16.vlgmr.msra.gmra.mrb[4].mxu0 %vm901_vm1, %v5074_v13 }
 0x235   : > { %4339 = vmatprep.mubr.msk.bf16.mxu0 %vm4836_vm0, %v4834_v4 }
 0x29d   : > { %v1022_v19 = vpop.permute.xlu1 %1021 }
 0x29e   : > { %v1025_v17 = vpop.permute.xlu0 %1024 }
 0x29f   : > { %v1030_v18 = vsel %vm901_vm1, %v1025_v17, 0  ;;  %v4590_v17 = vld [vmem:[%s5766_s5] sm:$0xff]  }
 0x2a0   : > { %4338 = vmatpush3.bf16.xpose.msra.mxu0 %v1030_v18 }
 0x2a1   : > { %4349 = vmatprep.subr.bf16.mxu0 %v4834_v4 }
 0x2a7   : > { %4340 = vmatmul.mubr.msk.bf16.vlgmr.msra.gmra.mrb[8].mxu0 %vm901_vm1, %v1022_v19  ;;  %v4591_v19 = vld [vmem:[%s5766_s5 + $0x8] sm:$0xff]  }
 0x2a8   : > { %4353 = vmatprep.mubr.msk.bf16.mxu0 %vm4836_vm0, %v4834_v4  ;;  %4350 = vmatpush3.bf16.msra.mxu0 %v4592_v5 }
 0x2a9   : > { %4351 = vmatprep.subr.bf16.mxu0 %v4834_v4 }
 0x2ac   : > { %4352 = vmatpush3.bf16.msra.mxu0 %v4593_v6 }
 0x2ad   : > { %4365 = vmatprep.subr.bf16.mxu0 %v4834_v4 }
 0x307   : > { %v942_v20 = vpop.f32.mrb[4].mxu0 }
 0x308   : > { %v949_v21 = vmul.f32 0.17677669, %v942_v20  ;;  %v4329_v22 = vpop.f32.mrb[5].mxu0 }
 0x309   : > { %v945_v23 = vpop.f32.mrb[6].mxu0 }
 0x30a   : > { %v950_v24 = vmul.f32 0.17677669, %v945_v23  ;;  %v4330_v25 = vpop.f32.mrb[7].mxu0  ;;  %v952_v26 = vsel %vm951_vm2, %v949_v21, -inf }
 0x30b   : > { %953 = vmax.xlane.f32.xlu1 %v952_v26 }
 0x30c   : > { %v955_v27 = vsel %vm951_vm2, %v950_v24, -inf }
 0x30d   : > { %956 = vmax.xlane.f32.xlu0 %v955_v27 }
 0x37a   : > { %v1066_v28 = vpop.f32.mrb[8].mxu0 }
 0x37b   : > { %v1073_v29 = vmul.f32 0.17677669, %v1066_v28  ;;  %v4341_v31 = vpop.f32.mrb[9].mxu0 }
 0x37c   : > { %v1069_v32 = vpop.f32.mrb[10].mxu0 }
 0x37d   : > { %v1074_v33 = vmul.f32 0.17677669, %v1069_v32  ;;  %v4342_v34 = vpop.f32.mrb[11].mxu0  ;;  %v1075_v35 = vsel %vm951_vm2, %v1073_v29, -inf }
 0x37e   : > { %1076 = vmax.xlane.f32.xlu0 %v1075_v35 }
 0x37f   : > { %v1078_v36 = vsel %vm951_vm2, %v1074_v33, -inf }
 0x380   : > { %1079 = vmax.xlane.f32.xlu1 %v1078_v36 }
 0x398   : > { %v954_v37 = vpop.xlane.xlu1 %953 }
 0x399   : > { %v958_v38 = vsub.f32 %v949_v21, %v954_v37 }
 0x39a   : > { %v957_v39 = vpop.xlane.xlu0 %956 }
 0x39b   : > { %v960_v40 = vmul.f32 1.442695, %v958_v38  ;;  %v959_v41 = vsub.f32 %v950_v24, %v957_v39 }
 0x39d   : > { %4730 = vpow2.f32 %v960_v40  ;;  %v962_v42 = vmul.f32 1.442695, %v959_v41 }
 0x39f   : > { %4732 = vpow2.f32 %v962_v42 }
 0x3a7   : > { %v4731_v43 = vpop.eup %4730 }
 0x3a8   : > { %v964_v44 = vsel %vm951_vm2, %v4731_v43, 0.0 }
 0x3a9   : > { %v4733_v45 = vpop.eup %4732  ;;  %965 = vadd.xlane.f32.xlu0 %v964_v44 }
 0x3aa   : > { %v967_v46 = vsel %vm951_vm2, %v4733_v45, 0.0 }
 0x3ab   : > { %968 = vadd.xlane.f32.xlu1 %v967_v46 }
 0x40b   : > { %v1077_v47 = vpop.xlane.xlu0 %1076 }
 0x40c   : > { %v1081_v48 = vsub.f32 %v1073_v29, %v1077_v47 }
 0x40d   : > { %v1080_v49 = vpop.xlane.xlu1 %1079 }
 0x40e   : > { %v1083_v50 = vmul.f32 1.442695, %v1081_v48  ;;  %v1082_v51 = vsub.f32 %v1074_v33, %v1080_v49 }
 0x410   : > { %4734 = vpow2.f32 %v1083_v50  ;;  %v1085_v52 = vmul.f32 1.442695, %v1082_v51 }
 0x412   : > { %4736 = vpow2.f32 %v1085_v52 }
 0x41a   : > { %v4735_v53 = vpop.eup %4734 }
 0x41b   : > { %v1087_v57 = vsel %vm951_vm2, %v4735_v53, 0.0 }
 0x41c   : > { %v4737_v59 = vpop.eup %4736  ;;  %1088 = vadd.xlane.f32.xlu0 %v1087_v57 }
 0x41d   : > { %v1090_v60 = vsel %vm951_vm2, %v4737_v59, 0.0 }
 0x41e   : > { %1091 = vadd.xlane.f32.xlu1 %v1090_v60 }
 0x42f   : > { %1261 = vrot.lane.b32.xlu1 %v5078_v15, %s5784_s30 }
 0x432   : > { %1099 = vrot.lane.b32.xlu0 %v5076_v14, %s4837_s29 }
 0x433   : > { %1259 = vrot.lane.b32.xlu1 %v5074_v13, %s5784_s30 }
 0x436   : > { %v966_v61 = vpop.xlane.xlu0 %965 }
 0x437   : > { %4738 = vrcp.f32 %v966_v61 }
 0x438   : > { %v969_v62 = vpop.xlane.xlu1 %968 }
 0x439   : > { %4740 = vrcp.f32 %v969_v62 }
 0x441   : > { %v4739_v63 = vpop.eup %4738 }
 0x442   : > { %v972_v1 = vmul.f32 %v4739_v63, %v4731_v43 }
 0x443   : > { %v4741_v0 = vpop.eup %4740 }
 0x444   : > { %v973_v2 = vmul.f32 %v4741_v0, %v4733_v45 }
 0x446   : > { %v974_v3 = vpack.c.bf16 %v973_v2, %v972_v1 }
 0x448   : > { %4334 = vmatmul.mubr.msk.bf16.vlgmr.msra.gmra.mrb[4].mxu1 %vm951_vm2, %v974_v3 }
 0x449   : > { %4345 = vmatprep.mubr.msk.bf16.mxu1 %vm4836_vm0, %v4834_v4 }
 0x4a9   : > { %v1089_v7 = vpop.xlane.xlu0 %1088 }
 0x4aa   : > { %4742 = vrcp.f32 %v1089_v7 }
 0x4ab   : > { %v1092_v8 = vpop.xlane.xlu1 %1091 }
 0x4ac   : > { %4744 = vrcp.f32 %v1092_v8 }
 0x4ad   : > { %v1100_v9 = vpop.permute.xlu0 %1099 }
 0x4ae   : > { %4344 = vmatpush3.bf16.msra.mxu1 %v1100_v9 }
 0x4af   : > { %4357 = vmatprep.subr.bf16.mxu1 %v4834_v4  ;;  %v1262_v27 = vpop.permute.xlu1 %1261 }
 0x4b0   : > { %v1267_v32 = vsel %vm901_vm1, %v1262_v27, 0 }
 0x4b3   : > { %v1260_v33 = vpop.permute.xlu1 %1259 }
 0x4b4   : > { %v4743_v10 = vpop.eup %4742 }
 0x4b5   : > { %v1095_v12 = vmul.f32 %v4743_v10, %v4735_v53 }
 0x4b6   : > { %v4745_v11 = vpop.eup %4744 }
 0x4b7   : > { %v1096_v16 = vmul.f32 %v4745_v11, %v4737_v59 }
 0x4b9   : > { %v1097_v18 = vpack.c.bf16 %v1096_v16, %v1095_v12  ;;  %v4595_v16 = vld [vmem:[%s5766_s5 + $0x28] sm:$0xff]  }
 0x4bb   : > { %4346 = vmatmul.mubr.msk.bf16.vlgmr.msra.gmra.mrb[8].mxu1 %vm951_vm2, %v1097_v18 }
 0x4bc   : > { %4358 = vmatpush3.bf16.msra.mxu1 %v4590_v17  ;;  %4361 = vmatprep.mubr.msk.bf16.mxu1 %vm4836_vm0, %v4834_v4 }
 0x4bd   : > { %4359 = vmatprep.subr.bf16.mxu1 %v4834_v4 }
 0x4c0   : > { %4360 = vmatpush3.bf16.msra.mxu1 %v4591_v19 }
 0x4c1   : > { %4371 = vmatprep.subr.bf16.mxu1 %v4834_v4 }
 0x51b   : > { %v1012_v20 = vpop.f32.mrb[4].mxu1 }
 0x51c   : > { %v4335_v21 = vpop.f32.mrb[5].mxu1 }
 0x51d   : > { %v1015_v22 = vpop.f32.mrb[6].mxu1 }
 0x51e   : > { %v1019_v23 = vpack.c.bf16 %v1015_v22, %v1012_v20  ;;  %v4336_v24 = vpop.f32.mrb[7].mxu1 }
 0x520   : > { %4362 = vmatmul.mubr.msk.bf16.vlgmr.msra.gmra.mrb[12].mxu1 %vm901_vm1, %v1019_v23 }
 0x521   : > { %4373 = vmatprep.mubr.msk.bf16.mxu1 %vm4836_vm0, %v4834_v4 }
 0x58e   : > { %v1139_v25 = vpop.f32.mrb[8].mxu1 }
 0x58f   : > { %v4347_v26 = vpop.f32.mrb[9].mxu1 }
 0x590   : > { %v1142_v28 = vpop.f32.mrb[10].mxu1 }
 0x591   : > { %v1146_v29 = vpack.c.bf16 %v1142_v28, %v1139_v25  ;;  %v4348_v31 = vpop.f32.mrb[11].mxu1 }
 0x593   : > { %4354 = vmatmul.mubr.msk.bf16.vlgmr.msra.gmra.mrb[12].mxu0 %vm901_vm1, %v1146_v29 }
 0x594   : > { %4366 = vmatpush3.bf16.xpose.msra.mxu0 %v1267_v32  ;;  %4367 = vmatprep.mubr.msk.bf16.mxu0 %vm4836_vm0, %v4834_v4 }
 0x595   : > { %4377 = vmatprep.subr.bf16.mxu0 %v4834_v4 }
 0x59b   : > { %4368 = vmatmul.mubr.msk.bf16.vlgmr.msra.gmra.mrb[16].mxu0 %vm901_vm1, %v1260_v33 }
 0x59c   : > { %4381 = vmatprep.mubr.msk.bf16.mxu0 %vm4836_vm0, %v4834_v4 }
 0x5f3   : > { %v1252_v34 = vpop.f32.mrb[12].mxu1 }
 0x5f4   : > { %v4363_v35 = vpop.f32.mrb[13].mxu1 }
 0x5f5   : > { %v1255_v36 = vpop.f32.mrb[14].mxu1 }
 0x5f6   : > { %v4364_v37 = vpop.f32.mrb[15].mxu1 }
 0x666   : > { %v1196_v38 = vpop.f32.mrb[12].mxu0 }
 0x667   : > { %v5146_v39 = vadd.f32 %v1252_v34, %v1196_v38  ;;  %v4355_v40 = vpop.f32.mrb[13].mxu0 }
 0x668   : > { %v1199_v41 = vpop.f32.mrb[14].mxu0 }
 0x669   : > { %v5148_v42 = vadd.f32 %v1255_v36, %v1199_v41  ;;  %v4356_v43 = vpop.f32.mrb[15].mxu0 }
 0x66a   : > { %v4596_v43 = vld [vmem:[%s5766_s5 + $0x30] sm:$0xff]  }
 0x66e   : > { %v1303_v44 = vpop.f32.mrb[16].mxu0 }
 0x66f   : > { %v1310_v45 = vmul.f32 0.17677669, %v1303_v44  ;;  %v4369_v46 = vpop.f32.mrb[17].mxu0 }
 0x670   : > { %v1306_v47 = vpop.f32.mrb[18].mxu0 }
 0x671   : > { %v1311_v48 = vmul.f32 0.17677669, %v1306_v47  ;;  %v4370_v49 = vpop.f32.mrb[19].mxu0  ;;  %v1312_v50 = vsel %vm951_vm2, %v1310_v45, -inf }
 0x672   : > { %1313 = vmax.xlane.f32.xlu1 %v1312_v50 }
 0x673   : > { %v1315_v51 = vsel %vm951_vm2, %v1311_v48, -inf }
 0x674   : > { %1316 = vmax.xlane.f32.xlu0 %v1315_v51 }
 0x683   : > { %1335 = vrot.lane.b32.xlu1 %v5076_v14, %s5784_s30  ;;  %s5792_s30 = smov 64  }
 0x687   : > { %1441 = vrot.lane.b32.xlu1 %v5074_v13, %s5782_s0  ;;  %v4594_v13 = vld [vmem:[%s5766_s5 + $0x20] sm:$0xff]  }
 0x688   : > { %4378 = vmatpush3.bf16.msra.mxu0 %v4594_v13 }
 0x689   : > { %4379 = vmatprep.subr.bf16.mxu0 %v4834_v4 }
 0x68c   : > { %4380 = vmatpush3.bf16.msra.mxu0 %v4595_v16  ;;  %v4598_v16 = vld [vmem:[%s5770_s9] ss:$8 sps:$4 sm:$0xff]  }
 0x68d   : > { %4391 = vmatprep.subr.bf16.mxu0 %v4834_v4 }
 0x6ff   : > { %v1314_v52 = vpop.xlane.xlu1 %1313 }
 0x700   : > { %v1318_v53 = vsub.f32 %v1310_v45, %v1314_v52 }
 0x701   : > { %v1317_v57 = vpop.xlane.xlu0 %1316 }
 0x702   : > { %v1320_v59 = vmul.f32 1.442695, %v1318_v53  ;;  %v1319_v60 = vsub.f32 %v1311_v48, %v1317_v57 }
 0x703   : > { %v1336_v61 = vpop.permute.xlu1 %1335 }
 0x704   : > { %4746 = vpow2.f32 %v1320_v59  ;;  %v1322_v62 = vmul.f32 1.442695, %v1319_v60  ;;  %4372 = vmatpush3.bf16.msra.mxu1 %v1336_v61 }
 0x705   : > { %4385 = vmatprep.subr.bf16.mxu1 %v4834_v4 }
 0x706   : > { %4748 = vpow2.f32 %v1322_v62 }
 0x70e   : > { %v4747_v63 = vpop.eup %4746 }
 0x70f   : > { %v1324_v0 = vsel %vm951_vm2, %v4747_v63, 0.0 }
 0x710   : > { %v4749_v1 = vpop.eup %4748  ;;  %1325 = vadd.xlane.f32.xlu0 %v1324_v0 }
 0x711   : > { %v1327_v2 = vsel %vm951_vm2, %v4749_v1, 0.0 }
 0x714   : > { %1328 = vadd.xlane.f32.xlu0 %v1327_v2 }
 0x72a   : > { %1443 = vrot.lane.b32.xlu0 %v5078_v15, %s5782_s0  ;;  %v1442_v15 = vpop.permute.xlu1 %1441 }
 0x79d   : > { %v1326_v3 = vpop.xlane.xlu0 %1325 }
 0x79e   : > { %4750 = vrcp.f32 %v1326_v3 }
 0x7a1   : > { %v1329_v5 = vpop.xlane.xlu0 %1328 }
 0x7a2   : > { %4752 = vrcp.f32 %v1329_v5  ;;  %v3924_v5 = vld [vmem:[%s5767_s6] ss:$0 sm:$0xff] }
 0x7a5   : > { %v1444_v10 = vpop.permute.xlu0 %1443 }
 0x7a6   : > { %v1449_v12 = vsel %vm901_vm1, %v1444_v10, 0  ;;  %v4825_v10 = vld [vmem:[%s4949_s1 + $0x8] sm:$0xff] }
 0x7a8   : > { %v4751_v6 = vpop.eup %4750 }
 0x7a9   : > { %v1332_v8 = vmul.f32 %v4751_v6, %v4747_v63  ;;  %v4824_v6 = vld [vmem:[%s4949_s1] sm:$0xff]  ;;  %s5793_s1 = smov 32  }
 0x7ac   : > { %v4753_v7 = vpop.eup %4752 }
 0x7ad   : > { %v1333_v9 = vmul.f32 %v4753_v7, %v4749_v1 }
 0x7af   : > { %v1334_v11 = vpack.c.bf16 %v1333_v9, %v1332_v8 }
 0x7b1   : > { %4374 = vmatmul.mubr.msk.bf16.vlgmr.msra.gmra.mrb[16].mxu1 %vm951_vm2, %v1334_v11 }
 0x7b2   : > { %4386 = vmatpush3.bf16.xpose.msra.mxu1 %v1449_v12  ;;  %4387 = vmatprep.mubr.msk.bf16.mxu1 %vm4836_vm0, %v4834_v4 }
 0x7b3   : > { %4397 = vmatprep.subr.bf16.mxu1 %v4834_v4 }
 0x7b9   : > { %4388 = vmatmul.mubr.msk.bf16.vlgmr.msra.gmra.mrb[20].mxu1 %vm901_vm1, %v1442_v15 }
 0x7ba   : > { %4401 = vmatprep.mubr.msk.bf16.mxu1 %vm4836_vm0, %v4834_v4  ;;  %4398 = vmatpush3.bf16.msra.mxu1 %v4596_v43 }
 0x7bb   : > { %4399 = vmatprep.subr.bf16.mxu1 %v4834_v4 }
 0x884   : > { %v1375_v17 = vpop.f32.mrb[16].mxu1 }
 0x885   : > { %v4375_v18 = vpop.f32.mrb[17].mxu1 }
 0x886   : > { %v1378_v19 = vpop.f32.mrb[18].mxu1  ;;  %v4603_v18 = vld [vmem:[%s5770_s9 + $0x14] ss:$8 sps:$4 sm:$0xff]  }
 0x887   : > { %v1382_v20 = vpack.c.bf16 %v1378_v19, %v1375_v17  ;;  %v4376_v21 = vpop.f32.mrb[19].mxu1  ;;  %v4600_v17 = vld [vmem:[%s5770_s9 + $0x4] ss:$8 sps:$4 sm:$0xff]   ;;  %v4601_v19 = vld [vmem:[%s5770_s9 + $0x10] ss:$8 sps:$4 sm:$0xff]  }
 0x889   : > { %4382 = vmatmul.mubr.msk.bf16.vlgmr.msra.gmra.mrb[20].mxu0 %vm901_vm1, %v1382_v20 }
 0x88a   : > { %4393 = vmatprep.mubr.msk.bf16.mxu0 %vm4836_vm0, %v4834_v4 }
 0x88c   : > { %v1485_v22 = vpop.f32.mrb[20].mxu1 }
 0x88d   : > { %v1492_v23 = vmul.f32 0.17677669, %v1485_v22  ;;  %v4389_v24 = vpop.f32.mrb[21].mxu1 }
 0x88e   : > { %v1488_v25 = vpop.f32.mrb[22].mxu1 }
 0x88f   : > { %v1493_v26 = vmul.f32 0.17677669, %v1488_v25  ;;  %v4390_v27 = vpop.f32.mrb[23].mxu1  ;;  %v1494_v28 = vsel %vm951_vm2, %v1492_v23, -inf }
 0x890   : > { %1495 = vmax.xlane.f32.xlu1 %v1494_v28  ;;  %v4606_v28 = vld [vmem:[%s5770_s9 + $0x24] ss:$8 sps:$4 sm:$0xff]  }
 0x891   : > { %v1497_v29 = vsel %vm951_vm2, %v1493_v26, -inf }
 0x892   : > { %1498 = vmax.xlane.f32.xlu0 %v1497_v29  ;;  %v4604_v29 = vld [vmem:[%s5770_s9 + $0x20] ss:$8 sps:$4 sm:$0xff]  }
 0x91d   : > { %v1496_v31 = vpop.xlane.xlu1 %1495 }
 0x91e   : > { %v1500_v32 = vsub.f32 %v1492_v23, %v1496_v31  ;;  %v4609_v31 = vld [vmem:[%s5770_s9 + $0x34] ss:$8 sps:$4 sm:$0xff]  }
 0x91f   : > { %v1499_v33 = vpop.xlane.xlu0 %1498 }
 0x920   : > { %v1502_v34 = vmul.f32 1.442695, %v1500_v32  ;;  %v1501_v35 = vsub.f32 %v1493_v26, %v1499_v33  ;;  %v4607_v32 = vld [vmem:[%s5770_s9 + $0x30] ss:$8 sps:$4 sm:$0xff]   ;;  %v4612_v33 = vld [vmem:[%s5770_s9 + $0x44] ss:$8 sps:$4 sm:$0xff]  }
 0x922   : > { %4754 = vpow2.f32 %v1502_v34  ;;  %v1504_v36 = vmul.f32 1.442695, %v1501_v35  ;;  %v4610_v34 = vld [vmem:[%s5770_s9 + $0x40] ss:$8 sps:$4 sm:$0xff]   ;;  %v4615_v35 = vld [vmem:[%s5770_s9 + $0x54] ss:$8 sps:$4 sm:$0xff]  }
 0x924   : > { %4756 = vpow2.f32 %v1504_v36  ;;  %v4613_v36 = vld [vmem:[%s5770_s9 + $0x50] ss:$8 sps:$4 sm:$0xff]  }
 0x92c   : > { %v4755_v37 = vpop.eup %4754 }
 0x92d   : > { %v1506_v38 = vsel %vm951_vm2, %v4755_v37, 0.0 }
 0x92e   : > { %v4757_v40 = vpop.eup %4756  ;;  %1507 = vadd.xlane.f32.xlu0 %v1506_v38  ;;  %v4616_v38 = vld [vmem:[%s5770_s9 + $0x60] ss:$8 sps:$4 sm:$0xff]  }
 0x92f   : > { %v1509_v41 = vsel %vm951_vm2, %v4757_v40, 0.0 }
 0x930   : > { %1510 = vadd.xlane.f32.xlu1 %v1509_v41  ;;  %v4619_v41 = vld [vmem:[%s5770_s9 + $0x70] ss:$8 sps:$4 sm:$0xff]  }
 0x944   : > { %1517 = vrot.lane.b32.xlu0 %v5076_v14, %s5782_s0 }
 0x95c   : > { %v1432_v44 = vpop.f32.mrb[20].mxu0 }
 0x95d   : > { %v1439_v45 = vadd.f32 %v1432_v44, %v5146_v39  ;;  %v4383_v46 = vpop.f32.mrb[21].mxu0  ;;  %v4597_v39 = vld [vmem:[%s5766_s5 + $0x38] sm:$0xff]  }
 0x95e   : > { %v1435_v47 = vpop.f32.mrb[22].mxu0  ;;  %4400 = vmatpush3.bf16.msra.mxu1 %v4597_v39 }
 0x95f   : > { %v1440_v48 = vadd.f32 %v1435_v47, %v5148_v42  ;;  %v4384_v49 = vpop.f32.mrb[23].mxu0 }
 0x9bb   : > { %v1508_v50 = vpop.xlane.xlu0 %1507 }
 0x9bc   : > { %4758 = vrcp.f32 %v1508_v50 }
 0x9bd   : > { %v1511_v51 = vpop.xlane.xlu1 %1510 }
 0x9be   : > { %4760 = vrcp.f32 %v1511_v51  ;;  %v3925_v51 = vld [vmem:[%s5768_s7] ss:$0 sm:$0xff] }
 0x9bf   : > { %v1518_v14 = vpop.permute.xlu0 %1517 }
 0x9c0   : > { %4392 = vmatpush3.bf16.msra.mxu0 %v1518_v14 }
 0x9c1   : > { %1783 = vmatprep.subr.bf16.mxu0 %v4600_v17  ;;  %v1691_v17 = vld [vmem:[%s5771_s10] sm:$0x3] }
 0x9c6   : > { %v4759_v52 = vpop.eup %4758 }
 0x9c7   : > { %v1514_v57 = vmul.f32 %v4759_v52, %v4755_v37  ;;  %v4618_v37 = vld [vmem:[%s5770_s9 + $0x64] ss:$8 sps:$4 sm:$0xff]  }
 0x9c8   : > { %v4761_v53 = vpop.eup %4760 }
 0x9c9   : > { %v1515_v59 = vmul.f32 %v4761_v53, %v4757_v40  ;;  %v4621_v40 = vld [vmem:[%s5770_s9 + $0x74] ss:$8 sps:$4 sm:$0xff]  }
 0x9cb   : > { %v1516_v60 = vpack.c.bf16 %v1515_v59, %v1514_v57  ;;  %v3926_v57 = vld [vmem:[%s5769_s8] ss:$0 sm:$0xff] }
 0x9cd   : > { %4394 = vmatmul.mubr.msk.bf16.vlgmr.msra.gmra.mrb[24].mxu0 %vm951_vm2, %v1516_v60 }
 0x9ce   : > { %1815 = vmatprep.mubr.bf16.mxu0 %v4835_v30  ;;  %1784 = vmatpush1.bf16.msra.mxu0 %v4598_v16  ;;  %v4637_v16 = vld [vmem:[%s5772_s11 + $0x38] sm:$0xff]  }
 0x9cf   : > { %1785 = vmatprep.subr.bf16.mxu0 %v4603_v18  ;;  %v1696_v18 = vrot.slane %v1691_v17, %v5061_v55 }
 0x9d2   : > { %1786 = vmatpush1.bf16.msra.mxu0 %v4601_v19  ;;  %v1700_v19 = vrot.slane %v1691_v17, %v5068_v58 }
 0x9d3   : > { %1787 = vmatprep.subr.bf16.mxu0 %v4606_v28 }
 0x9d6   : > { %1788 = vmatpush1.bf16.msra.mxu0 %v4604_v29 }
 0x9d7   : > { %1789 = vmatprep.subr.bf16.mxu0 %v4609_v31 }
 0x9da   : > { %1790 = vmatpush1.bf16.msra.mxu0 %v4607_v32 }
 0x9db   : > { %1791 = vmatprep.subr.bf16.mxu0 %v4612_v33 }
 0x9de   : > { %1792 = vmatpush1.bf16.msra.mxu0 %v4610_v34 }
 0x9df   : > { %1793 = vmatprep.subr.bf16.mxu0 %v4615_v35 }
 0x9e2   : > { %1794 = vmatpush1.bf16.msra.mxu0 %v4613_v36 }
 0x9e3   : > { %1795 = vmatprep.subr.bf16.mxu0 %v4618_v37 }
 0x9e6   : > { %1796 = vmatpush1.bf16.msra.mxu0 %v4616_v38 }
 0x9e7   : > { %1797 = vmatprep.subr.bf16.mxu0 %v4621_v40 }
 0x9ea   : > { %1798 = vmatpush1.bf16.msra.mxu0 %v4619_v41 }
 0xaa0   : > { %v1557_v42 = vpop.f32.mrb[24].mxu0 }
 0xaa1   : > { %v4395_v61 = vpop.f32.mrb[25].mxu0 }
 0xaa2   : > { %v1560_v62 = vpop.f32.mrb[26].mxu0  ;;  %v4622_v61 = vld [vmem:[%s5772_s11 + $0x40] sm:$0xff]  }
 0xaa3   : > { %v1564_v63 = vpack.c.bf16 %v1560_v62, %v1557_v42  ;;  %v4396_v0 = vpop.f32.mrb[27].mxu0  ;;  %v4623_v62 = vld [vmem:[%s5772_s11] sm:$0xff]   ;;  %4206 = vmatprep.subr.bf16.mxu1 %v4622_v61 }
 0xaa4   : > { %v4625_v0 = vld [vmem:[%s5772_s11 + $0x8] sm:$0xff]  }
 0xaa5   : > { %4402 = vmatmul.mubr.msk.bf16.vlgmr.msra.gmra.mrb[24].mxu1 %vm901_vm1, %v1564_v63  ;;  %v4624_v63 = vld [vmem:[%s5772_s11 + $0x48] sm:$0xff]  }
 0xaa6   : > { %4207 = vmatpush3.bf16.msra.mxu1 %v4623_v62 }
 0xaa7   : > { %4208 = vmatprep.subr.bf16.mxu1 %v4624_v63 }
 0xaaa   : > { %4209 = vmatpush3.bf16.msra.mxu1 %v4625_v0 }
 0xb78   : > { %v1614_v1 = vpop.f32.mrb[24].mxu1 }
 0xb79   : > { %v1621_v2 = vadd.f32 %v1614_v1, %v1439_v45  ;;  %v4403_v13 = vpop.f32.mrb[25].mxu1  ;;  %v4626_v1 = vld [vmem:[%s5772_s11 + $0x50] sm:$0xff]  }
 0xb7a   : > { %v1617_v3 = vpop.f32.mrb[26].mxu1  ;;  %4210 = vmatprep.subr.bf16.mxu1 %v4626_v1  ;;  %v4628_v13 = vld [vmem:[%s5772_s11 + $0x58] sm:$0xff]  }
 0xb7b   : > { %v1623_v7 = vadd.f32 %v4824_v6, %v1621_v2  ;;  %v1622_v8 = vadd.f32 %v1617_v3, %v1440_v48  ;;  %v4404_v9 = vpop.f32.mrb[27].mxu1  ;;  %v4627_v2 = vld [vmem:[%s5772_s11 + $0x10] sm:$0xff]   ;;  %v4629_v3 = vld [vmem:[%s5772_s11 + $0x18] sm:$0xff]   ;;  %v4631_v6 = vld [vmem:[%s5772_s11 + $0x20] sm:$0xff]  }
 0xb7c   : > { %4211 = vmatpush3.bf16.msra.mxu1 %v4627_v2  ;;  %v4634_v9 = vld [vmem:[%s5772_s11 + $0x70] sm:$0xff]  }
 0xb7d   : > { %v1624_v11 = vadd.f32 %v4825_v10, %v1622_v8  ;;  %v5203_v12 = vadd.f32 %v3924_v5, %v1623_v7  ;;  %4212 = vmatprep.subr.bf16.mxu1 %v4628_v13  ;;  %v4632_v7 = vld [vmem:[%s5772_s11 + $0x68] sm:$0xff]   ;;  %v4635_v10 = vld [vmem:[%s5772_s11 + $0x30] sm:$0xff]  }
 0xb7e   : > { %v4633_v8 = vld [vmem:[%s5772_s11 + $0x28] sm:$0xff]  }
 0xb7f   : > { %1636 = vadd.xlane.f32.xlu1 %v5203_v12  ;;  %v5206_v15 = vadd.f32 %v3924_v5, %v1624_v11  ;;  %v4630_v5 = vld [vmem:[%s5772_s11 + $0x60] sm:$0xff]   ;;  %v4636_v11 = vld [vmem:[%s5772_s11 + $0x78] sm:$0xff]  }
 0xb80   : > { %4213 = vmatpush3.bf16.msra.mxu1 %v4629_v3 }
 0xb81   : > { %4214 = vmatprep.subr.bf16.mxu1 %v4630_v5 }
 0xb83   : > { %1638 = vadd.xlane.f32.xlu1 %v5206_v15 }
 0xb84   : > { %4215 = vmatpush3.bf16.msra.mxu1 %v4631_v6 }
 0xb85   : > { %4216 = vmatprep.subr.bf16.mxu1 %v4632_v7 }
 0xb88   : > { %4217 = vmatpush3.bf16.msra.mxu1 %v4633_v8 }
 0xb89   : > { %4218 = vmatprep.subr.bf16.mxu1 %v4634_v9 }
 0xb8c   : > { %4219 = vmatpush3.bf16.msra.mxu1 %v4635_v10 }
 0xb8d   : > { %4220 = vmatprep.subr.bf16.mxu1 %v4636_v11  ;;  %v3959_v11 = vld [vmem:[%s5773_s12] ss:$0 sm:$0xff] }
 0xb90   : > { %4221 = vmatpush3.bf16.msra.mxu1 %v4637_v16 }
 0xb91   : > { %4405 = vmatprep.subr.bf16.mxu1 %v4834_v4 }
 0xc0c   : > { %v1637_v20 = vpop.xlane.xlu1 %1636 }
 0xc0d   : > { %v1640_v21 = vmul.f32 0.0078125, %v1637_v20 }
 0xc0f   : > { %v1642_v22 = vsub.f32 %v5203_v12, %v1640_v21 }
 0xc10   : > { %v1639_v23 = vpop.xlane.xlu1 %1638 }
 0xc11   : > { %v1641_v24 = vmul.f32 0.0078125, %v1639_v23  ;;  %v1644_v25 = vmul.f32 %v1642_v22, %v1642_v22 }
 0xc13   : > { %v1643_v26 = vsub.f32 %v5206_v15, %v1641_v24  ;;  %1646 = vadd.xlane.f32.xlu1 %v1644_v25 }
 0xc15   : > { %v1645_v27 = vmul.f32 %v1643_v26, %v1643_v26 }
 0xc17   : > { %1648 = vadd.xlane.f32.xlu1 %v1645_v27 }
 0xca0   : > { %v1647_v43 = vpop.xlane.xlu1 %1646 }
 0xca1   : > { %v1650_v44 = vmul.f32 0.0078125, %v1647_v43 }
 0xca3   : > { %v1652_v45 = vadd.f32 1e-05, %v1650_v44 }
 0xca4   : > { %v1649_v46 = vpop.xlane.xlu1 %1648 }
 0xca5   : > { %4762 = vrsqrt.f32 %v1652_v45  ;;  %v1651_v47 = vmul.f32 0.0078125, %v1649_v46 }
 0xca7   : > { %v1653_v48 = vadd.f32 1e-05, %v1651_v47 }
 0xca9   : > { %4764 = vrsqrt.f32 %v1653_v48 }
 0xcaf   : > { %v4763_v49 = vpop.eup %4762 }
 0xcb0   : > { %v1656_v50 = vmul.f32 %v4763_v49, %v1642_v22 }
 0xcb2   : > { %v1664_v53 = vmul.f32 %v3925_v51, %v1656_v50 }
 0xcb3   : > { %v4765_v14 = vpop.eup %4764 }
 0xcb4   : > { %v1657_v52 = vmul.f32 %v4765_v14, %v1643_v26  ;;  %v1672_v60 = vadd.f32 %v3926_v57, %v1664_v53 }
 0xcb6   : > { %v1665_v59 = vmul.f32 %v3925_v51, %v1657_v52 }
 0xcb8   : > { %v1673_v39 = vadd.f32 %v3926_v57, %v1665_v59 }
 0xcba   : > { %v1674_v42 = vpack.c.bf16 %v1673_v39, %v1672_v60 }
 0xcbc   : > { %1816 = vmatmul.mubr.bf16.vlgmr.msra.gmra.mrb[28].mxu0 %v1674_v42 }
 0xcbd   : > { %2298 = vmatprep.mubr.bf16.mxu0 %v4835_v30 }
 0xd8f   : > { %v1817_v20 = vpop.f32.mrb[28].mxu0 }
 0xd90   : > { %v1818_v21 = vadd.f32 %v1817_v20, %v1696_v18  ;;  %v1819_v22 = vpop.f32.mrb[29].mxu0 }
 0xd91   : > { %v1820_v23 = vadd.f32 %v1819_v22, %v1700_v19  ;;  %v1821_v24 = vpop.f32.mrb[30].mxu0  ;;  %v4640_v22 = vld [vmem:[%s5764_s3 + $0xc4] ss:$12 sps:$4 sm:$0xff]  }
 0xd92   : > { %v1826_v25 = vmul.f32 %v1818_v21, %v1818_v21  ;;  %v1822_v26 = vadd.f32 %v1821_v24, %v1696_v18  ;;  %v1823_v27 = vpop.f32.mrb[31].mxu0  ;;  %2266 = vmatprep.subr.bf16.mxu0 %v4640_v22 }
 0xd93   : > { %v1827_v28 = vmul.f32 %v1820_v23, %v1820_v23  ;;  %v1824_v29 = vadd.f32 %v1823_v27, %v1700_v19 }
 0xd94   : > { %v1830_v31 = vmul.f32 %v1826_v25, %v1818_v21  ;;  %v1828_v32 = vmul.f32 %v1822_v26, %v1822_v26 }
 0xd95   : > { %v1831_v33 = vmul.f32 %v1827_v28, %v1820_v23  ;;  %v1829_v34 = vmul.f32 %v1824_v29, %v1824_v29 }
 0xd96   : > { %v1834_v35 = vmul.f32 0.044715, %v1830_v31  ;;  %v1832_v36 = vmul.f32 %v1828_v32, %v1822_v26 }
 0xd97   : > { %v1835_v37 = vmul.f32 0.044715, %v1831_v33  ;;  %v1833_v38 = vmul.f32 %v1829_v34, %v1824_v29  ;;  %v4645_v33 = vld [vmem:[%s5764_s3 + $0xe0] ss:$12 sps:$4 sm:$0xff]  }
 0xd98   : > { %v1838_v40 = vadd.f32 %v1834_v35, %v1818_v21  ;;  %v1836_v41 = vmul.f32 0.044715, %v1832_v36  ;;  %v4648_v34 = vld [vmem:[%s5764_s3 + $0xf4] ss:$12 sps:$4 sm:$0xff]   ;;  %v4646_v35 = vld [vmem:[%s5764_s3 + $0xf0] ss:$12 sps:$4 sm:$0xff]  }
 0xd99   : > { %v1839_v43 = vadd.f32 %v1835_v37, %v1820_v23  ;;  %v1837_v44 = vmul.f32 0.044715, %v1833_v38  ;;  %v4649_v36 = vld [vmem:[%s5764_s3 + $0xf8] ss:$12 sps:$4 sm:$0xff]   ;;  %v4650_v38 = vld [vmem:[%s5764_s3 + $0x108] ss:$12 sps:$4 sm:$0xff]  }
 0xd9a   : > { %v1842_v45 = vmul.f32 0.7978846, %v1838_v40  ;;  %v1840_v46 = vadd.f32 %v1836_v41, %v1822_v26  ;;  %v4652_v37 = vld [vmem:[%s5764_s3 + $0x10c] ss:$12 sps:$4 sm:$0xff]   ;;  %v4653_v40 = vld [vmem:[%s5764_s3 + $0x110] ss:$12 sps:$4 sm:$0xff]  }
 0xd9b   : > { %v1843_v47 = vmul.f32 0.7978846, %v1839_v43  ;;  %v1841_v48 = vadd.f32 %v1837_v44, %v1824_v29  ;;  %v4656_v41 = vld [vmem:[%s5764_s3 + $0x124] ss:$12 sps:$4 sm:$0xff]   ;;  %v4654_v43 = vld [vmem:[%s5764_s3 + $0x120] ss:$12 sps:$4 sm:$0xff]  }
 0xd9c   : > { %4766 = vtanh.f32 %v1842_v45  ;;  %v1844_v49 = vmul.f32 0.7978846, %v1840_v46  ;;  %v4657_v44 = vld [vmem:[%s5764_s3 + $0x128] ss:$12 sps:$4 sm:$0xff]   ;;  %v4658_v46 = vld [vmem:[%s5764_s3 + $0x138] ss:$12 sps:$4 sm:$0xff]  }
 0xd9d   : > { %4768 = vtanh.f32 %v1843_v47  ;;  %v1845_v50 = vmul.f32 0.7978846, %v1841_v48  ;;  %v4660_v45 = vld [vmem:[%s5764_s3 + $0x13c] ss:$12 sps:$4 sm:$0xff]   ;;  %v4661_v47 = vld [vmem:[%s5764_s3 + $0x140] ss:$12 sps:$4 sm:$0xff]  }
 0xd9e   : > { %4770 = vtanh.f32 %v1844_v49  ;;  %v4664_v48 = vld [vmem:[%s5764_s3 + $0x154] ss:$12 sps:$4 sm:$0xff]   ;;  %v4662_v49 = vld [vmem:[%s5764_s3 + $0x150] ss:$12 sps:$4 sm:$0xff]  }
 0xd9f   : > { %4772 = vtanh.f32 %v1845_v50  ;;  %v4665_v50 = vld [vmem:[%s5764_s3 + $0x158] ss:$12 sps:$4 sm:$0xff]  }
 0xda6   : > { %v4767_v51 = vpop.eup %4766 }
 0xda7   : > { %v4769_v14 = vpop.eup %4768  ;;  %v1850_v52 = vadd.f32 1.0, %v4767_v51  ;;  %v4668_v51 = vld [vmem:[%s5764_s3 + $0x16c] ss:$12 sps:$4 sm:$0xff]  }
 0xda8   : > { %v4771_v53 = vpop.eup %4770  ;;  %v1851_v57 = vadd.f32 1.0, %v4769_v14  ;;  %v4666_v14 = vld [vmem:[%s5764_s3 + $0x168] ss:$12 sps:$4 sm:$0xff]  }
 0xda9   : > { %v4773_v59 = vpop.eup %4772  ;;  %v1854_v60 = vmul.f32 0.5, %v1850_v52  ;;  %v1852_v39 = vadd.f32 1.0, %v4771_v53  ;;  %v4669_v52 = vld [vmem:[%s5764_s3 + $0x170] ss:$12 sps:$4 sm:$0xff]  }
 0xdaa   : > { %v1853_v42 = vadd.f32 1.0, %v4773_v59  ;;  %v1855_v61 = vmul.f32 0.5, %v1851_v57 }
 0xdab   : > { %v1856_v62 = vmul.f32 0.5, %v1852_v39  ;;  %v1858_v0 = vmul.f32 %v1854_v60, %v1818_v21  ;;  %v4638_v21 = vld [vmem:[%s5764_s3 + $0xc0] ss:$12 sps:$4 sm:$0xff]  }
 0xdac   : > { %v1857_v63 = vmul.f32 0.5, %v1853_v42  ;;  %v1859_v2 = vmul.f32 %v1855_v61, %v1820_v23  ;;  %2267 = vmatpush1.bf16.msra.mxu0 %v4638_v21  ;;  %v4642_v23 = vld [vmem:[%s5764_s3 + $0xd8] ss:$12 sps:$4 sm:$0xff]  }
 0xdad   : > { %v1860_v1 = vmul.f32 %v1856_v62, %v1822_v26 }
 0xdae   : > { %v1861_v13 = vmul.f32 %v1857_v63, %v1824_v29  ;;  %v3962_v63 = vld [vmem:[%s5790_s22 + $0x1] ss:$0 sm:$0xff] }
 0xdaf   : > { %v1862_v3 = vpack.c.bf16 %v1860_v1, %v1858_v0 }
 0xdb0   : > { %v1863_v5 = vpack.c.bf16 %v1861_v13, %v1859_v2  ;;  %v3963_v13 = vld [vmem:[%s5791_s24 + $0x1] ss:$0 sm:$0xff] }
 0xdb2   : > { %2024 = vmatprep.mubr.bf16.mxu1 %v1863_v5 }
 0xdb3   : > { %2025 = vmatmul.mubr.bf16.vlgmr.msra.gmra.mrb[28].mxu1 %v1862_v3 }
 0xdb4   : > { %4421 = vmatprep.mubr.msk.bf16.mxu1 %vm4836_vm0, %v4834_v4 }
 0xe86   : > { %v4222_v6 = vpop.f32.mrb[28].mxu1 }
 0xe87   : > { %v4223_v7 = vpop.f32.mrb[29].mxu1 }
 0xe88   : > { %v4224_v8 = vadd.f32 %v4223_v7, %v4222_v6  ;;  %v4225_v9 = vpop.f32.mrb[30].mxu1 }
 0xe89   : > { %v4226_v10 = vpop.f32.mrb[31].mxu1 }
 0xe8a   : > { %v2033_v16 = vadd.f32 %v4224_v8, %v5203_v12  ;;  %v4227_v17 = vadd.f32 %v4226_v10, %v4225_v9  ;;  %v4641_v12 = vld [vmem:[%s5764_s3 + $0xc8] ss:$12 sps:$4 sm:$0xff]   ;;  %v3996_v8 = vld [vmem:[%s5765_s4 + $0x3] sm:$0x7] }
 0xe8b   : > { %4406 = vmatpush3.bf16.msra.mxu1 %v4641_v12  ;;  %v2126_v9 = vrot.slane %v3996_v8, %v5061_v55  ;;  %v2134_v10 = vrot.slane %v3996_v8, %v665_v56 }
 0xe8c   : > { %v2034_v18 = vadd.f32 %v4227_v17, %v5206_v15  ;;  %v5327_v19 = vadd.f32 %v3959_v11, %v2033_v16  ;;  %v4644_v15 = vld [vmem:[%s5764_s3 + $0xdc] ss:$12 sps:$4 sm:$0xff]   ;;  %4407 = vmatprep.subr.bf16.mxu1 %v4834_v4  ;;  %v2130_v17 = vrot.slane %v3996_v8, %v5068_v58 }
 0xe8d   : > { %2268 = vmatprep.subr.bf16.mxu0 %v4644_v15 }
 0xe8e   : > { %2048 = vadd.xlane.f32.xlu1 %v5327_v19  ;;  %v5330_v20 = vadd.f32 %v3959_v11, %v2034_v18  ;;  %2269 = vmatpush1.bf16.msra.mxu0 %v4642_v23 }
 0xe8f   : > { %4408 = vmatpush3.bf16.msra.mxu1 %v4645_v33  ;;  %2270 = vmatprep.subr.bf16.mxu0 %v4648_v34 }
 0xe90   : > { %4409 = vmatprep.subr.bf16.mxu1 %v4834_v4 }
 0xe92   : > { %2050 = vadd.xlane.f32.xlu1 %v5330_v20  ;;  %2271 = vmatpush1.bf16.msra.mxu0 %v4646_v35 }
 0xe93   : > { %4410 = vmatpush3.bf16.msra.mxu1 %v4649_v36  ;;  %2272 = vmatprep.subr.bf16.mxu0 %v4652_v37 }
 0xe94   : > { %4411 = vmatprep.subr.bf16.mxu1 %v4834_v4 }
 0xe96   : > { %2273 = vmatpush1.bf16.msra.mxu0 %v4650_v38 }
 0xe97   : > { %4412 = vmatpush3.bf16.msra.mxu1 %v4653_v40  ;;  %2274 = vmatprep.subr.bf16.mxu0 %v4656_v41 }
 0xe98   : > { %4413 = vmatprep.subr.bf16.mxu1 %v4834_v4 }
 0xe9a   : > { %2275 = vmatpush1.bf16.msra.mxu0 %v4654_v43 }
 0xe9b   : > { %4414 = vmatpush3.bf16.msra.mxu1 %v4657_v44  ;;  %2276 = vmatprep.subr.bf16.mxu0 %v4660_v45 }
 0xe9c   : > { %4415 = vmatprep.subr.bf16.mxu1 %v4834_v4 }
 0xe9e   : > { %2277 = vmatpush1.bf16.msra.mxu0 %v4658_v46 }
 0xe9f   : > { %4416 = vmatpush3.bf16.msra.mxu1 %v4661_v47  ;;  %2278 = vmatprep.subr.bf16.mxu0 %v4664_v48 }
 0xea0   : > { %4417 = vmatprep.subr.bf16.mxu1 %v4834_v4 }
 0xea2   : > { %2279 = vmatpush1.bf16.msra.mxu0 %v4662_v49 }
 0xea3   : > { %4418 = vmatpush3.bf16.msra.mxu1 %v4665_v50  ;;  %2280 = vmatprep.subr.bf16.mxu0 %v4668_v51 }
 0xea4   : > { %4419 = vmatprep.subr.bf16.mxu1 %v4834_v4 }
 0xea6   : > { %2281 = vmatpush1.bf16.msra.mxu0 %v4666_v14 }
 0xea7   : > { %4420 = vmatpush3.bf16.msra.mxu1 %v4669_v52  ;;  %4425 = vmatprep.subr.bf16.mxu0 %v4834_v4 }
 0xea8   : > { %4431 = vmatprep.subr.bf16.mxu1 %v4834_v4 }
 0xf1b   : > { %v2049_v24 = vpop.xlane.xlu1 %2048 }
 0xf1c   : > { %v2052_v25 = vmul.f32 0.0078125, %v2049_v24 }
 0xf1e   : > { %v5350_v26 = vsub.f32 %v5327_v19, %v2052_v25 }
 0xf1f   : > { %v2051_v27 = vpop.xlane.xlu1 %2050 }
 0xf20   : > { %v2053_v28 = vmul.f32 0.0078125, %v2051_v27  ;;  %v2056_v29 = vmul.f32 %v5350_v26, %v5350_v26 }
 0xf22   : > { %v2055_v31 = vsub.f32 %v5330_v20, %v2053_v28  ;;  %2058 = vadd.xlane.f32.xlu0 %v2056_v29 }
 0xf24   : > { %v2057_v32 = vmul.f32 %v2055_v31, %v2055_v31 }
 0xf26   : > { %2060 = vadd.xlane.f32.xlu1 %v2057_v32 }
 0xfaf   : > { %v2059_v53 = vpop.xlane.xlu0 %2058 }
 0xfb0   : > { %v2062_v57 = vmul.f32 0.0078125, %v2059_v53 }
 0xfb2   : > { %v2064_v59 = vadd.f32 1e-05, %v2062_v57 }
 0xfb3   : > { %v2061_v60 = vpop.xlane.xlu1 %2060 }
 0xfb4   : > { %4774 = vrsqrt.f32 %v2064_v59  ;;  %v2063_v39 = vmul.f32 0.0078125, %v2061_v60 }
 0xfb6   : > { %v2065_v42 = vadd.f32 1e-05, %v2063_v39 }
 0xfb8   : > { %4776 = vrsqrt.f32 %v2065_v42 }
 0xfbe   : > { %v4775_v61 = vpop.eup %4774 }
 0xfbf   : > { %v2068_v62 = vmul.f32 %v4775_v61, %v5350_v26 }
 0xfc1   : > { %v2076_v2 = vmul.f32 %v3962_v63, %v2068_v62 }
 0xfc2   : > { %v4777_v0 = vpop.eup %4776 }
 0xfc3   : > { %v2069_v1 = vmul.f32 %v4777_v0, %v2055_v31  ;;  %v2084_v5 = vadd.f32 %v3963_v13, %v2076_v2 }
 0xfc5   : > { %v2077_v3 = vmul.f32 %v3962_v63, %v2069_v1 }
 0xfc7   : > { %v2085_v6 = vadd.f32 %v3963_v13, %v2077_v3 }
 0xfc9   : > { %v2086_v7 = vpack.c.bf16 %v2085_v6, %v2084_v5 }
 0xfcb   : > { %2299 = vmatmul.mubr.bf16.vlgmr.msra.gmra.mrb[32].mxu0 %v2086_v7  ;;  %4422 = vmatmul.mubr.bf16.vlgmr.msra.gmra.mrb[32].mxu1 %v2086_v7 }
 0xfcc   : > { %4427 = vmatprep.mubr.msk.bf16.mxu0 %vm4836_vm0, %v4834_v4  ;;  %4433 = vmatprep.mubr.msk.bf16.mxu1 %vm4836_vm0, %v4834_v4 }
0x109e   : > { %v2300_v11 = vpop.f32.mrb[32].mxu0  ;;  %v2343_v16 = vpop.f32.mrb[32].mxu1 }
0x109f   : > { %v2302_v18 = vpop.f32.mrb[33].mxu0  ;;  %v4423_v21 = vpop.f32.mrb[33].mxu1  ;;  %v2301_v15 = vadd.f32 %v2300_v11, %v2126_v9  ;;  %v2344_v23 = vadd.f32 %v2343_v16, %v2134_v10 }
0x10a0   : > { %v2304_v22 = vpop.f32.mrb[34].mxu0  ;;  %v2346_v12 = vpop.f32.mrb[34].mxu1  ;;  %v2303_v28 = vadd.f32 %v2302_v18, %v2130_v17 }
0x10a1   : > { %v2305_v24 = vadd.f32 %v2304_v22, %v2126_v9  ;;  %v2347_v25 = vadd.f32 %v2346_v12, %v2134_v10  ;;  %v2306_v26 = vpop.f32.mrb[35].mxu0  ;;  %v4424_v27 = vpop.f32.mrb[35].mxu1 }
0x10a2   : > { %v2307_v29 = vadd.f32 %v2306_v26, %v2130_v17 }
0x10a3   : > { %v5438_v31 = vpack.c.bf16 %v2305_v24, %v2301_v15  ;;  %v5440_v54 = vpack.c.bf16 %v2347_v25, %v2344_v23  ;;  %v4672_v15 = vld [vmem:[%s5766_s5 + $0x50] sm:$0xff]   ;;  %v4673_v23 = vld [vmem:[%s5766_s5 + $0x58] sm:$0xff]  }
0x10a4   : > { %v5442_v56 = vpack.c.bf16 %v2307_v29, %v2303_v28 }
0x10a5   : > { %4432 = vmatpush3.bf16.msra.mxu1 %v5440_v54 }
0x10a6   : > { %2491 = vrot.lane.b32.xlu1 %v5442_v56, %s4837_s29  ;;  %v2374_v32 = vsel %vm901_vm1, %v5442_v56, 0  ;;  %4443 = vmatprep.subr.bf16.mxu1 %v4834_v4 }
0x10a7   : > { %4426 = vmatpush3.bf16.xpose.msra.mxu0 %v2374_v32 }
0x10a8   : > { %4437 = vmatprep.subr.bf16.mxu0 %v4834_v4 }
0x10aa   : > { %2488 = vrot.lane.b32.xlu1 %v5438_v31, %s4837_s29 }
0x10ae   : > { %4428 = vmatmul.mubr.msk.bf16.vlgmr.msra.gmra.mrb[36].mxu0 %vm901_vm1, %v5438_v31 }
0x10af   : > { %4439 = vmatprep.mubr.msk.bf16.mxu0 %vm4836_vm0, %v4834_v4 }
0x1118   : > { %v2492_v33 = vpop.permute.xlu1 %2491 }
0x1119   : > { %v2497_v34 = vsel %vm901_vm1, %v2492_v33, 0  ;;  %v4670_v33 = vld [vmem:[%s5766_s5 + $0x40] sm:$0xff]  }
0x111a   : > { %4438 = vmatpush3.bf16.xpose.msra.mxu0 %v2497_v34 }
0x111b   : > { %4449 = vmatprep.subr.bf16.mxu0 %v4834_v4 }
0x111c   : > { %v2489_v35 = vpop.permute.xlu1 %2488 }
0x1121   : > { %4440 = vmatmul.mubr.msk.bf16.vlgmr.msra.gmra.mrb[40].mxu0 %vm901_vm1, %v2489_v35  ;;  %v4671_v35 = vld [vmem:[%s5766_s5 + $0x48] sm:$0xff]  }
0x1122   : > { %4453 = vmatprep.mubr.msk.bf16.mxu0 %vm4836_vm0, %v4834_v4  ;;  %4450 = vmatpush3.bf16.msra.mxu0 %v4672_v15 }
0x1123   : > { %4451 = vmatprep.subr.bf16.mxu0 %v4834_v4 }
0x1126   : > { %4452 = vmatpush3.bf16.msra.mxu0 %v4673_v23 }
0x1127   : > { %4465 = vmatprep.subr.bf16.mxu0 %v4834_v4 }
0x1181   : > { %v2410_v36 = vpop.f32.mrb[36].mxu0 }
0x1182   : > { %v2417_v37 = vmul.f32 0.17677669, %v2410_v36  ;;  %v4429_v38 = vpop.f32.mrb[37].mxu0 }
0x1183   : > { %v2413_v40 = vpop.f32.mrb[38].mxu0 }
0x1184   : > { %v2418_v41 = vmul.f32 0.17677669, %v2413_v40  ;;  %v4430_v43 = vpop.f32.mrb[39].mxu0  ;;  %v2419_v44 = vsel %vm951_vm2, %v2417_v37, -inf }
0x1185   : > { %2420 = vmax.xlane.f32.xlu1 %v2419_v44 }
0x1186   : > { %v2422_v45 = vsel %vm951_vm2, %v2418_v41, -inf }
0x1187   : > { %2423 = vmax.xlane.f32.xlu0 %v2422_v45 }
0x1196   : > { %2728 = vrot.lane.b32.xlu1 %v5442_v56, %s5792_s30 }
0x119a   : > { %2726 = vrot.lane.b32.xlu1 %v5438_v31, %s5792_s30 }
0x11f4   : > { %v2533_v46 = vpop.f32.mrb[40].mxu0 }
0x11f5   : > { %v2540_v47 = vmul.f32 0.17677669, %v2533_v46  ;;  %v4441_v48 = vpop.f32.mrb[41].mxu0 }
0x11f6   : > { %v2536_v49 = vpop.f32.mrb[42].mxu0 }
0x11f7   : > { %v2541_v50 = vmul.f32 0.17677669, %v2536_v49  ;;  %v4442_v51 = vpop.f32.mrb[43].mxu0  ;;  %v2542_v14 = vsel %vm951_vm2, %v2540_v47, -inf }
0x11f8   : > { %2543 = vmax.xlane.f32.xlu0 %v2542_v14 }
0x11f9   : > { %v2545_v52 = vsel %vm951_vm2, %v2541_v50, -inf }
0x11fc   : > { %2546 = vmax.xlane.f32.xlu0 %v2545_v52 }
0x1212   : > { %v2421_v53 = vpop.xlane.xlu1 %2420 }
0x1213   : > { %v2425_v57 = vsub.f32 %v2417_v37, %v2421_v53 }
0x1214   : > { %v2424_v59 = vpop.xlane.xlu0 %2423 }
0x1215   : > { %v2427_v60 = vmul.f32 1.442695, %v2425_v57  ;;  %v2426_v39 = vsub.f32 %v2418_v41, %v2424_v59 }
0x1216   : > { %v2729_v45 = vpop.permute.xlu1 %2728 }
0x1217   : > { %4778 = vpow2.f32 %v2427_v60  ;;  %v2429_v42 = vmul.f32 1.442695, %v2426_v39  ;;  %v2734_v49 = vsel %vm901_vm1, %v2729_v45, 0 }
0x1219   : > { %4780 = vpow2.f32 %v2429_v42 }
0x1221   : > { %v4779_v61 = vpop.eup %4778 }
0x1222   : > { %v2431_v62 = vsel %vm951_vm2, %v4779_v61, 0.0 }
0x1223   : > { %v4781_v63 = vpop.eup %4780  ;;  %2432 = vadd.xlane.f32.xlu0 %v2431_v62 }
0x1224   : > { %v2434_v0 = vsel %vm951_vm2, %v4781_v63, 0.0 }
0x1227   : > { %2435 = vadd.xlane.f32.xlu0 %v2434_v0 }
0x1285   : > { %v2544_v1 = vpop.xlane.xlu0 %2543 }
0x1286   : > { %v2548_v2 = vsub.f32 %v2540_v47, %v2544_v1 }
0x1288   : > { %v2550_v13 = vmul.f32 1.442695, %v2548_v2 }
0x1289   : > { %v2547_v3 = vpop.xlane.xlu0 %2546 }
0x128a   : > { %4782 = vpow2.f32 %v2550_v13  ;;  %v2549_v5 = vsub.f32 %v2541_v50, %v2547_v3  ;;  %v2727_v50 = vpop.permute.xlu1 %2726 }
0x128c   : > { %v2552_v6 = vmul.f32 1.442695, %v2549_v5 }
0x128e   : > { %4784 = vpow2.f32 %v2552_v6 }
0x1294   : > { %v4783_v7 = vpop.eup %4782 }
0x1295   : > { %v2554_v8 = vsel %vm951_vm2, %v4783_v7, 0.0 }
0x1296   : > { %2555 = vadd.xlane.f32.xlu0 %v2554_v8 }
0x1298   : > { %v4785_v9 = vpop.eup %4784 }
0x1299   : > { %v2557_v10 = vsel %vm951_vm2, %v4785_v9, 0.0 }
0x129a   : > { %2558 = vadd.xlane.f32.xlu0 %v2557_v10 }
0x12b0   : > { %2566 = vrot.lane.b32.xlu0 %v5440_v54, %s4837_s29  ;;  %v2433_v11 = vpop.xlane.xlu0 %2432 }
0x12b1   : > { %4786 = vrcp.f32 %v2433_v11 }
0x12b4   : > { %v2436_v16 = vpop.xlane.xlu0 %2435 }
0x12b5   : > { %4788 = vrcp.f32 %v2436_v16 }
0x12bb   : > { %v4787_v17 = vpop.eup %4786 }
0x12bc   : > { %v2439_v21 = vmul.f32 %v4787_v17, %v4779_v61 }
0x12bf   : > { %v4789_v18 = vpop.eup %4788 }
0x12c0   : > { %v2440_v22 = vmul.f32 %v4789_v18, %v4781_v63 }
0x12c2   : > { %v2441_v12 = vpack.c.bf16 %v2440_v22, %v2439_v21 }
0x12c4   : > { %4434 = vmatmul.mubr.msk.bf16.vlgmr.msra.gmra.mrb[36].mxu1 %vm951_vm2, %v2441_v12 }
0x12c5   : > { %4445 = vmatprep.mubr.msk.bf16.mxu1 %vm4836_vm0, %v4834_v4 }
0x1323   : > { %v2556_v24 = vpop.xlane.xlu0 %2555 }
0x1324   : > { %4790 = vrcp.f32 %v2556_v24 }
0x1327   : > { %v2559_v25 = vpop.xlane.xlu0 %2558 }
0x1328   : > { %4792 = vrcp.f32 %v2559_v25 }
0x132b   : > { %v2567_v26 = vpop.permute.xlu0 %2566 }
0x132c   : > { %4444 = vmatpush3.bf16.msra.mxu1 %v2567_v26 }
0x132d   : > { %4457 = vmatprep.subr.bf16.mxu1 %v4834_v4 }
0x132e   : > { %v4791_v27 = vpop.eup %4790 }
0x132f   : > { %v2562_v29 = vmul.f32 %v4791_v27, %v4783_v7 }
0x1332   : > { %v4793_v28 = vpop.eup %4792 }
0x1333   : > { %v2563_v32 = vmul.f32 %v4793_v28, %v4785_v9 }
0x1335   : > { %v2564_v34 = vpack.c.bf16 %v2563_v32, %v2562_v29  ;;  %v4675_v32 = vld [vmem:[%s5766_s5 + $0x68] sm:$0xff]  }
0x1337   : > { %4446 = vmatmul.mubr.msk.bf16.vlgmr.msra.gmra.mrb[40].mxu1 %vm951_vm2, %v2564_v34 }
0x1338   : > { %4458 = vmatpush3.bf16.msra.mxu1 %v4670_v33  ;;  %4461 = vmatprep.mubr.msk.bf16.mxu1 %vm4836_vm0, %v4834_v4 }
0x1339   : > { %4459 = vmatprep.subr.bf16.mxu1 %v4834_v4 }
0x133c   : > { %4460 = vmatpush3.bf16.msra.mxu1 %v4671_v35 }
0x133d   : > { %4471 = vmatprep.subr.bf16.mxu1 %v4834_v4 }
0x1397   : > { %v2479_v36 = vpop.f32.mrb[36].mxu1 }
0x1398   : > { %v4435_v37 = vpop.f32.mrb[37].mxu1 }
0x1399   : > { %v2482_v38 = vpop.f32.mrb[38].mxu1 }
0x139a   : > { %v2486_v40 = vpack.c.bf16 %v2482_v38, %v2479_v36  ;;  %v4436_v41 = vpop.f32.mrb[39].mxu1 }
0x139c   : > { %4462 = vmatmul.mubr.msk.bf16.vlgmr.msra.gmra.mrb[44].mxu1 %vm901_vm1, %v2486_v40 }
0x139d   : > { %4473 = vmatprep.mubr.msk.bf16.mxu1 %vm4836_vm0, %v4834_v4 }
0x140a   : > { %v2606_v43 = vpop.f32.mrb[40].mxu1 }
0x140b   : > { %v4447_v44 = vpop.f32.mrb[41].mxu1 }
0x140c   : > { %v2609_v46 = vpop.f32.mrb[42].mxu1 }
0x140d   : > { %v2613_v47 = vpack.c.bf16 %v2609_v46, %v2606_v43  ;;  %v4448_v48 = vpop.f32.mrb[43].mxu1 }
0x140f   : > { %4454 = vmatmul.mubr.msk.bf16.vlgmr.msra.gmra.mrb[44].mxu0 %vm901_vm1, %v2613_v47 }
0x1410   : > { %4466 = vmatpush3.bf16.xpose.msra.mxu0 %v2734_v49  ;;  %4467 = vmatprep.mubr.msk.bf16.mxu0 %vm4836_vm0, %v4834_v4 }
0x1411   : > { %4477 = vmatprep.subr.bf16.mxu0 %v4834_v4 }
0x1417   : > { %4468 = vmatmul.mubr.msk.bf16.vlgmr.msra.gmra.mrb[48].mxu0 %vm901_vm1, %v2727_v50 }
0x1418   : > { %4481 = vmatprep.mubr.msk.bf16.mxu0 %vm4836_vm0, %v4834_v4 }
0x146f   : > { %v2719_v51 = vpop.f32.mrb[44].mxu1 }
0x1470   : > { %v4463_v14 = vpop.f32.mrb[45].mxu1 }
0x1471   : > { %v2722_v52 = vpop.f32.mrb[46].mxu1 }
0x1472   : > { %v4464_v53 = vpop.f32.mrb[47].mxu1 }
0x14e2   : > { %v2663_v57 = vpop.f32.mrb[44].mxu0 }
0x14e3   : > { %v5510_v59 = vadd.f32 %v2719_v51, %v2663_v57  ;;  %v4455_v60 = vpop.f32.mrb[45].mxu0 }
0x14e4   : > { %v2666_v39 = vpop.f32.mrb[46].mxu0 }
0x14e5   : > { %v5512_v42 = vadd.f32 %v2722_v52, %v2666_v39  ;;  %v4456_v61 = vpop.f32.mrb[47].mxu0 }
0x14ea   : > { %v2770_v62 = vpop.f32.mrb[48].mxu0 }
0x14eb   : > { %v2777_v63 = vmul.f32 0.17677669, %v2770_v62  ;;  %v4469_v0 = vpop.f32.mrb[49].mxu0 }
0x14ec   : > { %v2773_v1 = vpop.f32.mrb[50].mxu0 }
0x14ed   : > { %v2778_v2 = vmul.f32 0.17677669, %v2773_v1  ;;  %v4470_v13 = vpop.f32.mrb[51].mxu0  ;;  %v2779_v3 = vsel %vm951_vm2, %v2777_v63, -inf }
0x14ee   : > { %2780 = vmax.xlane.f32.xlu0 %v2779_v3 }
0x14ef   : > { %v2782_v5 = vsel %vm951_vm2, %v2778_v2, -inf }
0x14f0   : > { %2783 = vmax.xlane.f32.xlu1 %v2782_v5 }
0x1501   : > { %2910 = vrot.lane.b32.xlu1 %v5442_v56, %s5793_s1 }
0x1505   : > { %2908 = vrot.lane.b32.xlu1 %v5438_v31, %s5793_s1  ;;  %v4674_v31 = vld [vmem:[%s5766_s5 + $0x60] sm:$0xff]  }
0x1506   : > { %4478 = vmatpush3.bf16.msra.mxu0 %v4674_v31 }
0x1507   : > { %4479 = vmatprep.subr.bf16.mxu0 %v4834_v4 }
0x150a   : > { %4480 = vmatpush3.bf16.msra.mxu0 %v4675_v32 }
0x150b   : > { %4491 = vmatprep.subr.bf16.mxu0 %v4834_v4 }
0x157b   : > { %v2781_v6 = vpop.xlane.xlu0 %2780 }
0x157c   : > { %v2785_v7 = vsub.f32 %v2777_v63, %v2781_v6 }
0x157d   : > { %v2784_v8 = vpop.xlane.xlu1 %2783 }
0x157e   : > { %v2787_v9 = vmul.f32 1.442695, %v2785_v7  ;;  %v2786_v10 = vsub.f32 %v2778_v2, %v2784_v8 }
0x1580   : > { %4794 = vpow2.f32 %v2787_v9  ;;  %v2789_v11 = vmul.f32 1.442695, %v2786_v10 }
0x1581   : > { %v2911_v26 = vpop.permute.xlu1 %2910 }
0x1582   : > { %4796 = vpow2.f32 %v2789_v11  ;;  %v2916_v28 = vsel %vm901_vm1, %v2911_v26, 0 }
0x1585   : > { %v2909_v29 = vpop.permute.xlu1 %2908 }
0x158a   : > { %v4795_v16 = vpop.eup %4794 }
0x158b   : > { %v2791_v17 = vsel %vm951_vm2, %v4795_v16, 0.0 }
0x158c   : > { %v4797_v18 = vpop.eup %4796  ;;  %2792 = vadd.xlane.f32.xlu0 %v2791_v17 }
0x158d   : > { %v2794_v21 = vsel %vm951_vm2, %v4797_v18, 0.0 }
0x1590   : > { %2795 = vadd.xlane.f32.xlu0 %v2794_v21 }
0x15a6   : > { %2802 = vrot.lane.b32.xlu0 %v5440_v54, %s5792_s30 }
0x1619   : > { %v2793_v56 = vpop.xlane.xlu0 %2792 }
0x161a   : > { %4798 = vrcp.f32 %v2793_v56 }
0x161d   : > { %v2796_v22 = vpop.xlane.xlu0 %2795 }
0x161e   : > { %4800 = vrcp.f32 %v2796_v22 }
0x1621   : > { %v2803_v12 = vpop.permute.xlu0 %2802 }
0x1622   : > { %4472 = vmatpush3.bf16.msra.mxu1 %v2803_v12 }
0x1623   : > { %4485 = vmatprep.subr.bf16.mxu1 %v4834_v4 }
0x1624   : > { %v4799_v15 = vpop.eup %4798 }
0x1625   : > { %v2799_v24 = vmul.f32 %v4799_v15, %v4795_v16 }
0x1628   : > { %v4801_v23 = vpop.eup %4800 }
0x1629   : > { %v2800_v25 = vmul.f32 %v4801_v23, %v4797_v18 }
0x162b   : > { %v2801_v27 = vpack.c.bf16 %v2800_v25, %v2799_v24 }
0x162d   : > { %4474 = vmatmul.mubr.msk.bf16.vlgmr.msra.gmra.mrb[48].mxu1 %vm951_vm2, %v2801_v27  ;;  %v4678_v27 = vld [vmem:[%s5770_s9 + $0x80] ss:$8 sps:$4 sm:$0xff]  }
0x162e   : > { %4486 = vmatpush3.bf16.xpose.msra.mxu1 %v2916_v28  ;;  %4487 = vmatprep.mubr.msk.bf16.mxu1 %vm4836_vm0, %v4834_v4  ;;  %v4680_v28 = vld [vmem:[%s5770_s9 + $0x84] ss:$8 sps:$4 sm:$0xff]  }
0x162f   : > { %4497 = vmatprep.subr.bf16.mxu1 %v4834_v4 }
0x1635   : > { %4488 = vmatmul.mubr.msk.bf16.vlgmr.msra.gmra.mrb[52].mxu1 %vm901_vm1, %v2909_v29 }
0x1636   : > { %4501 = vmatprep.mubr.msk.bf16.mxu1 %vm4836_vm0, %v4834_v4 }
0x1700   : > { %v2842_v33 = vpop.f32.mrb[48].mxu1 }
0x1701   : > { %v4475_v34 = vpop.f32.mrb[49].mxu1 }
0x1702   : > { %v2845_v35 = vpop.f32.mrb[50].mxu1 }
0x1703   : > { %v2849_v36 = vpack.c.bf16 %v2845_v35, %v2842_v33  ;;  %v4476_v37 = vpop.f32.mrb[51].mxu1 }
0x1705   : > { %4482 = vmatmul.mubr.msk.bf16.vlgmr.msra.gmra.mrb[52].mxu0 %vm901_vm1, %v2849_v36 }
0x1706   : > { %4493 = vmatprep.mubr.msk.bf16.mxu0 %vm4836_vm0, %v4834_v4 }
0x1708   : > { %v2952_v38 = vpop.f32.mrb[52].mxu1 }
0x1709   : > { %v2959_v40 = vmul.f32 0.17677669, %v2952_v38  ;;  %v4489_v41 = vpop.f32.mrb[53].mxu1 }
0x170a   : > { %v2955_v43 = vpop.f32.mrb[54].mxu1  ;;  %v4684_v41 = vld [vmem:[%s5770_s9 + $0xa0] ss:$8 sps:$4 sm:$0xff]  }
0x170b   : > { %v2960_v44 = vmul.f32 0.17677669, %v2955_v43  ;;  %v4490_v45 = vpop.f32.mrb[55].mxu1  ;;  %v2961_v46 = vsel %vm951_vm2, %v2959_v40, -inf  ;;  %v4689_v43 = vld [vmem:[%s5770_s9 + $0xb4] ss:$8 sps:$4 sm:$0xff]  }
0x170c   : > { %2962 = vmax.xlane.f32.xlu1 %v2961_v46  ;;  %v4692_v45 = vld [vmem:[%s5770_s9 + $0xc4] ss:$8 sps:$4 sm:$0xff]   ;;  %v4690_v46 = vld [vmem:[%s5770_s9 + $0xc0] ss:$8 sps:$4 sm:$0xff]  }
0x170d   : > { %v2964_v47 = vsel %vm951_vm2, %v2960_v44, -inf }
0x170e   : > { %2965 = vmax.xlane.f32.xlu0 %v2964_v47  ;;  %v4695_v47 = vld [vmem:[%s5770_s9 + $0xd4] ss:$8 sps:$4 sm:$0xff]  }
0x171d   : > { %2984 = vrot.lane.b32.xlu1 %v5440_v54, %s5793_s1  ;;  %v4676_v54 = vld [vmem:[%s5766_s5 + $0x70] sm:$0xff]   ;;  %s5740_s1 = scalar_lea.vmem %s5779_s18, %s4168_s26 }
0x171e   : > { %4498 = vmatpush3.bf16.msra.mxu1 %v4676_v54 }
0x171f   : > { %4499 = vmatprep.subr.bf16.mxu1 %v4834_v4 }
0x1799   : > { %v2963_v48 = vpop.xlane.xlu1 %2962 }
0x179a   : > { %v2967_v49 = vsub.f32 %v2959_v40, %v2963_v48  ;;  %v4686_v40 = vld [vmem:[%s5770_s9 + $0xa4] ss:$8 sps:$4 sm:$0xff]   ;;  %v4693_v48 = vld [vmem:[%s5770_s9 + $0xd0] ss:$8 sps:$4 sm:$0xff]  }
0x179b   : > { %v2966_v50 = vpop.xlane.xlu0 %2965 }
0x179c   : > { %v2969_v51 = vmul.f32 1.442695, %v2967_v49  ;;  %v2968_v14 = vsub.f32 %v2960_v44, %v2966_v50  ;;  %v4687_v44 = vld [vmem:[%s5770_s9 + $0xb0] ss:$8 sps:$4 sm:$0xff]   ;;  %v4698_v49 = vld [vmem:[%s5770_s9 + $0xe4] ss:$8 sps:$4 sm:$0xff]  }
0x179d   : > { %v2985_v52 = vpop.permute.xlu1 %2984  ;;  %v4696_v50 = vld [vmem:[%s5770_s9 + $0xe0] ss:$8 sps:$4 sm:$0xff]  }
0x179e   : > { %4802 = vpow2.f32 %v2969_v51  ;;  %v2971_v53 = vmul.f32 1.442695, %v2968_v14  ;;  %4492 = vmatpush3.bf16.msra.mxu0 %v2985_v52  ;;  %v4701_v51 = vld [vmem:[%s5770_s9 + $0xf4] ss:$8 sps:$4 sm:$0xff]   ;;  %v4699_v14 = vld [vmem:[%s5770_s9 + $0xf0] ss:$8 sps:$4 sm:$0xff]  }
0x179f   : > { %3255 = vmatprep.subr.bf16.mxu0 %v4680_v28 }
0x17a0   : > { %4804 = vpow2.f32 %v2971_v53 }
0x17a8   : > { %v4803_v57 = vpop.eup %4802 }
0x17a9   : > { %v2973_v60 = vsel %vm951_vm2, %v4803_v57, 0.0 }
0x17aa   : > { %v4805_v39 = vpop.eup %4804  ;;  %2974 = vadd.xlane.f32.xlu0 %v2973_v60 }
0x17ab   : > { %v2976_v61 = vsel %vm951_vm2, %v4805_v39, 0.0 }
0x17ae   : > { %2977 = vadd.xlane.f32.xlu0 %v2976_v61 }
0x17d8   : > { %v2899_v62 = vpop.f32.mrb[52].mxu0 }
0x17d9   : > { %v2906_v63 = vadd.f32 %v2899_v62, %v5510_v59  ;;  %v4483_v0 = vpop.f32.mrb[53].mxu0  ;;  %v4677_v59 = vld [vmem:[%s5766_s5 + $0x78] sm:$0xff]  }
0x17da   : > { %v2902_v1 = vpop.f32.mrb[54].mxu0  ;;  %4500 = vmatpush3.bf16.msra.mxu1 %v4677_v59  ;;  %v4705_v59 = vld [vmem:[%s5772_s11 + $0x88] sm:$0xff]  }
0x17db   : > { %v2907_v2 = vadd.f32 %v2902_v1, %v5512_v42  ;;  %v4484_v13 = vpop.f32.mrb[55].mxu0 }
0x17dc   : > { %v4062_v13 = vld [vmem:[%s5769_s8 + $0x1] ss:$0 sm:$0xff] }
0x1837   : > { %v2975_v3 = vpop.xlane.xlu0 %2974 }
0x1838   : > { %4806 = vrcp.f32 %v2975_v3 }
0x183b   : > { %v2978_v5 = vpop.xlane.xlu0 %2977 }
0x183c   : > { %4808 = vrcp.f32 %v2978_v5 }
0x1842   : > { %v4807_v6 = vpop.eup %4806 }
0x1843   : > { %v2981_v8 = vmul.f32 %v4807_v6, %v4803_v57 }
0x1846   : > { %v4809_v7 = vpop.eup %4808 }
0x1847   : > { %v2982_v9 = vmul.f32 %v4809_v7, %v4805_v39 }
0x1849   : > { %v2983_v10 = vpack.c.bf16 %v2982_v9, %v2981_v8  ;;  %v4702_v8 = vld [vmem:[%s5772_s11 + $0xc0] sm:$0xff]  }
0x184a   : > { %v4703_v9 = vld [vmem:[%s5772_s11 + $0x80] sm:$0xff]   ;;  %4265 = vmatprep.subr.bf16.mxu1 %v4702_v8 }
0x184b   : > { %4494 = vmatmul.mubr.msk.bf16.vlgmr.msra.gmra.mrb[56].mxu0 %vm951_vm2, %v2983_v10  ;;  %v4704_v10 = vld [vmem:[%s5772_s11 + $0xc8] sm:$0xff]  }
0x184c   : > { %3287 = vmatprep.mubr.bf16.mxu0 %v4835_v30  ;;  %v4058_v30 = vld [vmem:[%s5767_s6 + $0x1] ss:$0 sm:$0xff]  ;;  %3256 = vmatpush1.bf16.msra.mxu0 %v4678_v27 }
0x191e   : > { %v3024_v42 = vpop.f32.mrb[56].mxu0 }
0x191f   : > { %v4495_v11 = vpop.f32.mrb[57].mxu0 }
0x1920   : > { %v3027_v16 = vpop.f32.mrb[58].mxu0  ;;  %v4707_v11 = vld [vmem:[%s5772_s11 + $0x90] sm:$0xff]  }
0x1921   : > { %v3031_v17 = vpack.c.bf16 %v3027_v16, %v3024_v42  ;;  %v4496_v18 = vpop.f32.mrb[59].mxu0  ;;  %v4706_v42 = vld [vmem:[%s5772_s11 + $0xd0] sm:$0xff]   ;;  %v4708_v16 = vld [vmem:[%s5772_s11 + $0xd8] sm:$0xff]  }
0x1922   : > { %v4710_v18 = vld [vmem:[%s5772_s11 + $0xe0] sm:$0xff]  }
0x1923   : > { %4502 = vmatmul.mubr.msk.bf16.vlgmr.msra.gmra.mrb[56].mxu1 %vm901_vm1, %v3031_v17  ;;  %v4709_v17 = vld [vmem:[%s5772_s11 + $0x98] sm:$0xff]  }
0x1924   : > { %4266 = vmatpush3.bf16.msra.mxu1 %v4703_v9 }
0x1925   : > { %4267 = vmatprep.subr.bf16.mxu1 %v4704_v10 }
0x1928   : > { %4268 = vmatpush3.bf16.msra.mxu1 %v4705_v59 }
0x1929   : > { %4269 = vmatprep.subr.bf16.mxu1 %v4706_v42 }
0x192c   : > { %4270 = vmatpush3.bf16.msra.mxu1 %v4707_v11 }
0x192d   : > { %4271 = vmatprep.subr.bf16.mxu1 %v4708_v16 }
0x1930   : > { %4272 = vmatpush3.bf16.msra.mxu1 %v4709_v17 }
0x1931   : > { %4273 = vmatprep.subr.bf16.mxu1 %v4710_v18  ;;  %v4145_v18 = vld [vmem:[%s5773_s12 + $0x1] ss:$0 sm:$0xff] }
0x19f6   : > { %v3081_v21 = vpop.f32.mrb[56].mxu1 }
0x19f7   : > { %v3088_v31 = vadd.f32 %v3081_v21, %v2906_v63  ;;  %v4503_v56 = vpop.f32.mrb[57].mxu1  ;;  %v4061_v63 = vld [vmem:[%s5768_s7 + $0x1] ss:$0 sm:$0xff] }
0x19f8   : > { %v3084_v22 = vpop.f32.mrb[58].mxu1  ;;  %v4711_v21 = vld [vmem:[%s5772_s11 + $0xa0] sm:$0xff]   ;;  %v4713_v56 = vld [vmem:[%s5772_s11 + $0xa8] sm:$0xff]  }
0x19f9   : > { %v3090_v12 = vadd.f32 %v3088_v31, %v5327_v19  ;;  %v3089_v15 = vadd.f32 %v3084_v22, %v2907_v2  ;;  %v4504_v23 = vpop.f32.mrb[59].mxu1  ;;  %v4683_v19 = vld [vmem:[%s5770_s9 + $0x94] ss:$8 sps:$4 sm:$0xff]   ;;  %4274 = vmatpush3.bf16.msra.mxu1 %v4711_v21  ;;  %v4712_v31 = vld [vmem:[%s5772_s11 + $0xe8] sm:$0xff]  }
0x19fa   : > { %3257 = vmatprep.subr.bf16.mxu0 %v4683_v19  ;;  %4275 = vmatprep.subr.bf16.mxu1 %v4712_v31  ;;  %v4714_v22 = vld [vmem:[%s5772_s11 + $0xf0] sm:$0xff]   ;;  %v4079_v23 = vld [vmem:[%s5771_s10 + $0x2] sm:$0x3] }
0x19fb   : > { %v3091_v24 = vadd.f32 %v3089_v15, %v5330_v20  ;;  %v3100_v25 = vadd.f32 %v4058_v30, %v3090_v12  ;;  %v4681_v20 = vld [vmem:[%s5770_s9 + $0x90] ss:$8 sps:$4 sm:$0xff]  }
0x19fc   : > { %3258 = vmatpush1.bf16.msra.mxu0 %v4681_v20  ;;  %v4716_v12 = vld [vmem:[%s5772_s11 + $0xf8] sm:$0xff]  }
0x19fd   : > { %3106 = vadd.xlane.f32.xlu0 %v3100_v25  ;;  %v5567_v26 = vadd.f32 %v4058_v30, %v3091_v24  ;;  %3259 = vmatprep.subr.bf16.mxu0 %v4686_v40  ;;  %v4715_v30 = vld [vmem:[%s5772_s11 + $0xb0] sm:$0xff]   ;;  %v4717_v15 = vld [vmem:[%s5772_s11 + $0xb8] sm:$0xff]   ;;  %v3168_v24 = vrot.slane %v4079_v23, %v5061_v55 }
0x19fe   : > { %4276 = vmatpush3.bf16.msra.mxu1 %v4713_v56  ;;  %v4718_v56 = vld [vmem:[%s5776_s15] sm:$0xff]  }
0x19ff   : > { %4277 = vmatprep.subr.bf16.mxu1 %v4714_v22  ;;  %v4719_v22 = vld [vmem:[%s5776_s15 + $0x8] sm:$0xff]  }
0x1a00   : > { %3260 = vmatpush1.bf16.msra.mxu0 %v4684_v41 }
0x1a01   : > { %3108 = vadd.xlane.f32.xlu0 %v5567_v26  ;;  %3261 = vmatprep.subr.bf16.mxu0 %v4689_v43 }
0x1a02   : > { %4278 = vmatpush3.bf16.msra.mxu1 %v4715_v30 }
0x1a03   : > { %4279 = vmatprep.subr.bf16.mxu1 %v4716_v12 }
0x1a04   : > { %3262 = vmatpush1.bf16.msra.mxu0 %v4687_v44 }
0x1a05   : > { %3263 = vmatprep.subr.bf16.mxu0 %v4692_v45 }
0x1a06   : > { %4280 = vmatpush3.bf16.msra.mxu1 %v4717_v15 }
0x1a08   : > { %3264 = vmatpush1.bf16.msra.mxu0 %v4690_v46 }
0x1a09   : > { %3265 = vmatprep.subr.bf16.mxu0 %v4695_v47 }
0x1a0c   : > { %3266 = vmatpush1.bf16.msra.mxu0 %v4693_v48 }
0x1a0d   : > { %3267 = vmatprep.subr.bf16.mxu0 %v4698_v49 }
0x1a10   : > { %3268 = vmatpush1.bf16.msra.mxu0 %v4696_v50 }
0x1a11   : > { %3269 = vmatprep.subr.bf16.mxu0 %v4701_v51 }
0x1a14   : > { %3270 = vmatpush1.bf16.msra.mxu0 %v4699_v14 }
0x1a15   : > { %4505 = vmatprep.subr.bf16.mxu0 %v4834_v4 }
0x1a8a   : > { %v3107_v29 = vpop.xlane.xlu0 %3106 }
0x1a8b   : > { %v3110_v32 = vmul.f32 0.0078125, %v3107_v29 }
0x1a8d   : > { %v3112_v33 = vsub.f32 %v3100_v25, %v3110_v32  ;;  %v3172_v25 = vrot.slane %v4079_v23, %v5068_v58  ;;  %v4720_v23 = vld [vmem:[%s5776_s15 + $0x10] sm:$0xff]  }
0x1a8e   : > { %v3109_v34 = vpop.xlane.xlu0 %3108 }
0x1a8f   : > { %v3111_v35 = vmul.f32 0.0078125, %v3109_v34  ;;  %v3114_v36 = vmul.f32 %v3112_v33, %v3112_v33 }
0x1a91   : > { %v3113_v37 = vsub.f32 %v5567_v26, %v3111_v35  ;;  %3116 = vadd.xlane.f32.xlu0 %v3114_v36 }
0x1a93   : > { %v3115_v38 = vmul.f32 %v3113_v37, %v3113_v37 }
0x1a95   : > { %3118 = vadd.xlane.f32.xlu0 %v3115_v38 }
0x1b1e   : > { %v3117_v52 = vpop.xlane.xlu0 %3116 }
0x1b1f   : > { %v3120_v53 = vmul.f32 0.0078125, %v3117_v52 }
0x1b21   : > { %v3122_v57 = vadd.f32 1e-05, %v3120_v53 }
0x1b22   : > { %v3119_v60 = vpop.xlane.xlu0 %3118 }
0x1b23   : > { %4810 = vrsqrt.f32 %v3122_v57  ;;  %v3121_v39 = vmul.f32 0.0078125, %v3119_v60 }
0x1b25   : > { %v3123_v61 = vadd.f32 1e-05, %v3121_v39 }
0x1b27   : > { %4812 = vrsqrt.f32 %v3123_v61 }
0x1b2d   : > { %v4811_v54 = vpop.eup %4810 }
0x1b2e   : > { %v3126_v62 = vmul.f32 %v4811_v54, %v3112_v33 }
0x1b30   : > { %v3134_v2 = vmul.f32 %v4061_v63, %v3126_v62 }
0x1b31   : > { %v4813_v0 = vpop.eup %4812 }
0x1b32   : > { %v3127_v1 = vmul.f32 %v4813_v0, %v3113_v37  ;;  %v3142_v5 = vadd.f32 %v4062_v13, %v3134_v2 }
0x1b34   : > { %v3135_v3 = vmul.f32 %v4061_v63, %v3127_v1 }
0x1b36   : > { %v3143_v6 = vadd.f32 %v4062_v13, %v3135_v3 }
0x1b38   : > { %v3144_v7 = vpack.c.bf16 %v3143_v6, %v3142_v5 }
0x1b3a   : > { %3288 = vmatmul.mubr.bf16.vlgmr.msra.gmra.mrb[60].mxu0 %v3144_v7 }
0x1b3b   : > { %4521 = vmatprep.mubr.msk.bf16.mxu0 %vm4836_vm0, %v4834_v4  ;;  %4506 = vmatpush3.bf16.msra.mxu0 %v4718_v56 }
0x1b3c   : > { %4507 = vmatprep.subr.bf16.mxu0 %v4834_v4 }
0x1b3f   : > { %4508 = vmatpush3.bf16.msra.mxu0 %v4719_v22 }
0x1b40   : > { %4509 = vmatprep.subr.bf16.mxu0 %v4834_v4 }
0x1b43   : > { %4510 = vmatpush3.bf16.msra.mxu0 %v4720_v23 }
0x1b44   : > { %4511 = vmatprep.subr.bf16.mxu0 %v4834_v4 }
0x1c0d   : > { %v3289_v27 = vpop.f32.mrb[60].mxu0 }
0x1c0e   : > { %v3290_v28 = vadd.f32 %v3289_v27, %v3168_v24  ;;  %v3291_v19 = vpop.f32.mrb[61].mxu0  ;;  %v4723_v27 = vld [vmem:[%s5776_s15 + $0x28] sm:$0xff]  }
0x1c0f   : > { %v3292_v20 = vadd.f32 %v3291_v19, %v3172_v25  ;;  %v3293_v29 = vpop.f32.mrb[62].mxu0  ;;  %v4725_v19 = vld [vmem:[%s5776_s15 + $0x38] sm:$0xff]  }
0x1c10   : > { %v3298_v32 = vmul.f32 %v3290_v28, %v3290_v28  ;;  %v3294_v33 = vadd.f32 %v3293_v29, %v3168_v24  ;;  %v3295_v34 = vpop.f32.mrb[63].mxu0  ;;  %v4721_v24 = vld [vmem:[%s5776_s15 + $0x18] sm:$0xff]  }
0x1c11   : > { %v3299_v35 = vmul.f32 %v3292_v20, %v3292_v20  ;;  %v3296_v36 = vadd.f32 %v3295_v34, %v3172_v25  ;;  %4512 = vmatpush3.bf16.msra.mxu0 %v4721_v24  ;;  %v4722_v25 = vld [vmem:[%s5776_s15 + $0x20] sm:$0xff]  }
0x1c12   : > { %v3302_v37 = vmul.f32 %v3298_v32, %v3290_v28  ;;  %v3300_v38 = vmul.f32 %v3294_v33, %v3294_v33  ;;  %4513 = vmatprep.subr.bf16.mxu0 %v4834_v4  ;;  %v4146_v34 = vld [vmem:[%s5774_s13] ss:$0 sm:$0xff] }
0x1c13   : > { %v3303_v40 = vmul.f32 %v3299_v35, %v3292_v20  ;;  %v3301_v41 = vmul.f32 %v3296_v36, %v3296_v36 }
0x1c14   : > { %v3306_v43 = vmul.f32 0.044715, %v3302_v37  ;;  %v3304_v44 = vmul.f32 %v3300_v38, %v3294_v33 }
0x1c15   : > { %v3307_v45 = vmul.f32 0.044715, %v3303_v40  ;;  %v3305_v55 = vmul.f32 %v3301_v41, %v3296_v36  ;;  %4514 = vmatpush3.bf16.msra.mxu0 %v4722_v25 }
0x1c16   : > { %v3310_v46 = vadd.f32 %v3306_v43, %v3290_v28  ;;  %v3308_v58 = vmul.f32 0.044715, %v3304_v44  ;;  %4515 = vmatprep.subr.bf16.mxu0 %v4834_v4  ;;  %v4148_v43 = vld [vmem:[%s5777_s16] ss:$0 sm:$0xff] }
0x1c17   : > { %v3311_v47 = vadd.f32 %v3307_v45, %v3292_v20  ;;  %v3309_v48 = vmul.f32 0.044715, %v3305_v55 }
0x1c18   : > { %v3314_v49 = vmul.f32 0.7978846, %v3310_v46  ;;  %v3312_v50 = vadd.f32 %v3308_v58, %v3294_v33 }
0x1c19   : > { %v3315_v51 = vmul.f32 0.7978846, %v3311_v47  ;;  %v3313_v14 = vadd.f32 %v3309_v48, %v3296_v36  ;;  %4516 = vmatpush3.bf16.msra.mxu0 %v4723_v27 }
0x1c1a   : > { %4814 = vtanh.f32 %v3314_v49  ;;  %v3316_v52 = vmul.f32 0.7978846, %v3312_v50  ;;  %4517 = vmatprep.subr.bf16.mxu0 %v4834_v4 }
0x1c1b   : > { %4816 = vtanh.f32 %v3315_v51  ;;  %v3317_v53 = vmul.f32 0.7978846, %v3313_v14 }
0x1c1c   : > { %4818 = vtanh.f32 %v3316_v52 }
0x1c1d   : > { %4820 = vtanh.f32 %v3317_v53 }
0x1c24   : > { %v4815_v57 = vpop.eup %4814 }
0x1c25   : > { %v4817_v60 = vpop.eup %4816  ;;  %v3322_v39 = vadd.f32 1.0, %v4815_v57 }
0x1c26   : > { %v4819_v61 = vpop.eup %4818  ;;  %v3323_v54 = vadd.f32 1.0, %v4817_v60 }
0x1c27   : > { %v4821_v62 = vpop.eup %4820  ;;  %v3326_v63 = vmul.f32 0.5, %v3322_v39  ;;  %v3324_v0 = vadd.f32 1.0, %v4819_v61 }
0x1c28   : > { %v3325_v1 = vadd.f32 1.0, %v4821_v62  ;;  %v3327_v2 = vmul.f32 0.5, %v3323_v54 }
0x1c29   : > { %v3328_v13 = vmul.f32 0.5, %v3324_v0  ;;  %v3330_v5 = vmul.f32 %v3326_v63, %v3290_v28  ;;  %v4724_v28 = vld [vmem:[%s5776_s15 + $0x30] sm:$0xff]  }
0x1c2a   : > { %v3329_v3 = vmul.f32 0.5, %v3325_v1  ;;  %v3331_v7 = vmul.f32 %v3327_v2, %v3292_v20  ;;  %4518 = vmatpush3.bf16.msra.mxu0 %v4724_v28 }
0x1c2b   : > { %v3332_v6 = vmul.f32 %v3328_v13, %v3294_v33  ;;  %4519 = vmatprep.subr.bf16.mxu0 %v4834_v4  ;;  %v3655_v4 = vld [vmem:[%s5778_s17] sm:$0xf] }
0x1c2c   : > { %v3333_v8 = vmul.f32 %v3329_v3, %v3296_v36  ;;  %v4147_v36 = vld [vmem:[%s5775_s14] ss:$0 sm:$0xff]  ;;  %4543 = vmatprep.subr.msk.bf16.mxu1 %vm3697_vm3, %v3655_v4  ;;  %v3699_v41 = vsel %vm3697_vm3, %v3655_v4, 0 }
0x1c2d   : > { %v3334_v9 = vpack.c.bf16 %v3332_v6, %v3330_v5 }
0x1c2e   : > { %v3335_v10 = vpack.c.bf16 %v3333_v8, %v3331_v7  ;;  %4520 = vmatpush3.bf16.msra.mxu0 %v4725_v19 }
0x1c30   : > { %3497 = vmatprep.mubr.bf16.mxu1 %v3335_v10 }
0x1c31   : > { %3498 = vmatmul.mubr.bf16.vlgmr.msra.gmra.mrb[60].mxu1 %v3334_v9 }
0x1c32   : > { %4526 = vmatpush3.bf16.msra.mxu1 %v3699_v41 }
0x1d04   : > { %v4281_v59 = vpop.f32.mrb[60].mxu1 }
0x1d05   : > { %v4282_v42 = vpop.f32.mrb[61].mxu1 }
0x1d06   : > { %v4284_v11 = vpop.f32.mrb[62].mxu1 }
0x1d07   : > { %v4285_v16 = vpop.f32.mrb[63].mxu1 }
0x1d08   : > { %v4286_v17 = vadd.f32 %v4285_v16, %v4284_v11 }
0x1d0a   : > { %v3505_v21 = vadd.f32 %v4286_v17, %v5567_v26 }
0x1d0c   : > { %v3514_v31 = vadd.f32 %v4145_v18, %v3505_v21 }
0x1d0e   : > { %3517 = vadd.xlane.f32.xlu1 %v3514_v31 }
0x1d9b   : > { %v3518_v30 = vpop.xlane.xlu1 %3517 }
0x1d9c   : > { %v3519_v12 = vmul.f32 0.0078125, %v3518_v30 }
0x1d9e   : > { %v3520_v15 = vsub.f32 %v3514_v31, %v3519_v12 }
0x1da0   : > { %v3521_v26 = vmul.f32 %v3520_v15, %v3520_v15 }
0x1da2   : > { %3522 = vadd.xlane.f32.xlu0 %v3521_v26 }
0x1e2f   : > { %v3523_v20 = vpop.xlane.xlu0 %3522 }
0x1e30   : > { %v3524_v29 = vmul.f32 0.0078125, %v3523_v20 }
0x1e32   : > { %v3525_v32 = vadd.f32 1e-05, %v3524_v29 }
0x1e34   : > { %4822 = vrsqrt.f32 %v3525_v32 }
0x1e3e   : > { %v4823_v33 = vpop.eup %4822 }
0x1e3f   : > { %v3527_v35 = vmul.f32 %v4823_v33, %v3520_v15 }
0x1e41   : > { %v3534_v37 = vmul.f32 %v4146_v34, %v3527_v35 }
0x1e43   : > { %v3541_v38 = vadd.f32 %v4147_v36, %v3534_v37 }
0x1e45   : > { %v3542_v40 = vpack.c.bf16 %v3541_v38, %v3541_v38 }
0x1e47   : > { %4522 = vmatmul.mubr.bf16.vlgmr.msra.gmra.mrb[64].mxu0 %v3542_v40 }
0x1f1a   : > { %v3648_v44 = vpop.f32.mrb[64].mxu0 }
0x1f1b   : > { %v3649_v45 = vadd.f32 %v4148_v43, %v3648_v44  ;;  %v4523_v55 = vpop.f32.mrb[65].mxu0 }
0x1f1c   : > { %v3651_v46 = vpop.f32.mrb[66].mxu0 }
0x1f1d   : > { %v3654_v58 = vpack.c.bf16 %v3649_v45, %v3649_v45  ;;  %v4524_v47 = vpop.f32.mrb[67].mxu0 }
0x1f1f   : > { %3656 = vxpose.xlu0.c.b16.start.end [1/1] (short) %v3654_v58, 128 }
0x1f85   : > { %v3664_v48 = vpop.trf.xlu0 }
0x1f86   : > { %4527 = vmatprep.mubr.msk.bf16.mxu1 %vm3672_vm4, %v3664_v48 }
0x1f89   : > { %v3665_v49 = vpop.trf.xlu0 }
0x1f8a   : > { %4528 = vmatmul.mubr.msk.bf16.vlgmr.msra.gmra.mrb[64].mxu1 %vm3672_vm4, %v3665_v49 }
0x1f8d   : > { %v3666_v50 = vpop.trf.xlu0 }
0x1f8e   : > { %4531 = vmatprep.mubr.msk.bf16.mxu1 %vm3672_vm4, %v3666_v50 }
0x1f91   : > { %v3667_v51 = vpop.trf.xlu0 }
0x1f92   : > { %4532 = vmatmul.mubr.msk.bf16.gmra.mrb[68].mxu1 %vm3672_vm4, %v3667_v51 }
0x1f95   : > { %v3668_v14 = vpop.trf.xlu0 }
0x1f96   : > { %4535 = vmatprep.mubr.msk.bf16.mxu1 %vm3672_vm4, %v3668_v14 }
0x1f99   : > { %v3669_v52 = vpop.trf.xlu0 }
0x1f9a   : > { %4536 = vmatmul.mubr.msk.bf16.gmra.mrb[72].mxu1 %vm3672_vm4, %v3669_v52 }
0x1f9d   : > { %v3670_v53 = vpop.trf.xlu0 }
0x1f9e   : > { %4539 = vmatprep.mubr.msk.bf16.mxu1 %vm3672_vm4, %v3670_v53 }
0x1fa1   : > { %v3671_v57 = vpop.trf.xlu0 }
0x1fa2   : > { %4540 = vmatmul.mubr.msk.bf16.gmra.mrb[76].mxu1 %vm3672_vm4, %v3671_v57 }
0x205d   : > { %v4529_v60 = vpop.f32.mrb[64].mxu1 }
0x205e   : > { %3800 = vst [vmem:[%s5740_s1 + $0x10] sm:$0xff] %v4529_v60  ;;  %v3735_v39 = vpop.f32.mrb[65].mxu1 }
0x205f   : > { %3798 = vst [vmem:[%s5740_s1] sm:$0xff] %v3735_v39  ;;  %v4530_v61 = vpop.f32.mrb[66].mxu1 }
0x2060   : > { %3801 = vst [vmem:[%s5740_s1 + $0x18] sm:$0xff] %v4530_v61  ;;  %v3738_v54 = vpop.f32.mrb[67].mxu1 }
0x2061   : > { %3799 = vst [vmem:[%s5740_s1 + $0x8] sm:$0xff] %v3738_v54 }
0x2065   : > { %v4533_v62 = vpop.f32.mrb[68].mxu1 }
0x2066   : > { %3804 = vst [vmem:[%s5740_s1 + $0x30] sm:$0xff] %v4533_v62  ;;  %v3751_v63 = vpop.f32.mrb[69].mxu1 }
0x2067   : > { %3802 = vst [vmem:[%s5740_s1 + $0x20] sm:$0xff] %v3751_v63  ;;  %v4534_v0 = vpop.f32.mrb[70].mxu1 }
0x2068   : > { %3805 = vst [vmem:[%s5740_s1 + $0x38] sm:$0xff] %v4534_v0  ;;  %v3754_v1 = vpop.f32.mrb[71].mxu1 }
0x2069   : > { %3803 = vst [vmem:[%s5740_s1 + $0x28] sm:$0xff] %v3754_v1 }
0x206d   : > { %v4537_v2 = vpop.f32.mrb[72].mxu1 }
0x206e   : > { %3808 = vst [vmem:[%s5740_s1 + $0x50] sm:$0xff] %v4537_v2  ;;  %v3767_v13 = vpop.f32.mrb[73].mxu1 }
0x206f   : > { %3806 = vst [vmem:[%s5740_s1 + $0x40] sm:$0xff] %v3767_v13  ;;  %v4538_v3 = vpop.f32.mrb[74].mxu1 }
0x2070   : > { %3809 = vst [vmem:[%s5740_s1 + $0x58] sm:$0xff] %v4538_v3  ;;  %v3770_v5 = vpop.f32.mrb[75].mxu1 }
0x2071   : > { %3807 = vst [vmem:[%s5740_s1 + $0x48] sm:$0xff] %v3770_v5 }
0x2075   : > { %v4541_v6 = vpop.f32.mrb[76].mxu1 }
0x2076   : > { %3812 = vst [vmem:[%s5740_s1 + $0x70] sm:$0xff] %v4541_v6  ;;  %v3783_v7 = vpop.f32.mrb[77].mxu1 }
0x2077   : > { %3810 = vst [vmem:[%s5740_s1 + $0x60] sm:$0xff] %v3783_v7  ;;  %v4542_v8 = vpop.f32.mrb[78].mxu1 }
0x2078   : > { %3813 = vst [vmem:[%s5740_s1 + $0x78] sm:$0xff] %v4542_v8  ;;  %v3786_v9 = vpop.f32.mrb[79].mxu1 }
0x2079   : > { %3811 = vst [vmem:[%s5740_s1 + $0x68] sm:$0xff] %v3786_v9 }
0x207a PF: > { %s28_s27 = sadd.s32 1, %s4832_s27  }
0x207b   : > { %p25_p4 = scmp.ge.s32.totalorder %s28_s27, 4  }
0x207d   :  { %27 = sbr.rel (!%p25_p4) target bundleno = 4 (0x4), region = 134 }

</bundles_post_ra>
